<compile_context>
chip_gen: v7x
topology: tpu7x:2x2x1
jax: 0.10.0
libtpu: 0.0.40
codegen_flags: <defaults>
</compile_context>

<pallas_src>
import functools

import jax
import jax.numpy as jnp
from jax.experimental import pallas as pl
from jax.experimental.pallas import tpu as pltpu


# ------------------------------ Pallas kernels ------------------------------

def _attn_and_proj(q, k, v, pw, num_heads):
    """Multi-head attention + fused output projection (bias added by caller).

    q: (HW, dim) already scaled; k, v: (L, dim); pw: (dim, dim).
    Heads are sliced from the packed channel axis (static slices, unrolled).
    """
    HW, dim = q.shape
    hd = dim // num_heads
    acc = jnp.zeros((HW, dim), jnp.float32)
    for h in range(num_heads):
        lo, hi = h * hd, (h + 1) * hd
        qh = q[:, lo:hi]                       # (HW, hd)
        kh = k[:, lo:hi]                       # (L,  hd)
        vh = v[:, lo:hi]                       # (L,  hd)
        # scores: contract head_dim of q with head_dim of k (no explicit .T)
        s = jax.lax.dot_general(qh, kh, (((1,), (1,)), ((), ())),
                                preferred_element_type=jnp.float32)   # (HW, L)
        m = jnp.max(s, axis=-1, keepdims=True)
        p = jnp.exp(s - m)
        inv = pl.reciprocal(jnp.sum(p, axis=-1, keepdims=True), approx=True)
        oh = jnp.dot(p, vh, preferred_element_type=jnp.float32) * inv  # (HW, hd)
        # fold the output projection into the head loop: o @ W == sum_h o_h @ W_h
        acc = acc + jnp.dot(oh, pw[lo:hi, :],
                            preferred_element_type=jnp.float32)       # (HW, dim)
    return acc


def _ea_kernel_sr(x_ref, p_ref, qw_ref, srw_ref, srb_ref, ng_ref, nb_ref,
                  kvw_ref, pw_ref, pb_ref, o_ref, *, num_heads, scale):
    """Fused EfficientAttention forward for one batch sample (sr_ratio > 1)."""
    dim = x_ref.shape[-1]
    # q projection (qkv_bias=False -> no bias); softmax scale folded into q.
    q = jnp.dot(x_ref[...], qw_ref[...],
                preferred_element_type=jnp.float32) * scale            # (HW, dim)
    # spatial-reduction Conv2d(k=stride=sr) realized as matmul over patches,
    # followed by LayerNorm(dim), eps=1e-5 (PyTorch default).
    xr = jnp.dot(p_ref[...], srw_ref[...],
                 preferred_element_type=jnp.float32) + srb_ref[...]    # (L, dim)
    mu = jnp.mean(xr, axis=-1, keepdims=True)
    var = jnp.mean((xr - mu) ** 2, axis=-1, keepdims=True)
    xr = (xr - mu) * jax.lax.rsqrt(var + 1e-5) * ng_ref[...] + nb_ref[...]
    # kv projection (qkv_bias=False -> no bias); channel split is (a=2, m, c).
    kv = jnp.dot(xr, kvw_ref[...], preferred_element_type=jnp.float32)  # (L, 2*dim)
    k = kv[:, :dim]
    v = kv[:, dim:]
    acc = _attn_and_proj(q, k, v, pw_ref[...], num_heads)
    o_ref[...] = acc + pb_ref[...]


def _ea_kernel_nosr(x_ref, qw_ref, kvw_ref, pw_ref, pb_ref, o_ref,
                    *, num_heads, scale):
    """Fused EfficientAttention forward for one batch sample (sr_ratio == 1)."""
    dim = x_ref.shape[-1]
    q = jnp.dot(x_ref[...], qw_ref[...],
                preferred_element_type=jnp.float32) * scale
    kv = jnp.dot(x_ref[...], kvw_ref[...], preferred_element_type=jnp.float32)
    k = kv[:, :dim]
    v = kv[:, dim:]
    acc = _attn_and_proj(q, k, v, pw_ref[...], num_heads)
    o_ref[...] = acc + pb_ref[...]


# ------------------------------ forward wrapper ------------------------------

def efficient_attention(params, x, h, w, *, num_heads, sr_ratio):
    """Pallas implementation of EfficientAttention.forward (dropout_p=0)."""
    B, HW, dim = x.shape
    scale = (dim // num_heads) ** (-0.5)

    if sr_ratio > 1:
        # Non-overlapping patch extraction for the Conv2d(k=stride=sr); done
        # once in the wrapper (pure layout), then fed to the fused kernel.
        hh, ww = h // sr_ratio, w // sr_ratio
        L = hh * ww
        kpix = dim * sr_ratio * sr_ratio
        patches = (x.reshape(B, hh, sr_ratio, ww, sr_ratio, dim)
                     .transpose(0, 1, 3, 5, 2, 4)        # (B, hh, ww, c, kh, kw)
                     .reshape(B, L, kpix))
        kern = functools.partial(_ea_kernel_sr, num_heads=num_heads, scale=scale)
        in_specs = [
            pl.BlockSpec((None, HW, dim), lambda b: (b, 0, 0)),   # x (squeezed b)
            pl.BlockSpec((None, L, kpix), lambda b: (b, 0, 0)),   # patches
            pl.BlockSpec((dim, dim), lambda b: (0, 0)),           # q_w
            pl.BlockSpec((kpix, dim), lambda b: (0, 0)),          # sr_w
            pl.BlockSpec((1, dim), lambda b: (0, 0)),             # sr_b
            pl.BlockSpec((1, dim), lambda b: (0, 0)),             # norm_g
            pl.BlockSpec((1, dim), lambda b: (0, 0)),             # norm_b
            pl.BlockSpec((dim, 2 * dim), lambda b: (0, 0)),       # kv_w
            pl.BlockSpec((dim, dim), lambda b: (0, 0)),           # proj_w
            pl.BlockSpec((1, dim), lambda b: (0, 0)),             # proj_b
        ]
        args = (x, patches,
                params["q_w"],
                params["sr_w"], params["sr_b"].reshape(1, dim),
                params["norm_g"].reshape(1, dim), params["norm_b"].reshape(1, dim),
                params["kv_w"],
                params["proj_w"], params["proj_b"].reshape(1, dim))
    else:
        kern = functools.partial(_ea_kernel_nosr, num_heads=num_heads, scale=scale)
        in_specs = [
            pl.BlockSpec((None, HW, dim), lambda b: (b, 0, 0)),   # x
            pl.BlockSpec((dim, dim), lambda b: (0, 0)),           # q_w
            pl.BlockSpec((dim, 2 * dim), lambda b: (0, 0)),       # kv_w
            pl.BlockSpec((dim, dim), lambda b: (0, 0)),           # proj_w
            pl.BlockSpec((1, dim), lambda b: (0, 0)),             # proj_b
        ]
        args = (x, params["q_w"], params["kv_w"],
                params["proj_w"], params["proj_b"].reshape(1, dim))

    return pl.pallas_call(
        kern,
        out_shape=jax.ShapeDtypeStruct((B, HW, dim), jnp.float32),
        grid=(B,),
        in_specs=in_specs,
        out_specs=pl.BlockSpec((None, HW, dim), lambda b: (b, 0, 0)),
        compiler_params=pltpu.CompilerParams(
            dimension_semantics=("parallel",)),
    )(*args)


# ----------------------------- plain-JAX reference ---------------------------

def reference(params, x, h, w, *, num_heads, sr_ratio):
    B, HW, dim = x.shape
    hd = dim // num_heads
    scale = hd ** (-0.5)
    q = x @ params["q_w"]                                   # qkv_bias=False
    q = q.reshape(B, HW, num_heads, hd).transpose(0, 2, 1, 3)
    if sr_ratio > 1:
        hh, ww = h // sr_ratio, w // sr_ratio
        p = (x.reshape(B, hh, sr_ratio, ww, sr_ratio, dim)
               .transpose(0, 1, 3, 5, 2, 4)
               .reshape(B, hh * ww, dim * sr_ratio * sr_ratio))
        xr = p @ params["sr_w"] + params["sr_b"]
        mu = xr.mean(-1, keepdims=True)
        var = ((xr - mu) ** 2).mean(-1, keepdims=True)
        xr = (xr - mu) / jnp.sqrt(var + 1e-5) * params["norm_g"] + params["norm_b"]
        L = hh * ww
    else:
        xr = x
        L = HW
    kv = xr @ params["kv_w"]                                # qkv_bias=False
    kv = kv.reshape(B, L, 2, num_heads, hd).transpose(2, 0, 3, 1, 4)
    k, v = kv[0], kv[1]
    attn = jax.nn.softmax((q @ jnp.swapaxes(k, -2, -1)) * scale, axis=-1)
    o = (attn @ v).transpose(0, 2, 1, 3).reshape(B, HW, dim)
    return o @ params["proj_w"] + params["proj_b"]          # dropout_p=0 -> id


# ----------------------------------- main ------------------------------------

def make_params(key, dim, sr_ratio):
    ks = jax.random.split(key, 6)
    s = 0.05
    params = {
        # linear weights stored as (in, out) for x @ W
        "q_w": jax.random.normal(ks[0], (dim, dim), jnp.float32) * s,
        "kv_w": jax.random.normal(ks[1], (dim, 2 * dim), jnp.float32) * s,
        "proj_w": jax.random.normal(ks[2], (dim, dim), jnp.float32) * s,
        "proj_b": jax.random.normal(ks[3], (dim,), jnp.float32) * s,
    }
    if sr_ratio > 1:
        # Conv2d(dim, dim, k=sr, stride=sr) weight (out, in, kh, kw) flattened
        # to matmul form (in*kh*kw, out)
        params["sr_w"] = (
            jax.random.normal(ks[4], (dim, dim, sr_ratio, sr_ratio), jnp.float32) * s
        ).reshape(dim, dim * sr_ratio * sr_ratio).T
        params["sr_b"] = jax.random.normal(ks[5], (dim,), jnp.float32) * s
        params["norm_g"] = jnp.ones((dim,), jnp.float32)    # LayerNorm default init
        params["norm_b"] = jnp.zeros((dim,), jnp.float32)
    return params


if __name__ == "__main__":
    # module config: dim=32, num_heads=8, qkv_bias=False, dropout_p=0.0
    dim, num_heads = 32, 8
    B, h, w = 2, 8, 8
    HW = h * w

    key = jax.random.PRNGKey(0)
    kx, kp1, kp2 = jax.random.split(key, 3)
    x = jax.random.normal(kx, (B, HW, dim), jnp.float32)

    # Cover both branches of the module: sr_ratio=2 (with conv+LN) and sr_ratio=1.
    for sr_ratio, kp in ((2, kp1), (1, kp2)):
        params = make_params(kp, dim, sr_ratio)
        out = efficient_attention(params, x, h, w,
                                  num_heads=num_heads, sr_ratio=sr_ratio)
        out = jax.block_until_ready(out)
        ref = reference(params, x, h, w, num_heads=num_heads, sr_ratio=sr_ratio)
        assert out.shape == (B, HW, dim)
        # slightly looser tolerance: softmax denom uses pl.reciprocal(approx=True)
        assert jnp.allclose(out, ref, rtol=2e-3, atol=2e-3), \
            f"mismatch vs reference (sr_ratio={sr_ratio})"

    print("KERNEL_OK")
</pallas_src>

<mosaic_0001>
module attributes {stable_mosaic.version = 11 : i64} {
  func.func @_ea_kernel_sr(%arg0: i32, %arg1: memref<1x64x32xf32, #tpu.memory_space<vmem>>, %arg2: memref<1x16x128xf32, #tpu.memory_space<vmem>>, %arg3: memref<32x32xf32, #tpu.memory_space<vmem>>, %arg4: memref<128x32xf32, #tpu.memory_space<vmem>>, %arg5: memref<1x32xf32, #tpu.memory_space<vmem>>, %arg6: memref<1x32xf32, #tpu.memory_space<vmem>>, %arg7: memref<1x32xf32, #tpu.memory_space<vmem>>, %arg8: memref<32x64xf32, #tpu.memory_space<vmem>>, %arg9: memref<32x32xf32, #tpu.memory_space<vmem>>, %arg10: memref<1x32xf32, #tpu.memory_space<vmem>>, %arg11: memref<1x64x32xf32, #tpu.memory_space<vmem>>) attributes {dimension_semantics = [#tpu.dimension_semantics<parallel>], iteration_bounds = array<i64: 2>, scalar_prefetch = 0 : i64, scratch_operands = 0 : i64, tpu.core_type = #tpu.core_type<tc>, window_params = [{transform_indices = @transform_0, window_bounds = array<i64: 1, 64, 32>}, {transform_indices = @transform_1, window_bounds = array<i64: 1, 16, 128>}, {pipeline_mode = #tpu.pipeline_mode<synchronous>, transform_indices = @transform_2, window_bounds = array<i64: 32, 32>}, {pipeline_mode = #tpu.pipeline_mode<synchronous>, transform_indices = @transform_3, window_bounds = array<i64: 128, 32>}, {pipeline_mode = #tpu.pipeline_mode<synchronous>, transform_indices = @transform_4, window_bounds = array<i64: 1, 32>}, {pipeline_mode = #tpu.pipeline_mode<synchronous>, transform_indices = @transform_5, window_bounds = array<i64: 1, 32>}, {pipeline_mode = #tpu.pipeline_mode<synchronous>, transform_indices = @transform_6, window_bounds = array<i64: 1, 32>}, {pipeline_mode = #tpu.pipeline_mode<synchronous>, transform_indices = @transform_7, window_bounds = array<i64: 32, 64>}, {pipeline_mode = #tpu.pipeline_mode<synchronous>, transform_indices = @transform_8, window_bounds = array<i64: 32, 32>}, {pipeline_mode = #tpu.pipeline_mode<synchronous>, transform_indices = @transform_9, window_bounds = array<i64: 1, 32>}, {transform_indices = @transform_10, window_bounds = array<i64: 1, 64, 32>}]} {
    %c0 = arith.constant 0 : index
    %c0_0 = arith.constant 0 : index
    %c0_1 = arith.constant 0 : index
    %0 = vector.load %arg1[%c0, %c0_0, %c0_1] : memref<1x64x32xf32, #tpu.memory_space<vmem>>, vector<1x64x32xf32>
    %1 = vector.shape_cast %0 : vector<1x64x32xf32> to vector<64x32xf32>
    %c0_2 = arith.constant 0 : index
    %c0_3 = arith.constant 0 : index
    %2 = vector.load %arg3[%c0_2, %c0_3] : memref<32x32xf32, #tpu.memory_space<vmem>>, vector<32x32xf32>
    %cst = arith.constant dense<0.000000e+00> : vector<64x32xf32>
    %3 = tpu.matmul %1, %2, %cst {dimension_numbers = #tpu.dot_dimension_numbers<[1], [0], [0], [1], [0, 0, 1, 1], [], []>} : vector<64x32xf32>, vector<32x32xf32>, vector<64x32xf32> -> vector<64x32xf32>
    %cst_4 = arith.constant 5.000000e-01 : f32
    %4 = vector.broadcast %cst_4 : f32 to vector<64x32xf32>
    %5 = arith.mulf %3, %4 : vector<64x32xf32>
    %c0_5 = arith.constant 0 : index
    %c0_6 = arith.constant 0 : index
    %c0_7 = arith.constant 0 : index
    %6 = vector.load %arg2[%c0_5, %c0_6, %c0_7] : memref<1x16x128xf32, #tpu.memory_space<vmem>>, vector<1x16x128xf32>
    %7 = vector.shape_cast %6 : vector<1x16x128xf32> to vector<16x128xf32>
    %c0_8 = arith.constant 0 : index
    %c0_9 = arith.constant 0 : index
    %8 = vector.load %arg4[%c0_8, %c0_9] : memref<128x32xf32, #tpu.memory_space<vmem>>, vector<128x32xf32>
    %cst_10 = arith.constant dense<0.000000e+00> : vector<16x32xf32>
    %9 = tpu.matmul %7, %8, %cst_10 {dimension_numbers = #tpu.dot_dimension_numbers<[1], [0], [0], [1], [0, 0, 1, 1], [], []>} : vector<16x128xf32>, vector<128x32xf32>, vector<16x32xf32> -> vector<16x32xf32>
    %c0_11 = arith.constant 0 : index
    %c0_12 = arith.constant 0 : index
    %10 = vector.load %arg5[%c0_11, %c0_12] : memref<1x32xf32, #tpu.memory_space<vmem>>, vector<1x32xf32>
    %11 = vector.broadcast %10 : vector<1x32xf32> to vector<16x32xf32>
    %12 = arith.addf %9, %11 : vector<16x32xf32>
    %cst_13 = arith.constant dense<0.000000e+00> : vector<16xf32>
    %13 = vector.multi_reduction <add>, %12, %cst_13 [1] : vector<16x32xf32> to vector<16xf32>
    %14 = vector.shape_cast %13 : vector<16xf32> to vector<16x1xf32>
    %cst_14 = arith.constant 3.200000e+01 : f32
    %15 = vector.broadcast %cst_14 : f32 to vector<16x1xf32>
    %16 = arith.divf %14, %15 : vector<16x1xf32>
    %17 = vector.broadcast %16 : vector<16x1xf32> to vector<16x32xf32>
    %18 = arith.subf %12, %17 : vector<16x32xf32>
    %19 = arith.mulf %18, %18 : vector<16x32xf32>
    %cst_15 = arith.constant dense<0.000000e+00> : vector<16xf32>
    %20 = vector.multi_reduction <add>, %19, %cst_15 [1] : vector<16x32xf32> to vector<16xf32>
    %21 = vector.shape_cast %20 : vector<16xf32> to vector<16x1xf32>
    %cst_16 = arith.constant 3.200000e+01 : f32
    %22 = vector.broadcast %cst_16 : f32 to vector<16x1xf32>
    %23 = arith.divf %21, %22 : vector<16x1xf32>
    %24 = vector.broadcast %16 : vector<16x1xf32> to vector<16x32xf32>
    %25 = arith.subf %12, %24 : vector<16x32xf32>
    %cst_17 = arith.constant 9.99999974E-6 : f32
    %26 = vector.broadcast %cst_17 : f32 to vector<16x1xf32>
    %27 = arith.addf %23, %26 : vector<16x1xf32>
    %28 = math.rsqrt %27 : vector<16x1xf32>
    %29 = vector.broadcast %28 : vector<16x1xf32> to vector<16x32xf32>
    %30 = arith.mulf %25, %29 : vector<16x32xf32>
    %c0_18 = arith.constant 0 : index
    %c0_19 = arith.constant 0 : index
    %31 = vector.load %arg6[%c0_18, %c0_19] : memref<1x32xf32, #tpu.memory_space<vmem>>, vector<1x32xf32>
    %32 = vector.broadcast %31 : vector<1x32xf32> to vector<16x32xf32>
    %33 = arith.mulf %30, %32 : vector<16x32xf32>
    %c0_20 = arith.constant 0 : index
    %c0_21 = arith.constant 0 : index
    %34 = vector.load %arg7[%c0_20, %c0_21] : memref<1x32xf32, #tpu.memory_space<vmem>>, vector<1x32xf32>
    %35 = vector.broadcast %34 : vector<1x32xf32> to vector<16x32xf32>
    %36 = arith.addf %33, %35 : vector<16x32xf32>
    %c0_22 = arith.constant 0 : index
    %c0_23 = arith.constant 0 : index
    %37 = vector.load %arg8[%c0_22, %c0_23] : memref<32x64xf32, #tpu.memory_space<vmem>>, vector<32x64xf32>
    %cst_24 = arith.constant dense<0.000000e+00> : vector<16x64xf32>
    %38 = tpu.matmul %36, %37, %cst_24 {dimension_numbers = #tpu.dot_dimension_numbers<[1], [0], [0], [1], [0, 0, 1, 1], [], []>} : vector<16x32xf32>, vector<32x64xf32>, vector<16x64xf32> -> vector<16x64xf32>
    %39 = vector.extract_strided_slice %38 {offsets = [0, 0], sizes = [16, 32], strides = [1, 1]} : vector<16x64xf32> to vector<16x32xf32>
    %40 = vector.extract_strided_slice %38 {offsets = [0, 32], sizes = [16, 32], strides = [1, 1]} : vector<16x64xf32> to vector<16x32xf32>
    %c0_25 = arith.constant 0 : index
    %c0_26 = arith.constant 0 : index
    %41 = vector.load %arg9[%c0_25, %c0_26] : memref<32x32xf32, #tpu.memory_space<vmem>>, vector<32x32xf32>
    %cst_27 = arith.constant 0.000000e+00 : f32
    %42 = vector.broadcast %cst_27 : f32 to vector<64x32xf32>
    %43 = vector.extract_strided_slice %5 {offsets = [0, 0], sizes = [64, 4], strides = [1, 1]} : vector<64x32xf32> to vector<64x4xf32>
    %44 = vector.extract_strided_slice %39 {offsets = [0, 0], sizes = [16, 4], strides = [1, 1]} : vector<16x32xf32> to vector<16x4xf32>
    %45 = vector.extract_strided_slice %40 {offsets = [0, 0], sizes = [16, 4], strides = [1, 1]} : vector<16x32xf32> to vector<16x4xf32>
    %cst_28 = arith.constant dense<0.000000e+00> : vector<64x16xf32>
    %46 = tpu.matmul %43, %44, %cst_28 {dimension_numbers = #tpu.dot_dimension_numbers<[1], [1], [0], [0], [0, 0, 1, 0], [], []>} : vector<64x4xf32>, vector<16x4xf32>, vector<64x16xf32> -> vector<64x16xf32>
    %cst_29 = arith.constant dense<0xFF800000> : vector<64xf32>
    %47 = vector.multi_reduction <maximumf>, %46, %cst_29 [1] : vector<64x16xf32> to vector<64xf32>
    %48 = vector.shape_cast %47 : vector<64xf32> to vector<64x1xf32>
    %49 = vector.broadcast %48 : vector<64x1xf32> to vector<64x16xf32>
    %50 = arith.subf %46, %49 : vector<64x16xf32>
    %51 = math.exp %50 : vector<64x16xf32>
    %cst_30 = arith.constant dense<0.000000e+00> : vector<64xf32>
    %52 = vector.multi_reduction <add>, %51, %cst_30 [1] : vector<64x16xf32> to vector<64xf32>
    %53 = vector.shape_cast %52 : vector<64xf32> to vector<64x1xf32>
    %54 = tpu.reciprocal %53 {approx = true} : vector<64x1xf32> -> vector<64x1xf32>
    %cst_31 = arith.constant dense<0.000000e+00> : vector<64x4xf32>
    %55 = tpu.matmul %51, %45, %cst_31 {dimension_numbers = #tpu.dot_dimension_numbers<[1], [0], [0], [1], [0, 0, 1, 1], [], []>} : vector<64x16xf32>, vector<16x4xf32>, vector<64x4xf32> -> vector<64x4xf32>
    %56 = vector.broadcast %54 : vector<64x1xf32> to vector<64x4xf32>
    %57 = arith.mulf %55, %56 : vector<64x4xf32>
    %58 = vector.extract_strided_slice %41 {offsets = [0, 0], sizes = [4, 32], strides = [1, 1]} : vector<32x32xf32> to vector<4x32xf32>
    %cst_32 = arith.constant dense<0.000000e+00> : vector<64x32xf32>
    %59 = tpu.matmul %57, %58, %cst_32 {dimension_numbers = #tpu.dot_dimension_numbers<[1], [0], [0], [1], [0, 0, 1, 1], [], []>} : vector<64x4xf32>, vector<4x32xf32>, vector<64x32xf32> -> vector<64x32xf32>
    %60 = arith.addf %42, %59 : vector<64x32xf32>
    %61 = vector.extract_strided_slice %5 {offsets = [0, 4], sizes = [64, 4], strides = [1, 1]} : vector<64x32xf32> to vector<64x4xf32>
    %62 = vector.extract_strided_slice %39 {offsets = [0, 4], sizes = [16, 4], strides = [1, 1]} : vector<16x32xf32> to vector<16x4xf32>
    %63 = vector.extract_strided_slice %40 {offsets = [0, 4], sizes = [16, 4], strides = [1, 1]} : vector<16x32xf32> to vector<16x4xf32>
    %cst_33 = arith.constant dense<0.000000e+00> : vector<64x16xf32>
    %64 = tpu.matmul %61, %62, %cst_33 {dimension_numbers = #tpu.dot_dimension_numbers<[1], [1], [0], [0], [0, 0, 1, 0], [], []>} : vector<64x4xf32>, vector<16x4xf32>, vector<64x16xf32> -> vector<64x16xf32>
    %cst_34 = arith.constant dense<0xFF800000> : vector<64xf32>
    %65 = vector.multi_reduction <maximumf>, %64, %cst_34 [1] : vector<64x16xf32> to vector<64xf32>
    %66 = vector.shape_cast %65 : vector<64xf32> to vector<64x1xf32>
    %67 = vector.broadcast %66 : vector<64x1xf32> to vector<64x16xf32>
    %68 = arith.subf %64, %67 : vector<64x16xf32>
    %69 = math.exp %68 : vector<64x16xf32>
    %cst_35 = arith.constant dense<0.000000e+00> : vector<64xf32>
    %70 = vector.multi_reduction <add>, %69, %cst_35 [1] : vector<64x16xf32> to vector<64xf32>
    %71 = vector.shape_cast %70 : vector<64xf32> to vector<64x1xf32>
    %72 = tpu.reciprocal %71 {approx = true} : vector<64x1xf32> -> vector<64x1xf32>
    %cst_36 = arith.constant dense<0.000000e+00> : vector<64x4xf32>
    %73 = tpu.matmul %69, %63, %cst_36 {dimension_numbers = #tpu.dot_dimension_numbers<[1], [0], [0], [1], [0, 0, 1, 1], [], []>} : vector<64x16xf32>, vector<16x4xf32>, vector<64x4xf32> -> vector<64x4xf32>
    %74 = vector.broadcast %72 : vector<64x1xf32> to vector<64x4xf32>
    %75 = arith.mulf %73, %74 : vector<64x4xf32>
    %76 = vector.extract_strided_slice %41 {offsets = [4, 0], sizes = [4, 32], strides = [1, 1]} : vector<32x32xf32> to vector<4x32xf32>
    %cst_37 = arith.constant dense<0.000000e+00> : vector<64x32xf32>
    %77 = tpu.matmul %75, %76, %cst_37 {dimension_numbers = #tpu.dot_dimension_numbers<[1], [0], [0], [1], [0, 0, 1, 1], [], []>} : vector<64x4xf32>, vector<4x32xf32>, vector<64x32xf32> -> vector<64x32xf32>
    %78 = arith.addf %60, %77 : vector<64x32xf32>
    %79 = vector.extract_strided_slice %5 {offsets = [0, 8], sizes = [64, 4], strides = [1, 1]} : vector<64x32xf32> to vector<64x4xf32>
    %80 = vector.extract_strided_slice %39 {offsets = [0, 8], sizes = [16, 4], strides = [1, 1]} : vector<16x32xf32> to vector<16x4xf32>
    %81 = vector.extract_strided_slice %40 {offsets = [0, 8], sizes = [16, 4], strides = [1, 1]} : vector<16x32xf32> to vector<16x4xf32>
    %cst_38 = arith.constant dense<0.000000e+00> : vector<64x16xf32>
    %82 = tpu.matmul %79, %80, %cst_38 {dimension_numbers = #tpu.dot_dimension_numbers<[1], [1], [0], [0], [0, 0, 1, 0], [], []>} : vector<64x4xf32>, vector<16x4xf32>, vector<64x16xf32> -> vector<64x16xf32>
    %cst_39 = arith.constant dense<0xFF800000> : vector<64xf32>
    %83 = vector.multi_reduction <maximumf>, %82, %cst_39 [1] : vector<64x16xf32> to vector<64xf32>
    %84 = vector.shape_cast %83 : vector<64xf32> to vector<64x1xf32>
    %85 = vector.broadcast %84 : vector<64x1xf32> to vector<64x16xf32>
    %86 = arith.subf %82, %85 : vector<64x16xf32>
    %87 = math.exp %86 : vector<64x16xf32>
    %cst_40 = arith.constant dense<0.000000e+00> : vector<64xf32>
    %88 = vector.multi_reduction <add>, %87, %cst_40 [1] : vector<64x16xf32> to vector<64xf32>
    %89 = vector.shape_cast %88 : vector<64xf32> to vector<64x1xf32>
    %90 = tpu.reciprocal %89 {approx = true} : vector<64x1xf32> -> vector<64x1xf32>
    %cst_41 = arith.constant dense<0.000000e+00> : vector<64x4xf32>
    %91 = tpu.matmul %87, %81, %cst_41 {dimension_numbers = #tpu.dot_dimension_numbers<[1], [0], [0], [1], [0, 0, 1, 1], [], []>} : vector<64x16xf32>, vector<16x4xf32>, vector<64x4xf32> -> vector<64x4xf32>
    %92 = vector.broadcast %90 : vector<64x1xf32> to vector<64x4xf32>
    %93 = arith.mulf %91, %92 : vector<64x4xf32>
    %94 = vector.extract_strided_slice %41 {offsets = [8, 0], sizes = [4, 32], strides = [1, 1]} : vector<32x32xf32> to vector<4x32xf32>
    %cst_42 = arith.constant dense<0.000000e+00> : vector<64x32xf32>
    %95 = tpu.matmul %93, %94, %cst_42 {dimension_numbers = #tpu.dot_dimension_numbers<[1], [0], [0], [1], [0, 0, 1, 1], [], []>} : vector<64x4xf32>, vector<4x32xf32>, vector<64x32xf32> -> vector<64x32xf32>
    %96 = arith.addf %78, %95 : vector<64x32xf32>
    %97 = vector.extract_strided_slice %5 {offsets = [0, 12], sizes = [64, 4], strides = [1, 1]} : vector<64x32xf32> to vector<64x4xf32>
    %98 = vector.extract_strided_slice %39 {offsets = [0, 12], sizes = [16, 4], strides = [1, 1]} : vector<16x32xf32> to vector<16x4xf32>
    %99 = vector.extract_strided_slice %40 {offsets = [0, 12], sizes = [16, 4], strides = [1, 1]} : vector<16x32xf32> to vector<16x4xf32>
    %cst_43 = arith.constant dense<0.000000e+00> : vector<64x16xf32>
    %100 = tpu.matmul %97, %98, %cst_43 {dimension_numbers = #tpu.dot_dimension_numbers<[1], [1], [0], [0], [0, 0, 1, 0], [], []>} : vector<64x4xf32>, vector<16x4xf32>, vector<64x16xf32> -> vector<64x16xf32>
    %cst_44 = arith.constant dense<0xFF800000> : vector<64xf32>
    %101 = vector.multi_reduction <maximumf>, %100, %cst_44 [1] : vector<64x16xf32> to vector<64xf32>
    %102 = vector.shape_cast %101 : vector<64xf32> to vector<64x1xf32>
    %103 = vector.broadcast %102 : vector<64x1xf32> to vector<64x16xf32>
    %104 = arith.subf %100, %103 : vector<64x16xf32>
    %105 = math.exp %104 : vector<64x16xf32>
    %cst_45 = arith.constant dense<0.000000e+00> : vector<64xf32>
    %106 = vector.multi_reduction <add>, %105, %cst_45 [1] : vector<64x16xf32> to vector<64xf32>
    %107 = vector.shape_cast %106 : vector<64xf32> to vector<64x1xf32>
    %108 = tpu.reciprocal %107 {approx = true} : vector<64x1xf32> -> vector<64x1xf32>
    %cst_46 = arith.constant dense<0.000000e+00> : vector<64x4xf32>
    %109 = tpu.matmul %105, %99, %cst_46 {dimension_numbers = #tpu.dot_dimension_numbers<[1], [0], [0], [1], [0, 0, 1, 1], [], []>} : vector<64x16xf32>, vector<16x4xf32>, vector<64x4xf32> -> vector<64x4xf32>
    %110 = vector.broadcast %108 : vector<64x1xf32> to vector<64x4xf32>
    %111 = arith.mulf %109, %110 : vector<64x4xf32>
    %112 = vector.extract_strided_slice %41 {offsets = [12, 0], sizes = [4, 32], strides = [1, 1]} : vector<32x32xf32> to vector<4x32xf32>
    %cst_47 = arith.constant dense<0.000000e+00> : vector<64x32xf32>
    %113 = tpu.matmul %111, %112, %cst_47 {dimension_numbers = #tpu.dot_dimension_numbers<[1], [0], [0], [1], [0, 0, 1, 1], [], []>} : vector<64x4xf32>, vector<4x32xf32>, vector<64x32xf32> -> vector<64x32xf32>
    %114 = arith.addf %96, %113 : vector<64x32xf32>
    %115 = vector.extract_strided_slice %5 {offsets = [0, 16], sizes = [64, 4], strides = [1, 1]} : vector<64x32xf32> to vector<64x4xf32>
    %116 = vector.extract_strided_slice %39 {offsets = [0, 16], sizes = [16, 4], strides = [1, 1]} : vector<16x32xf32> to vector<16x4xf32>
    %117 = vector.extract_strided_slice %40 {offsets = [0, 16], sizes = [16, 4], strides = [1, 1]} : vector<16x32xf32> to vector<16x4xf32>
    %cst_48 = arith.constant dense<0.000000e+00> : vector<64x16xf32>
    %118 = tpu.matmul %115, %116, %cst_48 {dimension_numbers = #tpu.dot_dimension_numbers<[1], [1], [0], [0], [0, 0, 1, 0], [], []>} : vector<64x4xf32>, vector<16x4xf32>, vector<64x16xf32> -> vector<64x16xf32>
    %cst_49 = arith.constant dense<0xFF800000> : vector<64xf32>
    %119 = vector.multi_reduction <maximumf>, %118, %cst_49 [1] : vector<64x16xf32> to vector<64xf32>
    %120 = vector.shape_cast %119 : vector<64xf32> to vector<64x1xf32>
    %121 = vector.broadcast %120 : vector<64x1xf32> to vector<64x16xf32>
    %122 = arith.subf %118, %121 : vector<64x16xf32>
    %123 = math.exp %122 : vector<64x16xf32>
    %cst_50 = arith.constant dense<0.000000e+00> : vector<64xf32>
    %124 = vector.multi_reduction <add>, %123, %cst_50 [1] : vector<64x16xf32> to vector<64xf32>
    %125 = vector.shape_cast %124 : vector<64xf32> to vector<64x1xf32>
    %126 = tpu.reciprocal %125 {approx = true} : vector<64x1xf32> -> vector<64x1xf32>
    %cst_51 = arith.constant dense<0.000000e+00> : vector<64x4xf32>
    %127 = tpu.matmul %123, %117, %cst_51 {dimension_numbers = #tpu.dot_dimension_numbers<[1], [0], [0], [1], [0, 0, 1, 1], [], []>} : vector<64x16xf32>, vector<16x4xf32>, vector<64x4xf32> -> vector<64x4xf32>
    %128 = vector.broadcast %126 : vector<64x1xf32> to vector<64x4xf32>
    %129 = arith.mulf %127, %128 : vector<64x4xf32>
    %130 = vector.extract_strided_slice %41 {offsets = [16, 0], sizes = [4, 32], strides = [1, 1]} : vector<32x32xf32> to vector<4x32xf32>
    %cst_52 = arith.constant dense<0.000000e+00> : vector<64x32xf32>
    %131 = tpu.matmul %129, %130, %cst_52 {dimension_numbers = #tpu.dot_dimension_numbers<[1], [0], [0], [1], [0, 0, 1, 1], [], []>} : vector<64x4xf32>, vector<4x32xf32>, vector<64x32xf32> -> vector<64x32xf32>
    %132 = arith.addf %114, %131 : vector<64x32xf32>
    %133 = vector.extract_strided_slice %5 {offsets = [0, 20], sizes = [64, 4], strides = [1, 1]} : vector<64x32xf32> to vector<64x4xf32>
    %134 = vector.extract_strided_slice %39 {offsets = [0, 20], sizes = [16, 4], strides = [1, 1]} : vector<16x32xf32> to vector<16x4xf32>
    %135 = vector.extract_strided_slice %40 {offsets = [0, 20], sizes = [16, 4], strides = [1, 1]} : vector<16x32xf32> to vector<16x4xf32>
    %cst_53 = arith.constant dense<0.000000e+00> : vector<64x16xf32>
    %136 = tpu.matmul %133, %134, %cst_53 {dimension_numbers = #tpu.dot_dimension_numbers<[1], [1], [0], [0], [0, 0, 1, 0], [], []>} : vector<64x4xf32>, vector<16x4xf32>, vector<64x16xf32> -> vector<64x16xf32>
    %cst_54 = arith.constant dense<0xFF800000> : vector<64xf32>
    %137 = vector.multi_reduction <maximumf>, %136, %cst_54 [1] : vector<64x16xf32> to vector<64xf32>
    %138 = vector.shape_cast %137 : vector<64xf32> to vector<64x1xf32>
    %139 = vector.broadcast %138 : vector<64x1xf32> to vector<64x16xf32>
    %140 = arith.subf %136, %139 : vector<64x16xf32>
    %141 = math.exp %140 : vector<64x16xf32>
    %cst_55 = arith.constant dense<0.000000e+00> : vector<64xf32>
    %142 = vector.multi_reduction <add>, %141, %cst_55 [1] : vector<64x16xf32> to vector<64xf32>
    %143 = vector.shape_cast %142 : vector<64xf32> to vector<64x1xf32>
    %144 = tpu.reciprocal %143 {approx = true} : vector<64x1xf32> -> vector<64x1xf32>
    %cst_56 = arith.constant dense<0.000000e+00> : vector<64x4xf32>
    %145 = tpu.matmul %141, %135, %cst_56 {dimension_numbers = #tpu.dot_dimension_numbers<[1], [0], [0], [1], [0, 0, 1, 1], [], []>} : vector<64x16xf32>, vector<16x4xf32>, vector<64x4xf32> -> vector<64x4xf32>
    %146 = vector.broadcast %144 : vector<64x1xf32> to vector<64x4xf32>
    %147 = arith.mulf %145, %146 : vector<64x4xf32>
    %148 = vector.extract_strided_slice %41 {offsets = [20, 0], sizes = [4, 32], strides = [1, 1]} : vector<32x32xf32> to vector<4x32xf32>
    %cst_57 = arith.constant dense<0.000000e+00> : vector<64x32xf32>
    %149 = tpu.matmul %147, %148, %cst_57 {dimension_numbers = #tpu.dot_dimension_numbers<[1], [0], [0], [1], [0, 0, 1, 1], [], []>} : vector<64x4xf32>, vector<4x32xf32>, vector<64x32xf32> -> vector<64x32xf32>
    %150 = arith.addf %132, %149 : vector<64x32xf32>
    %151 = vector.extract_strided_slice %5 {offsets = [0, 24], sizes = [64, 4], strides = [1, 1]} : vector<64x32xf32> to vector<64x4xf32>
    %152 = vector.extract_strided_slice %39 {offsets = [0, 24], sizes = [16, 4], strides = [1, 1]} : vector<16x32xf32> to vector<16x4xf32>
    %153 = vector.extract_strided_slice %40 {offsets = [0, 24], sizes = [16, 4], strides = [1, 1]} : vector<16x32xf32> to vector<16x4xf32>
    %cst_58 = arith.constant dense<0.000000e+00> : vector<64x16xf32>
    %154 = tpu.matmul %151, %152, %cst_58 {dimension_numbers = #tpu.dot_dimension_numbers<[1], [1], [0], [0], [0, 0, 1, 0], [], []>} : vector<64x4xf32>, vector<16x4xf32>, vector<64x16xf32> -> vector<64x16xf32>
    %cst_59 = arith.constant dense<0xFF800000> : vector<64xf32>
    %155 = vector.multi_reduction <maximumf>, %154, %cst_59 [1] : vector<64x16xf32> to vector<64xf32>
    %156 = vector.shape_cast %155 : vector<64xf32> to vector<64x1xf32>
    %157 = vector.broadcast %156 : vector<64x1xf32> to vector<64x16xf32>
    %158 = arith.subf %154, %157 : vector<64x16xf32>
    %159 = math.exp %158 : vector<64x16xf32>
    %cst_60 = arith.constant dense<0.000000e+00> : vector<64xf32>
    %160 = vector.multi_reduction <add>, %159, %cst_60 [1] : vector<64x16xf32> to vector<64xf32>
    %161 = vector.shape_cast %160 : vector<64xf32> to vector<64x1xf32>
    %162 = tpu.reciprocal %161 {approx = true} : vector<64x1xf32> -> vector<64x1xf32>
    %cst_61 = arith.constant dense<0.000000e+00> : vector<64x4xf32>
    %163 = tpu.matmul %159, %153, %cst_61 {dimension_numbers = #tpu.dot_dimension_numbers<[1], [0], [0], [1], [0, 0, 1, 1], [], []>} : vector<64x16xf32>, vector<16x4xf32>, vector<64x4xf32> -> vector<64x4xf32>
    %164 = vector.broadcast %162 : vector<64x1xf32> to vector<64x4xf32>
    %165 = arith.mulf %163, %164 : vector<64x4xf32>
    %166 = vector.extract_strided_slice %41 {offsets = [24, 0], sizes = [4, 32], strides = [1, 1]} : vector<32x32xf32> to vector<4x32xf32>
    %cst_62 = arith.constant dense<0.000000e+00> : vector<64x32xf32>
    %167 = tpu.matmul %165, %166, %cst_62 {dimension_numbers = #tpu.dot_dimension_numbers<[1], [0], [0], [1], [0, 0, 1, 1], [], []>} : vector<64x4xf32>, vector<4x32xf32>, vector<64x32xf32> -> vector<64x32xf32>
    %168 = arith.addf %150, %167 : vector<64x32xf32>
    %169 = vector.extract_strided_slice %5 {offsets = [0, 28], sizes = [64, 4], strides = [1, 1]} : vector<64x32xf32> to vector<64x4xf32>
    %170 = vector.extract_strided_slice %39 {offsets = [0, 28], sizes = [16, 4], strides = [1, 1]} : vector<16x32xf32> to vector<16x4xf32>
    %171 = vector.extract_strided_slice %40 {offsets = [0, 28], sizes = [16, 4], strides = [1, 1]} : vector<16x32xf32> to vector<16x4xf32>
    %cst_63 = arith.constant dense<0.000000e+00> : vector<64x16xf32>
    %172 = tpu.matmul %169, %170, %cst_63 {dimension_numbers = #tpu.dot_dimension_numbers<[1], [1], [0], [0], [0, 0, 1, 0], [], []>} : vector<64x4xf32>, vector<16x4xf32>, vector<64x16xf32> -> vector<64x16xf32>
    %cst_64 = arith.constant dense<0xFF800000> : vector<64xf32>
    %173 = vector.multi_reduction <maximumf>, %172, %cst_64 [1] : vector<64x16xf32> to vector<64xf32>
    %174 = vector.shape_cast %173 : vector<64xf32> to vector<64x1xf32>
    %175 = vector.broadcast %174 : vector<64x1xf32> to vector<64x16xf32>
    %176 = arith.subf %172, %175 : vector<64x16xf32>
    %177 = math.exp %176 : vector<64x16xf32>
    %cst_65 = arith.constant dense<0.000000e+00> : vector<64xf32>
    %178 = vector.multi_reduction <add>, %177, %cst_65 [1] : vector<64x16xf32> to vector<64xf32>
    %179 = vector.shape_cast %178 : vector<64xf32> to vector<64x1xf32>
    %180 = tpu.reciprocal %179 {approx = true} : vector<64x1xf32> -> vector<64x1xf32>
    %cst_66 = arith.constant dense<0.000000e+00> : vector<64x4xf32>
    %181 = tpu.matmul %177, %171, %cst_66 {dimension_numbers = #tpu.dot_dimension_numbers<[1], [0], [0], [1], [0, 0, 1, 1], [], []>} : vector<64x16xf32>, vector<16x4xf32>, vector<64x4xf32> -> vector<64x4xf32>
    %182 = vector.broadcast %180 : vector<64x1xf32> to vector<64x4xf32>
    %183 = arith.mulf %181, %182 : vector<64x4xf32>
    %184 = vector.extract_strided_slice %41 {offsets = [28, 0], sizes = [4, 32], strides = [1, 1]} : vector<32x32xf32> to vector<4x32xf32>
    %cst_67 = arith.constant dense<0.000000e+00> : vector<64x32xf32>
    %185 = tpu.matmul %183, %184, %cst_67 {dimension_numbers = #tpu.dot_dimension_numbers<[1], [0], [0], [1], [0, 0, 1, 1], [], []>} : vector<64x4xf32>, vector<4x32xf32>, vector<64x32xf32> -> vector<64x32xf32>
    %186 = arith.addf %168, %185 : vector<64x32xf32>
    %c0_68 = arith.constant 0 : index
    %c0_69 = arith.constant 0 : index
    %187 = vector.load %arg10[%c0_68, %c0_69] : memref<1x32xf32, #tpu.memory_space<vmem>>, vector<1x32xf32>
    %188 = vector.broadcast %187 : vector<1x32xf32> to vector<64x32xf32>
    %189 = arith.addf %186, %188 : vector<64x32xf32>
    %c0_70 = arith.constant 0 : index
    %c0_71 = arith.constant 0 : index
    %c0_72 = arith.constant 0 : index
    %190 = vector.load %arg11[%c0_70, %c0_71, %c0_72] : memref<1x64x32xf32, #tpu.memory_space<vmem>>, vector<1x64x32xf32>
    %191 = vector.shape_cast %190 : vector<1x64x32xf32> to vector<64x32xf32>
    %192 = vector.shape_cast %189 : vector<64x32xf32> to vector<1x64x32xf32>
    tpu.vector_store %arg11[%c0_70, %c0_71, %c0_72], %192 {strides = array<i32>} : memref<1x64x32xf32, #tpu.memory_space<vmem>>, vector<1x64x32xf32>,
    return
  }
  func.func @transform_0(%arg0: i32) -> (i32, i32, i32) {
    %c0_i32 = arith.constant 0 : i32
    %c0_i32_0 = arith.constant 0 : i32
    %c0_i32_1 = arith.constant 0 : i32
    return %arg0, %c0_i32, %c0_i32_0 : i32, i32, i32
  }
  func.func @transform_1(%arg0: i32) -> (i32, i32, i32) {
    %c0_i32 = arith.constant 0 : i32
    %c0_i32_0 = arith.constant 0 : i32
    %c0_i32_1 = arith.constant 0 : i32
    return %arg0, %c0_i32, %c0_i32_0 : i32, i32, i32
  }
  func.func @transform_2(%arg0: i32) -> (i32, i32) {
    %c0_i32 = arith.constant 0 : i32
    %c0_i32_0 = arith.constant 0 : i32
    %c0_i32_1 = arith.constant 0 : i32
    return %c0_i32, %c0_i32_0 : i32, i32
  }
  func.func @transform_3(%arg0: i32) -> (i32, i32) {
    %c0_i32 = arith.constant 0 : i32
    %c0_i32_0 = arith.constant 0 : i32
    %c0_i32_1 = arith.constant 0 : i32
    return %c0_i32, %c0_i32_0 : i32, i32
  }
  func.func @transform_4(%arg0: i32) -> (i32, i32) {
    %c0_i32 = arith.constant 0 : i32
    %c0_i32_0 = arith.constant 0 : i32
    %c0_i32_1 = arith.constant 0 : i32
    return %c0_i32, %c0_i32_0 : i32, i32
  }
  func.func @transform_5(%arg0: i32) -> (i32, i32) {
    %c0_i32 = arith.constant 0 : i32
    %c0_i32_0 = arith.constant 0 : i32
    %c0_i32_1 = arith.constant 0 : i32
    return %c0_i32, %c0_i32_0 : i32, i32
  }
  func.func @transform_6(%arg0: i32) -> (i32, i32) {
    %c0_i32 = arith.constant 0 : i32
    %c0_i32_0 = arith.constant 0 : i32
    %c0_i32_1 = arith.constant 0 : i32
    return %c0_i32, %c0_i32_0 : i32, i32
  }
  func.func @transform_7(%arg0: i32) -> (i32, i32) {
    %c0_i32 = arith.constant 0 : i32
    %c0_i32_0 = arith.constant 0 : i32
    %c0_i32_1 = arith.constant 0 : i32
    return %c0_i32, %c0_i32_0 : i32, i32
  }
  func.func @transform_8(%arg0: i32) -> (i32, i32) {
    %c0_i32 = arith.constant 0 : i32
    %c0_i32_0 = arith.constant 0 : i32
    %c0_i32_1 = arith.constant 0 : i32
    return %c0_i32, %c0_i32_0 : i32, i32
  }
  func.func @transform_9(%arg0: i32) -> (i32, i32) {
    %c0_i32 = arith.constant 0 : i32
    %c0_i32_0 = arith.constant 0 : i32
    %c0_i32_1 = arith.constant 0 : i32
    return %c0_i32, %c0_i32_0 : i32, i32
  }
  func.func @transform_10(%arg0: i32) -> (i32, i32, i32) {
    %c0_i32 = arith.constant 0 : i32
    %c0_i32_0 = arith.constant 0 : i32
    %c0_i32_1 = arith.constant 0 : i32
    return %arg0, %c0_i32, %c0_i32_0 : i32, i32, i32
  }
}

</mosaic_0001>

<bundles_post_ra>
// kernel: tpu_custom_call.1
= control target key start
LH: loop header
LB: loop body
LE: loop exit
PB: predicated region body
PF: predicated region fallthrough
CT: control target
= control target key end

     0   :  { %s6463_s13 = smov 0   ;;  %s7717_s0 = inlined_call_operand.vmem [shape: f32[2,64,32], index: 0, kind: input, shape index: {}]   ;;  %s7718_s1 = inlined_call_operand.vmem [shape: f32[2,16,128], index: 1, kind: input, shape index: {}]   ;;  %s7719_s2 = inlined_call_operand.vmem [shape: f32[32,32], index: 2, kind: input, shape index: {}]   ;;  %s7720_s3 = inlined_call_operand.vmem [shape: f32[128,32], index: 3, kind: input, shape index: {}]   ;;  %s7721_s4 = inlined_call_operand.vmem [shape: f32[1,32], index: 4, kind: input, shape index: {}]   ;;  %s7722_s5 = inlined_call_operand.vmem [shape: f32[1,32], index: 5, kind: input, shape index: {}]   ;;  %s7723_s6 = inlined_call_operand.vmem [shape: f32[1,32], index: 6, kind: input, shape index: {}]   ;;  %s7724_s7 = inlined_call_operand.vmem [shape: f32[32,64], index: 7, kind: input, shape index: {}]   ;;  %s7725_s8 = inlined_call_operand.vmem [shape: f32[32,32], index: 8, kind: input, shape index: {}]   ;;  %s7726_s9 = inlined_call_operand.vmem [shape: f32[1,32], index: 9, kind: input, shape index: {}]   ;;  %s7727_s10 = inlined_call_operand.vmem [shape: f32[2,64,32], index: 10, kind: output, shape index: {}]  }
   0x1 LB: > { %s4895_s14 = sadd.s32 4294967295, %s6391_s13   ;;  %p4899_p0 = scmp.ge.s32.totalorder %s6391_s13, 1  ;;  %s6391_s13 = sphi %s6463_s13, %s20_s13  }
   0x2   : > { %p322_p1 = scmp.lt.s32.totalorder %s6391_s13, 3 }
   0x4   : > { %p323_p2 = pnand %p4899_p0, %p322_p1 }
   0x6   : > { %326 = sbr.rel (%p323_p2) target bundleno = 3413 (0xd55), region = 60 }
   0xd   : > { %v388_v0 = vld [vmem:[%s7719_s2] sm:$0xff]  ;;  %v389_v1 = vld [vmem:[%s7719_s2 + $0x8] sm:$0xff]  ;;  %v390_v2 = vld [vmem:[%s7719_s2 + $0x10] sm:$0xff]  ;;  %p365_p3 = scmp.lt.s32.totalorder %s4895_s14, 1  ;;  %vm392_vm0 = vcmask 261120   ;;  %s6393_s12 = smov 124  }
   0xe   : > { %v5843_v3 = vpack.c.bf16 %v389_v1, %v388_v0  ;;  %v391_v4 = vld [vmem:[%s7719_s2 + $0x18] sm:$0xff]  ;;  %v532_v6 = vld [vmem:[%s7720_s3] sm:$0xff]  ;;  %v533_v7 = vld [vmem:[%s7720_s3 + $0x8] sm:$0xff]  ;;  %vm764_vm1 = vcmask 31744   ;;  %s6394_s26 = smov 96   ;;  %s6395_s28 = smov 92  }
   0xf   : > { %v5847_v5 = vpack.c.bf16 %v391_v4, %v390_v2  ;;  %s7761_s14 = smov (!%p365_p3, %s4895_s14), 1  ;;  %v5851_v8 = vpack.c.bf16 %v533_v7, %v532_v6  ;;  %v534_v10 = vld [vmem:[%s7720_s3 + $0x10] sm:$0xff]  ;;  %v535_v11 = vld [vmem:[%s7720_s3 + $0x18] sm:$0xff]  ;;  %v536_v15 = vld [vmem:[%s7720_s3 + $0x20] sm:$0xff]  ;;  %vm900_vm3 = vcmask 130048   ;;  %s6396_s29 = smov 120  }
  0x10   : > { %5844 = vmatprep.subr.bf16.mxu1 %v5843_v3  ;;  %s5138_s27 = sshll.u32 %s7761_s14, 6  ;;  %v5855_v13 = vpack.c.bf16 %v535_v11, %v534_v10  ;;  %v537_v16 = vld [vmem:[%s7720_s3 + $0x28] sm:$0xff]  ;;  %v538_v20 = vld [vmem:[%s7720_s3 + $0x30] sm:$0xff]  ;;  %v539_v21 = vld [vmem:[%s7720_s3 + $0x38] sm:$0xff]  ;;  %s5139_s25 = sshll.u32 %s7761_s14, 4  ;;  %vm1518_vm4 = vcmask 1043456  }
  0x11   : > { %5846 = vmatpush3.bf16.msra.mxu1 %v5843_v3  ;;  %s6497_s30 = scalar_lea.vmem %s7717_s0, %s5138_s27  ;;  %v5859_v18 = vpack.c.bf16 %v537_v16, %v536_v15  ;;  %v5863_v23 = vpack.c.bf16 %v539_v21, %v538_v20  ;;  %v540_v25 = vld [vmem:[%s7720_s3 + $0x40] sm:$0xff]  ;;  %v541_v26 = vld [vmem:[%s7720_s3 + $0x48] sm:$0xff]  ;;  %s374_s16 = scalar_lea.vmem %s7718_s1, %s5139_s25  ;;  %v542_v30 = vld [vmem:[%s7720_s3 + $0x50] sm:$0xff] }
  0x12   : > { %5848 = vmatprep.subr.bf16.mxu1 %v5847_v5  ;;  %v380_v9 = vld [vmem:[%s6497_s30] sm:$0xff]  ;;  %v381_v12 = vld [vmem:[%s6497_s30 + $0x8] sm:$0xff]  ;;  %v382_v14 = vld [vmem:[%s6497_s30 + $0x10] sm:$0xff]  ;;  %v5867_v28 = vpack.c.bf16 %v541_v26, %v540_v25  ;;  %s6397_s11 = smov 116   ;;  %s6399_s15 = smov 112  }
  0x13   : > { %5417 = vmatprep.mubr.msk.f32.mxu1 %vm392_vm0, %v380_v9  ;;  %v383_v17 = vld [vmem:[%s6497_s30 + $0x18] sm:$0xff]  ;;  %v384_v19 = vld [vmem:[%s6497_s30 + $0x20] sm:$0xff]  ;;  %v385_v22 = vld [vmem:[%s6497_s30 + $0x28] sm:$0xff]  ;;  %s6401_s17 = smov 108   ;;  %s6402_s18 = smov 104  }
  0x14   : > { %v386_v24 = vld [vmem:[%s6497_s30 + $0x30] sm:$0xff]  ;;  %v387_v27 = vld [vmem:[%s6497_s30 + $0x38] sm:$0xff]  ;;  %v530_v29 = vld [vmem:[%s374_s16] sm:$0xff]  ;;  %s6403_s21 = smov 84   ;;  %s6404_s22 = smov 100  }
  0x15   : > { %5850 = vmatpush3.bf16.msra.mxu1 %v5847_v5  ;;  %v543_v31 = vld [vmem:[%s7720_s3 + $0x58] sm:$0xff]  ;;  %v544_v33 = vld [vmem:[%s7720_s3 + $0x60] sm:$0xff]  ;;  %v545_v34 = vld [vmem:[%s7720_s3 + $0x68] sm:$0xff]  ;;  %s6405_s30 = smov 72   ;;  %s379_s19 = scalar_lea.vmem %s7727_s10, %s5138_s27 }
  0x16   : > { %5852 = vmatprep.subr.bf16.mxu1 %v5851_v8  ;;  %v5871_v32 = vpack.c.bf16 %v543_v31, %v542_v30  ;;  %v5875_v35 = vpack.c.bf16 %v545_v34, %v544_v33  ;;  %v546_v36 = vld [vmem:[%s7720_s3 + $0x70] sm:$0xff]  ;;  %v547_v37 = vld [vmem:[%s7720_s3 + $0x78] sm:$0xff]  ;;  %v531_v39 = vld [vmem:[%s374_s16 + $0x8] sm:$0xff]  ;;  %s6400_s16 = smov 80  }
  0x17   : > { %v5879_v38 = vpack.c.bf16 %v547_v37, %v546_v36  ;;  %v4914_v48 = vld [vmem:[%s7721_s4] ss:$0 sm:$0xff]  ;;  %v676_v5 = vld [vmem:[%s7724_s7 + $0x8] sm:$0xff]  ;;  %v678_v9 = vld [vmem:[%s7724_s7 + $0x18] sm:$0xff] }
  0x18   : > { %5418 = vmatmul.mubr.msk.f32.vlgmr.msra.gmra.mrb[0].mxu1 %vm392_vm0, %v381_v12  ;;  %v675_v4 = vld [vmem:[%s7724_s7] sm:$0xff]  ;;  %vm6618_vm2 = vmpackc.low %vm764_vm1, %vm764_vm1 }
  0x19   : > { %5854 = vmatpush3.bf16.msra.mxu1 %v5851_v8  ;;  %5420 = vmatprep.mubr.msk.f32.mxu1 %vm392_vm0, %v382_v14  ;;  %v5883_v6 = vpack.c.bf16 %v676_v5, %v675_v4  ;;  %v677_v8 = vld [vmem:[%s7724_s7 + $0x10] sm:$0xff]  ;;  %v4916_v21 = vld [vmem:[%s7723_s6] ss:$0 sm:$0xff] }
  0x1a   : > { %5856 = vmatprep.subr.bf16.mxu1 %v5855_v13  ;;  %v5887_v10 = vpack.c.bf16 %v678_v9, %v677_v8 }
  0x1b   : > { %5884 = vmatprep.subr.bf16.mxu0 %v5883_v6 }
  0x1c   : > { %5421 = vmatmul.mubr.msk.f32.gmra.mrb[2].mxu1 %vm392_vm0, %v383_v17  ;;  %5886 = vmatpush3.bf16.msra.mxu0 %v5883_v6 }
  0x1d   : > { %5858 = vmatpush3.bf16.msra.mxu1 %v5855_v13  ;;  %5423 = vmatprep.mubr.msk.f32.mxu1 %vm392_vm0, %v384_v19  ;;  %v4915_v19 = vld [vmem:[%s7722_s5] ss:$0 sm:$0xff] }
  0x1e   : > { %5860 = vmatprep.subr.bf16.mxu1 %v5859_v18  ;;  %5888 = vmatprep.subr.bf16.mxu0 %v5887_v10 }
  0x20   : > { %5424 = vmatmul.mubr.msk.f32.gmra.mrb[4].mxu1 %vm392_vm0, %v385_v22  ;;  %5890 = vmatpush3.bf16.msra.mxu0 %v5887_v10 }
  0x21   : > { %5862 = vmatpush3.bf16.msra.mxu1 %v5859_v18  ;;  %5426 = vmatprep.mubr.msk.f32.mxu1 %vm392_vm0, %v386_v24 }
  0x22   : > { %5864 = vmatprep.subr.bf16.mxu1 %v5863_v23 }
  0x24   : > { %5427 = vmatmul.mubr.msk.f32.gmra.mrb[6].mxu1 %vm392_vm0, %v387_v27 }
  0x25   : > { %5866 = vmatpush3.bf16.msra.mxu1 %v5863_v23  ;;  %5461 = vmatprep.mubr.f32.mxu1 %v530_v29 }
  0x26   : > { %5868 = vmatprep.subr.bf16.mxu1 %v5867_v28 }
  0x29   : > { %5870 = vmatpush3.bf16.msra.mxu1 %v5867_v28 }
  0x2a   : > { %5872 = vmatprep.subr.bf16.mxu1 %v5871_v32 }
  0x2d   : > { %5874 = vmatpush3.bf16.msra.mxu1 %v5871_v32 }
  0x2e   : > { %5876 = vmatprep.subr.bf16.mxu1 %v5875_v35 }
  0x31   : > { %5878 = vmatpush3.bf16.msra.mxu1 %v5875_v35 }
  0x32   : > { %5880 = vmatprep.subr.bf16.mxu1 %v5879_v38 }
  0x35   : > { %5882 = vmatpush3.bf16.msra.mxu1 %v5879_v38 }
  0x38   : > { %5462 = vmatmul.mubr.f32.vlgmr.msra.gmra.mrb[8].mxu1 %v531_v39 }
  0xeb   : > { %v5419_v40 = vpop.f32.mrb[0].mxu1 }
  0xec   : > { %v483_v41 = vpop.f32.mrb[1].mxu1  ;;  %v6578_v2 = vmul.f32 0.5, %v5419_v40 }
  0xed   : > { %v6574_v1 = vmul.f32 0.5, %v483_v41 }
  0xef   : > { %v6561_v42 = vpop.f32.mrb[2].mxu1 }
  0xf0   : > { %v493_v43 = vpop.f32.mrb[3].mxu1  ;;  %v6632_v33 = vmul.f32 0.5, %v6561_v42 }
  0xf1   : > { %v6582_v3 = vmul.f32 0.5, %v493_v43 }
  0xf3   : > { %v6563_v44 = vpop.f32.mrb[4].mxu1 }
  0xf4   : > { %v503_v45 = vpop.f32.mrb[5].mxu1  ;;  %v6638_v34 = vmul.f32 0.5, %v6563_v44 }
  0xf5   : > { %v6592_v7 = vmul.f32 0.5, %v503_v45 }
  0xf7   : > { %v6565_v46 = vpop.f32.mrb[6].mxu1 }
  0xf8   : > { %v513_v47 = vpop.f32.mrb[7].mxu1  ;;  %v6647_v35 = vmul.f32 0.5, %v6565_v46 }
  0xf9   : > { %v6602_v11 = vmul.f32 0.5, %v513_v47 }
 0x10b   : > { %v5463_v49 = vpop.f32.mrb[8].mxu1 }
 0x10c   : > { %v621_v50 = vpop.f32.mrb[9].mxu1  ;;  %v627_v52 = vadd.f32 %v5463_v49, %v4914_v48 }
 0x10d   : > { %v622_v51 = vadd.f32 %v4914_v48, %v621_v50 }
 0x10e   : > { %v633_v54 = vsel %vm392_vm0, %v627_v52, 0.0 }
 0x10f   : > { %v630_v53 = vsel %vm392_vm0, %v622_v51, 0.0 }
 0x110   : > { %631 = vadd.xlane.f32.xlu0 %v630_v53 }
 0x114   : > { %634 = vadd.xlane.f32.xlu0 %v633_v54 }
 0x19d   : > { %v632_v55 = vpop.xlane.xlu0 %631 }
 0x19e   : > { %v637_v56 = vmul.f32 0.03125, %v632_v55 }
 0x1a0   : > { %v639_v57 = vsub.f32 %v622_v51, %v637_v56 }
 0x1a1   : > { %v635_v58 = vpop.xlane.xlu0 %634 }
 0x1a2   : > { %v638_v59 = vmul.f32 0.03125, %v635_v58  ;;  %v641_v60 = vmul.f32 %v639_v57, %v639_v57 }
 0x1a4   : > { %v640_v61 = vsub.f32 %v627_v52, %v638_v59  ;;  %v643_v62 = vsel %vm392_vm0, %v641_v60, 0.0 }
 0x1a5   : > { %644 = vadd.xlane.f32.xlu1 %v643_v62 }
 0x1a6   : > { %v642_v63 = vmul.f32 %v640_v61, %v640_v61 }
 0x1a8   : > { %v646_v0 = vsel %vm392_vm0, %v642_v63, 0.0 }
 0x1a9   : > { %647 = vadd.xlane.f32.xlu1 %v646_v0 }
 0x1ba   : > { %1124 = vrot.lane.b32.xlu1 %v6574_v1, %s6393_s12 }
 0x1be   : > { %1126 = vrot.lane.b32.xlu1 %v6578_v2, %s6393_s12 }
 0x1c2   : > { %1128 = vrot.lane.b32.xlu1 %v6582_v3, %s6393_s12 }
 0x1c6   : > { %1132 = vrot.lane.b32.xlu1 %v6592_v7, %s6393_s12 }
 0x1ca   : > { %1136 = vrot.lane.b32.xlu1 %v6602_v11, %s6393_s12 }
 0x232   : > { %v645_v12 = vpop.xlane.xlu1 %644 }
 0x233   : > { %v649_v13 = vmul.f32 0.03125, %v645_v12 }
 0x235   : > { %v651_v14 = vadd.f32 1e-05, %v649_v13 }
 0x236   : > { %v648_v15 = vpop.xlane.xlu1 %647 }
 0x237   : > { %6125 = vrsqrt.f32 %v651_v14  ;;  %v650_v16 = vmul.f32 0.03125, %v648_v15 }
 0x239   : > { %v652_v17 = vadd.f32 1e-05, %v650_v16 }
 0x23a   : > { %v1125_v36 = vpop.permute.xlu1 %1124 }
 0x23b   : > { %6127 = vrsqrt.f32 %v652_v17 }
 0x23e   : > { %v1127_v37 = vpop.permute.xlu1 %1126 }
 0x241   : > { %v6126_v18 = vpop.eup %6125 }
 0x242   : > { %v655_v20 = vmul.f32 %v6126_v18, %v639_v57  ;;  %v1129_v38 = vpop.permute.xlu1 %1128 }
 0x244   : > { %v664_v22 = vmul.f32 %v4915_v19, %v655_v20 }
 0x245   : > { %v6128_v23 = vpop.eup %6127 }
 0x246   : > { %v656_v24 = vmul.f32 %v6128_v23, %v640_v61  ;;  %v673_v25 = vadd.f32 %v4916_v21, %v664_v22  ;;  %v1133_v39 = vpop.permute.xlu1 %1132 }
 0x248   : > { %v665_v26 = vmul.f32 %v4915_v19, %v656_v24  ;;  %5472 = vmatprep.mubr.msk.f32.mxu0 %vm392_vm0, %v673_v25 }
 0x24a   : > { %v674_v27 = vadd.f32 %v4916_v21, %v665_v26  ;;  %v1137_v40 = vpop.permute.xlu1 %1136 }
 0x24c   : > { %5473 = vmatmul.mubr.msk.f32.vlgmr.msra.gmra.mrb[0].mxu0 %vm392_vm0, %v674_v27 }
 0x24d   : > { %5479 = vmatprep.mubr.msk.f32.mxu0 %vm764_vm1, %v6574_v1 }
 0x31f   : > { %v5474_v28 = vpop.f32.mrb[0].mxu0 }
 0x320   : > { %v751_v29 = vpop.f32.mrb[1].mxu0 }
 0x321   : > { %v6622_v31 = vpack.i.bf16 %v5474_v28, %v751_v29  ;;  %v5891_v32 = vpack.c.bf16 %v5474_v28, %v751_v29 }
 0x323   : > { %6051 = vrot.lane.b32.xlu0 %v6622_v31, %s6393_s12  ;;  %5893 = vmatprep.subr.msk.bf16.mxu0 %vm6618_vm2, %v5891_v32 }
 0x324   : > { %6056 = vrot.lane.b32.xlu1 %v6622_v31, %s6394_s26  ;;  %5896 = vmatpush3.bf16.xpose.msk.msra.mxu0 %vm6618_vm2, %v5891_v32 }
 0x327   : > { %1130 = vrot.lane.b32.xlu0 %v6632_v33, %s6393_s12 }
 0x328   : > { %6061 = vrot.lane.b32.xlu1 %v6622_v31, %s6395_s28  ;;  %s6406_s28 = smov 76  }
 0x32b   : > { %1134 = vrot.lane.b32.xlu0 %v6638_v34, %s6393_s12  ;;  %5480 = vmatmul.mubr.msk.f32.vlgmr.msra.gmra.mrb[2].mxu0 %vm764_vm1, %v6578_v2 }
 0x32c   : > { %5482 = vmatprep.mubr.msk.f32.mxu0 %vm764_vm1, %v6582_v3 }
 0x32f   : > { %1138 = vrot.lane.b32.xlu0 %v6647_v35, %s6393_s12  ;;  %5483 = vmatmul.mubr.msk.f32.gmra.mrb[4].mxu0 %vm764_vm1, %v6632_v33  ;;  %s6398_s12 = smov 88  }
 0x330   : > { %5485 = vmatprep.mubr.msk.f32.mxu0 %vm764_vm1, %v6592_v7 }
 0x333   : > { %5486 = vmatmul.mubr.msk.f32.gmra.mrb[6].mxu0 %vm764_vm1, %v6638_v34 }
 0x334   : > { %5488 = vmatprep.mubr.msk.f32.mxu0 %vm764_vm1, %v6602_v11 }
 0x337   : > { %5489 = vmatmul.mubr.msk.f32.gmra.mrb[8].mxu0 %vm764_vm1, %v6647_v35 }
 0x338   : > { %5511 = vmatprep.mubr.msk.f32.mxu0 %vm764_vm1, %v1125_v36 }
 0x395   : > { %v6052_v41 = vpop.permute.xlu0 %6051 }
 0x396   : > { %v6054_v42 = vunpack.i.h.bf16 %v6052_v41  ;;  %v6053_v43 = vunpack.i.l.bf16 %v6052_v41  ;;  %v6057_v44 = vpop.permute.xlu1 %6056 }
 0x397   : > { %v6059_v45 = vunpack.i.h.bf16 %v6057_v44  ;;  %v6058_v46 = vunpack.i.l.bf16 %v6057_v44 }
 0x398   : > { %v5901_v47 = vpack.c.bf16 %v6054_v42, %v6053_v43 }
 0x399   : > { %v5897_v48 = vpack.c.bf16 %v6059_v45, %v6058_v46  ;;  %v1131_v53 = vpop.permute.xlu0 %1130 }
 0x39a   : > { %v6062_v49 = vpop.permute.xlu1 %6061  ;;  %5903 = vmatprep.subr.msk.bf16.mxu0 %vm6618_vm2, %v5901_v47 }
 0x39b   : > { %v6064_v50 = vunpack.i.h.bf16 %v6062_v49  ;;  %v6063_v51 = vunpack.i.l.bf16 %v6062_v49  ;;  %5898 = vmatprep.subr.bf16.mxu1 %v5897_v48  ;;  %5906 = vmatpush3.bf16.xpose.msk.msra.mxu0 %vm6618_vm2, %v5901_v47 }
 0x39c   : > { %5900 = vmatpush3.bf16.msra.mxu1 %v5897_v48 }
 0x39d   : > { %v6666_v52 = vpack.c.bf16 %v6064_v50, %v6063_v51  ;;  %v1135_v54 = vpop.permute.xlu0 %1134 }
 0x39f   : > { %5908 = vmatprep.subr.bf16.mxu1 %v6666_v52 }
 0x3a1   : > { %v1139_v55 = vpop.permute.xlu0 %1138 }
 0x3a2   : > { %5512 = vmatmul.mubr.msk.f32.vlgmr.msra.gmra.mrb[10].mxu0 %vm764_vm1, %v1127_v37 }
 0x3a3   : > { %5514 = vmatprep.mubr.msk.f32.mxu0 %vm764_vm1, %v1129_v38 }
 0x3a6   : > { %5515 = vmatmul.mubr.msk.f32.gmra.mrb[12].mxu0 %vm764_vm1, %v1131_v53 }
 0x3a7   : > { %5517 = vmatprep.mubr.msk.f32.mxu0 %vm764_vm1, %v1133_v39 }
 0x3aa   : > { %5518 = vmatmul.mubr.msk.f32.gmra.mrb[14].mxu0 %vm764_vm1, %v1135_v54 }
 0x3ab   : > { %5520 = vmatprep.mubr.msk.f32.mxu0 %vm764_vm1, %v1137_v40 }
 0x3ae   : > { %5521 = vmatmul.mubr.msk.f32.gmra.mrb[16].mxu0 %vm764_vm1, %v1139_v55 }
 0x3fe   : > { %v5481_v56 = vpop.f32.mrb[2].mxu0 }
 0x3ff   : > { %v861_v57 = vpop.f32.mrb[3].mxu0  ;;  %v904_v58 = vsel %vm900_vm3, %v5481_v56, -inf }
 0x400   : > { %905 = vmax.xlane.f32.xlu0 %v904_v58  ;;  %v901_v59 = vsel %vm900_vm3, %v861_v57, -inf }
 0x401   : > { %902 = vmax.xlane.f32.xlu1 %v901_v59 }
 0x402   : > { %v5484_v60 = vpop.f32.mrb[4].mxu0 }
 0x403   : > { %v871_v61 = vpop.f32.mrb[5].mxu0  ;;  %v910_v62 = vsel %vm900_vm3, %v5484_v60, -inf }
 0x404   : > { %911 = vmax.xlane.f32.xlu0 %v910_v62  ;;  %v907_v4 = vsel %vm900_vm3, %v871_v61, -inf }
 0x406   : > { %v6679_v63 = vpop.f32.mrb[6].mxu0 }
 0x407   : > { %v881_v0 = vpop.f32.mrb[7].mxu0  ;;  %v916_v9 = vsel %vm900_vm3, %v6679_v63, -inf }
 0x408   : > { %908 = vmax.xlane.f32.xlu0 %v907_v4  ;;  %v913_v5 = vsel %vm900_vm3, %v881_v0, -inf }
 0x409   : > { %914 = vmax.xlane.f32.xlu1 %v913_v5 }
 0x40a   : > { %v6683_v6 = vpop.f32.mrb[8].mxu0 }
 0x40b   : > { %v891_v8 = vpop.f32.mrb[9].mxu0  ;;  %v922_v12 = vsel %vm900_vm3, %v6683_v6, -inf }
 0x40c   : > { %917 = vmax.xlane.f32.xlu0 %v916_v9  ;;  %v919_v10 = vsel %vm900_vm3, %v891_v8, -inf }
 0x40d   : > { %920 = vmax.xlane.f32.xlu1 %v919_v10 }
 0x410   : > { %923 = vmax.xlane.f32.xlu0 %v922_v12 }
 0x475   : > { %v6690_v13 = vpop.f32.mrb[10].mxu0 }
 0x476   : > { %v6692_v14 = vpop.f32.mrb[11].mxu0  ;;  %v1272_v15 = vsel %vm900_vm3, %v6690_v13, -inf }
 0x477   : > { %1273 = vmax.xlane.f32.xlu0 %v1272_v15  ;;  %v1269_v16 = vsel %vm900_vm3, %v6692_v14, -inf }
 0x478   : > { %1270 = vmax.xlane.f32.xlu1 %v1269_v16 }
 0x479   : > { %v6698_v17 = vpop.f32.mrb[12].mxu0 }
 0x47a   : > { %v6700_v18 = vpop.f32.mrb[13].mxu0  ;;  %v1278_v19 = vsel %vm900_vm3, %v6698_v17, -inf }
 0x47b   : > { %1279 = vmax.xlane.f32.xlu0 %v1278_v19  ;;  %v1275_v20 = vsel %vm900_vm3, %v6700_v18, -inf }
 0x47c   : > { %1276 = vmax.xlane.f32.xlu1 %v1275_v20 }
 0x47d   : > { %v6706_v21 = vpop.f32.mrb[14].mxu0 }
 0x47e   : > { %v6708_v22 = vpop.f32.mrb[15].mxu0  ;;  %v1284_v23 = vsel %vm900_vm3, %v6706_v21, -inf }
 0x47f   : > { %1285 = vmax.xlane.f32.xlu0 %v1284_v23  ;;  %v1281_v26 = vsel %vm900_vm3, %v6708_v22, -inf }
 0x481   : > { %v6712_v24 = vpop.f32.mrb[16].mxu0 }
 0x482   : > { %v6714_v25 = vpop.f32.mrb[17].mxu0  ;;  %v1290_v27 = vsel %vm900_vm3, %v6712_v24, -inf }
 0x483   : > { %1282 = vmax.xlane.f32.xlu0 %v1281_v26  ;;  %v1287_v28 = vsel %vm900_vm3, %v6714_v25, -inf }
 0x487   : > { %1291 = vmax.xlane.f32.xlu0 %v1290_v27 }
 0x48b   : > { %1288 = vmax.xlane.f32.xlu0 %v1287_v28 }
 0x48d   : > { %v906_v29 = vpop.xlane.xlu0 %905  ;;  %1757 = vrot.lane.b32.xlu1 %v6574_v1, %s6396_s29 }
 0x48e   : > { %v926_v32 = vsub.f32 %v5481_v56, %v906_v29  ;;  %v903_v36 = vpop.xlane.xlu1 %902 }
 0x48f   : > { %v925_v37 = vsub.f32 %v861_v57, %v903_v36 }
 0x490   : > { %v935_v38 = vmul.f32 1.442695, %v926_v32 }
 0x491   : > { %v933_v39 = vmul.f32 1.442695, %v925_v37  ;;  %v912_v40 = vpop.xlane.xlu0 %911  ;;  %1759 = vrot.lane.b32.xlu1 %v6578_v2, %s6396_s29 }
 0x492   : > { %v928_v41 = vsub.f32 %v5484_v60, %v912_v40 }
 0x493   : > { %6129 = vpow2.f32 %v933_v39 }
 0x494   : > { %6131 = vpow2.f32 %v935_v38  ;;  %v939_v42 = vmul.f32 1.442695, %v928_v41 }
 0x495   : > { %v909_v43 = vpop.xlane.xlu0 %908  ;;  %1761 = vrot.lane.b32.xlu1 %v6582_v3, %s6396_s29 }
 0x496   : > { %v927_v44 = vsub.f32 %v871_v61, %v909_v43  ;;  %v915_v45 = vpop.xlane.xlu1 %914  ;;  %6133 = vpow2.f32 %v939_v42 }
 0x497   : > { %v929_v46 = vsub.f32 %v881_v0, %v915_v45 }
 0x498   : > { %v937_v47 = vmul.f32 1.442695, %v927_v44 }
 0x499   : > { %v941_v48 = vmul.f32 1.442695, %v929_v46  ;;  %v918_v49 = vpop.xlane.xlu0 %917  ;;  %1763 = vrot.lane.b32.xlu1 %v6632_v33, %s6396_s29 }
 0x49a   : > { %6135 = vpow2.f32 %v937_v47  ;;  %v930_v50 = vsub.f32 %v6679_v63, %v918_v49  ;;  %v921_v51 = vpop.xlane.xlu1 %920 }
 0x49b   : > { %6137 = vpow2.f32 %v941_v48  ;;  %v931_v53 = vsub.f32 %v891_v8, %v921_v51 }
 0x49c   : > { %v943_v54 = vmul.f32 1.442695, %v930_v50 }
 0x49d   : > { %v6731_v55 = vpop.eup %6129  ;;  %v945_v56 = vmul.f32 1.442695, %v931_v53  ;;  %v924_v57 = vpop.xlane.xlu0 %923  ;;  %1765 = vrot.lane.b32.xlu1 %v6592_v7, %s6396_s29 }
 0x49e   : > { %v6735_v58 = vpop.eup %6131  ;;  %6139 = vpow2.f32 %v943_v54  ;;  %v932_v59 = vsub.f32 %v6683_v6, %v924_v57  ;;  %5495 = vmatprep.mubr.msk.f32.mxu1 %vm900_vm3, %v6731_v55 }
 0x49f   : > { %6141 = vpow2.f32 %v945_v56  ;;  %5496 = vmatmul.mubr.msk.f32.vlgmr.msra.gmra.mrb[10].mxu1 %vm900_vm3, %v6735_v58 }
 0x4a0   : > { %v947_v60 = vmul.f32 1.442695, %v932_v59  ;;  %5910 = vmatpush3.bf16.msra.mxu1 %v6666_v52  ;;  %v6747_v61 = vpop.eup %6133 }
 0x4a1   : > { %6066 = vrot.lane.b32.xlu0 %v6622_v31, %s6396_s29  ;;  %1767 = vrot.lane.b32.xlu1 %v6638_v34, %s6396_s29 }
 0x4a2   : > { %6143 = vpow2.f32 %v947_v60 }
 0x4a4   : > { %v6749_v62 = vpop.eup %6135 }
 0x4a5   : > { %v6751_v63 = vpop.eup %6137  ;;  %5498 = vmatprep.mubr.msk.f32.mxu1 %vm900_vm3, %v6749_v62  ;;  %1769 = vrot.lane.b32.xlu0 %v6602_v11, %s6396_s29 }
 0x4a6   : > { %1771 = vrot.lane.b32.xlu1 %v6647_v35, %s6396_s29  ;;  %5499 = vmatmul.mubr.msk.f32.gmra.mrb[12].mxu1 %vm900_vm3, %v6747_v61 }
 0x4a7   : > { %5501 = vmatprep.mubr.msk.f32.mxu1 %vm900_vm3, %v6751_v63 }
 0x4a8   : > { %v6763_v52 = vpop.eup %6139 }
 0x4a9   : > { %v6765_v0 = vpop.eup %6141 }
 0x4aa   : > { %5502 = vmatmul.mubr.msk.f32.gmra.mrb[14].mxu1 %vm900_vm3, %v6763_v52 }
 0x4ab   : > { %5504 = vmatprep.mubr.msk.f32.mxu1 %vm900_vm3, %v6765_v0 }
 0x4ac   : > { %v6771_v4 = vpop.eup %6143 }
 0x4ae   : > { %5505 = vmatmul.mubr.msk.f32.gmra.mrb[16].mxu1 %vm900_vm3, %v6771_v4 }
 0x504   : > { %v1274_v5 = vpop.xlane.xlu0 %1273 }
 0x505   : > { %v1294_v6 = vsub.f32 %v6690_v13, %v1274_v5  ;;  %v1271_v8 = vpop.xlane.xlu1 %1270 }
 0x506   : > { %v1293_v9 = vsub.f32 %v6692_v14, %v1271_v8 }
 0x507   : > { %v1303_v10 = vmul.f32 1.442695, %v1294_v6 }
 0x508   : > { %v1301_v12 = vmul.f32 1.442695, %v1293_v9  ;;  %v1280_v15 = vpop.xlane.xlu0 %1279 }
 0x509   : > { %v1296_v16 = vsub.f32 %v6698_v17, %v1280_v15  ;;  %v1277_v19 = vpop.xlane.xlu1 %1276 }
 0x50a   : > { %6145 = vpow2.f32 %v1301_v12  ;;  %v1295_v20 = vsub.f32 %v6700_v18, %v1277_v19 }
 0x50b   : > { %6147 = vpow2.f32 %v1303_v10  ;;  %v1307_v23 = vmul.f32 1.442695, %v1296_v16 }
 0x50c   : > { %v1305_v26 = vmul.f32 1.442695, %v1295_v20  ;;  %v1286_v27 = vpop.xlane.xlu0 %1285 }
 0x50d   : > { %v1298_v28 = vsub.f32 %v6706_v21, %v1286_v27  ;;  %v1758_v17 = vpop.permute.xlu1 %1757 }
 0x50e   : > { %6149 = vpow2.f32 %v1305_v26 }
 0x50f   : > { %6151 = vpow2.f32 %v1307_v23  ;;  %v1311_v29 = vmul.f32 1.442695, %v1298_v28 }
 0x510   : > { %v1283_v13 = vpop.xlane.xlu0 %1282 }
 0x511   : > { %v1297_v14 = vsub.f32 %v6708_v22, %v1283_v13  ;;  %v1760_v41 = vpop.permute.xlu1 %1759 }
 0x513   : > { %v1309_v32 = vmul.f32 1.442695, %v1297_v14 }
 0x514   : > { %v6781_v36 = vpop.eup %6145  ;;  %v1292_v37 = vpop.xlane.xlu0 %1291 }
 0x515   : > { %v6783_v38 = vpop.eup %6147  ;;  %6153 = vpow2.f32 %v1309_v32  ;;  %5527 = vmatprep.mubr.msk.f32.mxu1 %vm900_vm3, %v6781_v36  ;;  %v1300_v18 = vsub.f32 %v6712_v24, %v1292_v37 }
 0x516   : > { %6155 = vpow2.f32 %v1311_v29  ;;  %5528 = vmatmul.mubr.msk.f32.vlgmr.msra.gmra.mrb[18].mxu1 %vm900_vm3, %v6783_v38 }
 0x517   : > { %v1315_v42 = vmul.f32 1.442695, %v1300_v18 }
 0x518   : > { %v6790_v21 = vpop.eup %6149  ;;  %v1289_v22 = vpop.xlane.xlu0 %1288 }
 0x519   : > { %v6792_v39 = vpop.eup %6151  ;;  %v1299_v40 = vsub.f32 %v6714_v25, %v1289_v22  ;;  %5530 = vmatprep.mubr.msk.f32.mxu1 %vm900_vm3, %v6790_v21  ;;  %v1762_v25 = vpop.permute.xlu1 %1761 }
 0x51a   : > { %5531 = vmatmul.mubr.msk.f32.gmra.mrb[20].mxu1 %vm900_vm3, %v6792_v39 }
 0x51b   : > { %v1313_v43 = vmul.f32 1.442695, %v1299_v40 }
 0x51c   : > { %v6067_v24 = vpop.permute.xlu0 %6066 }
 0x51d   : > { %6157 = vpow2.f32 %v1313_v43  ;;  %v6069_v44 = vunpack.i.h.bf16 %v6067_v24  ;;  %v6068_v45 = vunpack.i.l.bf16 %v6067_v24  ;;  %v1764_v49 = vpop.permute.xlu1 %1763 }
 0x51e   : > { %6159 = vpow2.f32 %v1315_v42 }
 0x51f   : > { %v6799_v46 = vpop.eup %6153  ;;  %v5911_v47 = vpack.c.bf16 %v6069_v44, %v6068_v45 }
 0x520   : > { %v6801_v48 = vpop.eup %6155  ;;  %5533 = vmatprep.mubr.msk.f32.mxu1 %vm900_vm3, %v6799_v46  ;;  %v1770_v56 = vpop.permute.xlu0 %1769 }
 0x521   : > { %5534 = vmatmul.mubr.msk.f32.gmra.mrb[22].mxu1 %vm900_vm3, %v6801_v48  ;;  %5913 = vmatprep.subr.msk.bf16.mxu1 %vm6618_vm2, %v5911_v47  ;;  %v1766_v53 = vpop.permute.xlu1 %1765 }
 0x522   : > { %5916 = vmatpush3.bf16.xpose.msk.msra.mxu1 %vm6618_vm2, %v5911_v47 }
 0x525   : > { %v1768_v54 = vpop.permute.xlu1 %1767 }
 0x527   : > { %v6811_v50 = vpop.eup %6157 }
 0x528   : > { %v6813_v51 = vpop.eup %6159  ;;  %5536 = vmatprep.mubr.msk.f32.mxu1 %vm900_vm3, %v6811_v50 }
 0x529   : > { %5537 = vmatmul.mubr.msk.f32.gmra.mrb[24].mxu1 %vm900_vm3, %v6813_v51  ;;  %v1772_v57 = vpop.permute.xlu1 %1771 }
 0x52a   : > { %5571 = vmatprep.mubr.msk.f32.mxu1 %vm764_vm1, %v1758_v17 }
 0x52d   : > { %5572 = vmatmul.mubr.msk.f32.vlgmr.msra.gmra.mrb[26].mxu1 %vm764_vm1, %v1760_v41 }
 0x52e   : > { %5574 = vmatprep.mubr.msk.f32.mxu1 %vm764_vm1, %v1762_v25 }
 0x531   : > { %5575 = vmatmul.mubr.msk.f32.gmra.mrb[28].mxu1 %vm764_vm1, %v1764_v49 }
 0x532   : > { %5577 = vmatprep.mubr.msk.f32.mxu1 %vm764_vm1, %v1766_v53 }
 0x535   : > { %5578 = vmatmul.mubr.msk.f32.gmra.mrb[30].mxu1 %vm764_vm1, %v1768_v54 }
 0x536   : > { %5580 = vmatprep.mubr.msk.f32.mxu1 %vm764_vm1, %v1770_v56 }
 0x539   : > { %5581 = vmatmul.mubr.msk.f32.gmra.mrb[32].mxu1 %vm764_vm1, %v1772_v57 }
 0x572   : > { %v6827_v59 = vpop.f32.mrb[10].mxu1 }
 0x573   : > { %7730 = vst [vmem:[#allocation2_spill] sm:$0xff] %v6827_v59  ;;  %v6829_v60 = vpop.f32.mrb[11].mxu1 }
 0x579   : > { %v6831_v5 = vpop.f32.mrb[12].mxu1 }
 0x57a   : > { %7731 = vst [vmem:[#allocation3_spill] sm:$0xff] %v6831_v5  ;;  %v6833_v6 = vpop.f32.mrb[13].mxu1 }
 0x57b   : > { %7732 = vst [vmem:[#allocation4_spill] sm:$0xff] %v6833_v6 }
 0x57d   : > { %v6835_v8 = vpop.f32.mrb[14].mxu1 }
 0x57e   : > { %7733 = vst [vmem:[#allocation5_spill] sm:$0xff] %v6835_v8  ;;  %v6837_v9 = vpop.f32.mrb[15].mxu1 }
 0x57f   : > { %7734 = vst [vmem:[#allocation6_spill] sm:$0xff] %v6837_v9 }
 0x581   : > { %v6839_v10 = vpop.f32.mrb[16].mxu1 }
 0x582   : > { %7735 = vst [vmem:[#allocation7_spill] sm:$0xff] %v6839_v10  ;;  %v6841_v12 = vpop.f32.mrb[17].mxu1 }
 0x583   : > { %7736 = vst [vmem:[#allocation8_spill] sm:$0xff] %v6841_v12 }
 0x5e9   : > { %v6843_v15 = vpop.f32.mrb[18].mxu1 }
 0x5ea   : > { %v6845_v16 = vpop.f32.mrb[19].mxu1 }
 0x5ed   : > { %v6847_v19 = vpop.f32.mrb[20].mxu1 }
 0x5ee   : > { %v6849_v20 = vpop.f32.mrb[21].mxu1 }
 0x5f4   : > { %v6851_v23 = vpop.f32.mrb[22].mxu1 }
 0x5f5   : > { %v6853_v26 = vpop.f32.mrb[23].mxu1 }
 0x5fc   : > { %v6855_v27 = vpop.f32.mrb[24].mxu1 }
 0x5fd   : > { %v6857_v28 = vpop.f32.mrb[25].mxu1 }
 0x600   : > { %v6859_v13 = vpop.f32.mrb[26].mxu1 }
 0x601   : > { %v1863_v14 = vpop.f32.mrb[27].mxu1  ;;  %v1905_v29 = vsel %vm900_vm3, %v6859_v13, -inf }
 0x602   : > { %1906 = vmax.xlane.f32.xlu1 %v1905_v29  ;;  %v1902_v32 = vsel %vm900_vm3, %v1863_v14, -inf }
 0x603   : > { %1903 = vmax.xlane.f32.xlu0 %v1902_v32 }
 0x604   : > { %v6864_v17 = vpop.f32.mrb[28].mxu1 }
 0x605   : > { %v1873_v37 = vpop.f32.mrb[29].mxu1  ;;  %v1911_v18 = vsel %vm900_vm3, %v6864_v17, -inf }
 0x606   : > { %v1908_v42 = vsel %vm900_vm3, %v1873_v37, -inf }
 0x607   : > { %1912 = vmax.xlane.f32.xlu0 %v1911_v18 }
 0x608   : > { %v6868_v22 = vpop.f32.mrb[30].mxu1 }
 0x609   : > { %v6870_v40 = vpop.f32.mrb[31].mxu1  ;;  %v1917_v41 = vsel %vm900_vm3, %v6868_v22, -inf }
 0x60a   : > { %1918 = vmax.xlane.f32.xlu1 %v1917_v41  ;;  %v1914_v45 = vsel %vm900_vm3, %v6870_v40, -inf }
 0x60b   : > { %1909 = vmax.xlane.f32.xlu0 %v1908_v42 }
 0x60c   : > { %v6875_v43 = vpop.f32.mrb[32].mxu1 }
 0x60d   : > { %v6877_v24 = vpop.f32.mrb[33].mxu1  ;;  %v1923_v44 = vsel %vm900_vm3, %v6875_v43, -inf }
 0x60e   : > { %1924 = vmax.xlane.f32.xlu1 %v1923_v44  ;;  %v1920_v47 = vsel %vm900_vm3, %v6877_v24, -inf }
 0x60f   : > { %1915 = vmax.xlane.f32.xlu0 %v1914_v45 }
 0x613   : > { %1921 = vmax.xlane.f32.xlu0 %v1920_v47 }
 0x61f   : > { %6076 = vrot.lane.b32.xlu1 %v6622_v31, %s6397_s11 }
 0x623   : > { %2265 = vrot.lane.b32.xlu1 %v6574_v1, %s6397_s11 }
 0x627   : > { %2267 = vrot.lane.b32.xlu1 %v6578_v2, %s6397_s11 }
 0x629   : > { %6071 = vrot.lane.b32.xlu0 %v6622_v31, %s6398_s12  ;;  %s6407_s12 = smov 68  }
 0x62b   : > { %2271 = vrot.lane.b32.xlu1 %v6632_v33, %s6397_s11 }
 0x62d   : > { %2269 = vrot.lane.b32.xlu0 %v6582_v3, %s6397_s11 }
 0x62f   : > { %2273 = vrot.lane.b32.xlu1 %v6592_v7, %s6397_s11 }
 0x631   : > { %6081 = vrot.lane.b32.xlu0 %v6622_v31, %s6399_s15 }
 0x633   : > { %2277 = vrot.lane.b32.xlu1 %v6602_v11, %s6397_s11 }
 0x635   : > { %2275 = vrot.lane.b32.xlu0 %v6638_v34, %s6397_s11 }
 0x637   : > { %2773 = vrot.lane.b32.xlu1 %v6574_v1, %s6399_s15 }
 0x639   : > { %2279 = vrot.lane.b32.xlu0 %v6647_v35, %s6397_s11 }
 0x63b   : > { %2777 = vrot.lane.b32.xlu1 %v6582_v3, %s6399_s15 }
 0x63d   : > { %2775 = vrot.lane.b32.xlu0 %v6578_v2, %s6399_s15 }
 0x63f   : > { %2781 = vrot.lane.b32.xlu1 %v6592_v7, %s6399_s15 }
 0x641   : > { %2779 = vrot.lane.b32.xlu0 %v6632_v33, %s6399_s15 }
 0x643   : > { %2785 = vrot.lane.b32.xlu1 %v6602_v11, %s6399_s15 }
 0x645   : > { %2783 = vrot.lane.b32.xlu0 %v6638_v34, %s6399_s15 }
 0x647   : > { %6086 = vrot.lane.b32.xlu1 %v6622_v31, %s6400_s16 }
 0x649   : > { %2787 = vrot.lane.b32.xlu0 %v6647_v35, %s6399_s15 }
 0x64b   : > { %3281 = vrot.lane.b32.xlu1 %v6574_v1, %s6401_s17 }
 0x64d   : > { %6091 = vrot.lane.b32.xlu0 %v6622_v31, %s6401_s17 }
 0x68f   : > { %v1907_v53 = vpop.xlane.xlu1 %1906 }
 0x690   : > { %v1904_v25 = vpop.xlane.xlu0 %1903  ;;  %v1927_v32 = vsub.f32 %v6859_v13, %v1907_v53 }
 0x691   : > { %v1926_v49 = vsub.f32 %v1863_v14, %v1904_v25 }
 0x692   : > { %v1936_v44 = vmul.f32 1.442695, %v1927_v32 }
 0x693   : > { %v1934_v54 = vmul.f32 1.442695, %v1926_v49 }
 0x694   : > { %v1913_v56 = vpop.xlane.xlu0 %1912 }
 0x695   : > { %6161 = vpow2.f32 %v1934_v54  ;;  %v1929_v45 = vsub.f32 %v6864_v17, %v1913_v56 }
 0x696   : > { %6163 = vpow2.f32 %v1936_v44 }
 0x697   : > { %v1919_v57 = vpop.xlane.xlu1 %1918  ;;  %v1940_v49 = vmul.f32 1.442695, %v1929_v45 }
 0x698   : > { %v1910_v29 = vpop.xlane.xlu0 %1909  ;;  %v1931_v13 = vsub.f32 %v6868_v22, %v1919_v57 }
 0x699   : > { %v1928_v18 = vsub.f32 %v1873_v37, %v1910_v29 }
 0x69b   : > { %v1925_v41 = vpop.xlane.xlu1 %1924  ;;  %v1938_v10 = vmul.f32 1.442695, %v1928_v18 }
 0x69c   : > { %v1916_v42 = vpop.xlane.xlu0 %1915 }
 0x69d   : > { %v1930_v12 = vsub.f32 %v6870_v40, %v1916_v42  ;;  %6165 = vpow2.f32 %v1938_v10  ;;  %v1944_v40 = vmul.f32 1.442695, %v1931_v13  ;;  %v1933_v42 = vsub.f32 %v6875_v43, %v1925_v41 }
 0x69e   : > { %6167 = vpow2.f32 %v1940_v49 }
 0x69f   : > { %v6911_v47 = vpop.eup %6161  ;;  %v6077_v14 = vpop.permute.xlu1 %6076  ;;  %v1942_v37 = vmul.f32 1.442695, %v1930_v12  ;;  %v1948_v10 = vmul.f32 1.442695, %v1933_v42 }
 0x6a0   : > { %5587 = vmatprep.mubr.msk.f32.mxu1 %vm900_vm3, %v6911_v47  ;;  %v1922_v25 = vpop.xlane.xlu0 %1921  ;;  %v6079_v56 = vunpack.i.h.bf16 %v6077_v14  ;;  %v6078_v29 = vunpack.i.l.bf16 %v6077_v14 }
 0x6a1   : > { %v1932_v53 = vsub.f32 %v6877_v24, %v1922_v25  ;;  %6169 = vpow2.f32 %v1942_v37  ;;  %v6921_v24 = vpop.eup %6163 }
 0x6a2   : > { %v5921_v22 = vpack.c.bf16 %v6079_v56, %v6078_v29  ;;  %6171 = vpow2.f32 %v1944_v40 }
 0x6a3   : > { %v2266_v54 = vpop.permute.xlu1 %2265  ;;  %v1946_v8 = vmul.f32 1.442695, %v1932_v53 }
 0x6a4   : > { %v6072_v17 = vpop.permute.xlu0 %6071 }
 0x6a5   : > { %v6074_v32 = vunpack.i.h.bf16 %v6072_v17  ;;  %v6073_v18 = vunpack.i.l.bf16 %v6072_v17  ;;  %6173 = vpow2.f32 %v1946_v8 }
 0x6a6   : > { %6175 = vpow2.f32 %v1948_v10 }
 0x6a7   : > { %v2268_v44 = vpop.permute.xlu1 %2267  ;;  %v5917_v45 = vpack.c.bf16 %v6074_v32, %v6073_v18  ;;  %v6923_v14 = vpop.eup %6165 }
 0x6a8   : > { %v2270_v9 = vpop.permute.xlu0 %2269  ;;  %v6929_v8 = vpop.eup %6167 }
 0x6a9   : > { %5918 = vmatprep.subr.bf16.mxu1 %v5917_v45 }
 0x6aa   : > { %5920 = vmatpush3.bf16.msra.mxu1 %v5917_v45 }
 0x6ab   : > { %v2272_v12 = vpop.permute.xlu1 %2271  ;;  %5923 = vmatprep.subr.msk.bf16.mxu1 %vm6618_vm2, %v5921_v22  ;;  %v6931_v13 = vpop.eup %6169 }
 0x6ac   : > { %v6082_v57 = vpop.permute.xlu0 %6081  ;;  %v6939_v17 = vpop.eup %6171 }
 0x6ad   : > { %5588 = vmatmul.mubr.msk.f32.vlgmr.msra.gmra.mrb[34].mxu1 %vm900_vm3, %v6921_v24  ;;  %v6084_v43 = vunpack.i.h.bf16 %v6082_v57  ;;  %v6083_v41 = vunpack.i.l.bf16 %v6082_v57 }
 0x6ae   : > { %5590 = vmatprep.mubr.msk.f32.mxu1 %vm900_vm3, %v6923_v14 }
 0x6af   : > { %v2274_v25 = vpop.permute.xlu1 %2273  ;;  %v5931_v37 = vpack.c.bf16 %v6084_v43, %v6083_v41  ;;  %v6943_v29 = vpop.eup %6173 }
 0x6b0   : > { %v2276_v49 = vpop.permute.xlu0 %2275  ;;  %v6949_v18 = vpop.eup %6175 }
 0x6b1   : > { %5591 = vmatmul.mubr.msk.f32.gmra.mrb[36].mxu1 %vm900_vm3, %v6929_v8 }
 0x6b2   : > { %5593 = vmatprep.mubr.msk.f32.mxu1 %vm900_vm3, %v6931_v13 }
 0x6b3   : > { %v2278_v53 = vpop.permute.xlu1 %2277  ;;  %5926 = vmatpush3.bf16.xpose.msk.msra.mxu1 %vm6618_vm2, %v5921_v22 }
 0x6b4   : > { %v2280_v56 = vpop.permute.xlu0 %2279  ;;  %5933 = vmatprep.subr.msk.bf16.mxu1 %vm6618_vm2, %v5931_v37 }
 0x6b5   : > { %5594 = vmatmul.mubr.msk.f32.gmra.mrb[38].mxu1 %vm900_vm3, %v6939_v17 }
 0x6b6   : > { %5596 = vmatprep.mubr.msk.f32.mxu1 %vm900_vm3, %v6943_v29 }
 0x6b7   : > { %v2774_v32 = vpop.permute.xlu1 %2773 }
 0x6b8   : > { %v2776_v40 = vpop.permute.xlu0 %2775 }
 0x6b9   : > { %5597 = vmatmul.mubr.msk.f32.gmra.mrb[40].mxu1 %vm900_vm3, %v6949_v18 }
 0x6ba   : > { %5617 = vmatprep.mubr.msk.f32.mxu1 %vm764_vm1, %v2266_v54 }
 0x6bb   : > { %v2778_v42 = vpop.permute.xlu1 %2777 }
 0x6bc   : > { %v2780_v45 = vpop.permute.xlu0 %2779 }
 0x6bd   : > { %5618 = vmatmul.mubr.msk.f32.vlgmr.msra.gmra.mrb[42].mxu1 %vm764_vm1, %v2268_v44 }
 0x6be   : > { %5936 = vmatpush3.bf16.xpose.msk.msra.mxu1 %vm6618_vm2, %v5931_v37  ;;  %5620 = vmatprep.mubr.msk.f32.mxu1 %vm764_vm1, %v2270_v9 }
 0x6bf   : > { %v2782_v22 = vpop.permute.xlu1 %2781 }
 0x6c0   : > { %v2784_v10 = vpop.permute.xlu0 %2783 }
 0x6c1   : > { %5621 = vmatmul.mubr.msk.f32.gmra.mrb[44].mxu1 %vm764_vm1, %v2272_v12 }
 0x6c2   : > { %5623 = vmatprep.mubr.msk.f32.mxu1 %vm764_vm1, %v2274_v25 }
 0x6c3   : > { %v2786_v57 = vpop.permute.xlu1 %2785 }
 0x6c4   : > { %v2788_v43 = vpop.permute.xlu0 %2787 }
 0x6c5   : > { %5624 = vmatmul.mubr.msk.f32.gmra.mrb[46].mxu1 %vm764_vm1, %v2276_v49 }
 0x6c6   : > { %5626 = vmatprep.mubr.msk.f32.mxu1 %vm764_vm1, %v2278_v53 }
 0x6c7   : > { %v6087_v54 = vpop.permute.xlu1 %6086 }
 0x6c8   : > { %v6089_v41 = vunpack.i.h.bf16 %v6087_v54  ;;  %v6088_v44 = vunpack.i.l.bf16 %v6087_v54  ;;  %v6092_v5 = vpop.permute.xlu0 %6091 }
 0x6c9   : > { %v6094_v6 = vunpack.i.h.bf16 %v6092_v5  ;;  %v6093_v37 = vunpack.i.l.bf16 %v6092_v5  ;;  %5627 = vmatmul.mubr.msk.f32.gmra.mrb[48].mxu1 %vm764_vm1, %v2280_v56 }
 0x6ca   : > { %5663 = vmatprep.mubr.msk.f32.mxu1 %vm764_vm1, %v2774_v32  ;;  %v5937_v9 = vpack.c.bf16 %v6089_v41, %v6088_v44 }
 0x6cb   : > { %v6964_v12 = vpack.c.bf16 %v6094_v6, %v6093_v37 }
 0x6cc   : > { %5938 = vmatprep.subr.bf16.mxu1 %v5937_v9 }
 0x6cd   : > { %5664 = vmatmul.mubr.msk.f32.vlgmr.msra.gmra.mrb[50].mxu1 %vm764_vm1, %v2776_v40 }
 0x6ce   : > { %5940 = vmatpush3.bf16.msra.mxu1 %v5937_v9  ;;  %5666 = vmatprep.mubr.msk.f32.mxu1 %vm764_vm1, %v2778_v42 }
 0x6cf   : > { %5943 = vmatprep.subr.msk.bf16.mxu1 %vm6618_vm2, %v6964_v12 }
 0x6d1   : > { %5667 = vmatmul.mubr.msk.f32.gmra.mrb[52].mxu1 %vm764_vm1, %v2780_v45 }
 0x6d2   : > { %5669 = vmatprep.mubr.msk.f32.mxu1 %vm764_vm1, %v2782_v22 }
 0x6d5   : > { %5670 = vmatmul.mubr.msk.f32.gmra.mrb[54].mxu1 %vm764_vm1, %v2784_v10 }
 0x6d6   : > { %5672 = vmatprep.mubr.msk.f32.mxu1 %vm764_vm1, %v2786_v57 }
 0x6d9   : > { %5673 = vmatmul.mubr.msk.f32.gmra.mrb[56].mxu1 %vm764_vm1, %v2788_v43 }
 0x780   : > { %v6976_v5 = vpop.f32.mrb[34].mxu1 }
 0x781   : > { %7737 = vst [vmem:[#allocation9_spill] sm:$0xff] %v6976_v5  ;;  %v6978_v6 = vpop.f32.mrb[35].mxu1 }
 0x782   : > { %7738 = vst [vmem:[#allocation10_spill] sm:$0xff] %v6978_v6 }
 0x784   : > { %v6980_v25 = vpop.f32.mrb[36].mxu1 }
 0x785   : > { %7739 = vst [vmem:[#allocation11_spill] sm:$0xff] %v6980_v25  ;;  %v6982_v49 = vpop.f32.mrb[37].mxu1 }
 0x786   : > { %7740 = vst [vmem:[#allocation12_spill] sm:$0xff] %v6982_v49 }
 0x788   : > { %v6984_v53 = vpop.f32.mrb[38].mxu1 }
 0x789   : > { %7741 = vst [vmem:[#allocation13_spill] sm:$0xff] %v6984_v53  ;;  %v6986_v56 = vpop.f32.mrb[39].mxu1 }
 0x78a   : > { %7742 = vst [vmem:[#allocation14_spill] sm:$0xff] %v6986_v56 }
 0x78c   : > { %v6988_v32 = vpop.f32.mrb[40].mxu1 }
 0x78d   : > { %7743 = vst [vmem:[#allocation15_spill] sm:$0xff] %v6988_v32  ;;  %v6990_v40 = vpop.f32.mrb[41].mxu1 }
 0x78e   : > { %7744 = vst [vmem:[#allocation16_spill] sm:$0xff] %v6990_v40 }
 0x790   : > { %v6992_v42 = vpop.f32.mrb[42].mxu1 }
 0x791   : > { %v6994_v45 = vpop.f32.mrb[43].mxu1 }
 0x794   : > { %v6996_v22 = vpop.f32.mrb[44].mxu1 }
 0x795   : > { %v6998_v10 = vpop.f32.mrb[45].mxu1 }
 0x798   : > { %v7000_v57 = vpop.f32.mrb[46].mxu1 }
 0x799   : > { %v7002_v43 = vpop.f32.mrb[47].mxu1 }
 0x79c   : > { %v7004_v54 = vpop.f32.mrb[48].mxu1 }
 0x79d   : > { %v7006_v41 = vpop.f32.mrb[49].mxu1 }
 0x7a0   : > { %v7008_v44 = vpop.f32.mrb[50].mxu1 }
 0x7a1   : > { %v7010_v37 = vpop.f32.mrb[51].mxu1  ;;  %v2921_v9 = vsel %vm900_vm3, %v7008_v44, -inf }
 0x7a2   : > { %2922 = vmax.xlane.f32.xlu0 %v2921_v9  ;;  %v2918_v32 = vsel %vm900_vm3, %v7010_v37, -inf }
 0x7a3   : > { %2919 = vmax.xlane.f32.xlu1 %v2918_v32 }
 0x7a4   : > { %v7016_v40 = vpop.f32.mrb[52].mxu1 }
 0x7a5   : > { %v7018_v53 = vpop.f32.mrb[53].mxu1  ;;  %v2927_v56 = vsel %vm900_vm3, %v7016_v40, -inf }
 0x7a6   : > { %2928 = vmax.xlane.f32.xlu0 %v2927_v56  ;;  %v2924_v5 = vsel %vm900_vm3, %v7018_v53, -inf  ;;  %v1317_v56 = vsel %vm900_vm3, %v6781_v36, 0.0  ;;  %v1335_v36 = vsel %vm900_vm3, %v6811_v50, 0.0  ;;  %v1950_v50 = vsel %vm900_vm3, %v6911_v47, 0.0 }
 0x7a8   : > { %v7022_v25 = vpop.f32.mrb[54].mxu1 }
 0x7a9   : > { %v7024_v49 = vpop.f32.mrb[55].mxu1  ;;  %v2933_v32 = vsel %vm900_vm3, %v7022_v25, -inf }
 0x7aa   : > { %2925 = vmax.xlane.f32.xlu0 %v2924_v5  ;;  %v2930_v5 = vsel %vm900_vm3, %v7024_v49, -inf }
 0x7ac   : > { %v7028_v9 = vpop.f32.mrb[56].mxu1 }
 0x7ad   : > { %v7030_v6 = vpop.f32.mrb[57].mxu1  ;;  %v2939_v59 = vsel %vm900_vm3, %v7028_v9, -inf }
 0x7ae   : > { %2934 = vmax.xlane.f32.xlu0 %v2933_v32  ;;  %v1323_v32 = vsel %vm900_vm3, %v6790_v21, 0.0  ;;  %v949_v21 = vsel %vm900_vm3, %v6731_v55, 0.0  ;;  %v1956_v55 = vsel %vm900_vm3, %v6923_v14, 0.0  ;;  %v1332_v14 = vsel %vm900_vm3, %v6801_v48, 0.0 }
 0x7af   : > { %v2416_v48 = vsel %vm900_vm3, %v6998_v10, -inf }
 0x7b2   : > { %2940 = vmax.xlane.f32.xlu0 %v2939_v59  ;;  %v2936_v59 = vsel %vm900_vm3, %v7030_v6, -inf }
 0x7b4   : > { %3283 = vrot.lane.b32.xlu1 %v6578_v2, %s6401_s17 }
 0x7c8   : > { %3287 = vrot.lane.b32.xlu0 %v6632_v33, %s6401_s17 }
 0x7cc   : > { %3289 = vrot.lane.b32.xlu0 %v6592_v7, %s6401_s17 }
 0x7d0   : > { %3293 = vrot.lane.b32.xlu0 %v6602_v11, %s6401_s17 }
 0x7d4   : > { %3789 = vrot.lane.b32.xlu0 %v6574_v1, %s6402_s18 }
 0x7d8   : > { %2931 = vmax.xlane.f32.xlu1 %v2930_v5  ;;  %3793 = vrot.lane.b32.xlu0 %v6582_v3, %s6402_s18  ;;  %v1326_v5 = vsel %vm900_vm3, %v6792_v39, 0.0  ;;  %v961_v39 = vsel %vm900_vm3, %v6751_v63, 0.0  ;;  %v1320_v63 = vsel %vm900_vm3, %v6783_v38, 0.0 }
 0x7dc   : > { %3797 = vrot.lane.b32.xlu0 %v6592_v7, %s6402_s18  ;;  %2937 = vmax.xlane.f32.xlu1 %v2936_v59  ;;  %v1329_v59 = vsel %vm900_vm3, %v6799_v46, 0.0  ;;  %v967_v46 = vsel %vm900_vm3, %v6765_v0, 0.0  ;;  %v1968_v0 = vsel %vm900_vm3, %v6943_v29, 0.0  ;;  %v1338_v29 = vsel %vm900_vm3, %v6813_v51, 0.0 }
 0x7dd   : > { %v2422_v51 = vsel %vm900_vm3, %v7002_v43, -inf }
 0x7e0   : > { %3801 = vrot.lane.b32.xlu0 %v6602_v11, %s6402_s18 }
 0x7ed   : > { %3285 = vrot.lane.b32.xlu1 %v6582_v3, %s6401_s17 }
 0x7f1   : > { %6096 = vrot.lane.b32.xlu1 %v6622_v31, %s6402_s18 }
 0x7f5   : > { %3291 = vrot.lane.b32.xlu1 %v6638_v34, %s6401_s17 }
 0x7f9   : > { %3295 = vrot.lane.b32.xlu1 %v6647_v35, %s6401_s17 }
 0x7fd   : > { %3791 = vrot.lane.b32.xlu1 %v6578_v2, %s6402_s18 }
 0x7ff   : > { %1318 = vadd.xlane.f32.xlu0 %v1317_v56  ;;  %v955_v56 = vsel %vm900_vm3, %v6749_v62, 0.0  ;;  %v1962_v62 = vsel %vm900_vm3, %v6931_v13, 0.0 }
 0x801   : > { %3795 = vrot.lane.b32.xlu1 %v6632_v33, %s6402_s18 }
 0x803   : > { %1324 = vadd.xlane.f32.xlu0 %v1323_v32  ;;  %v7087_v32 = vpop.permute.xlu1 %3281 }
 0x805   : > { %3799 = vrot.lane.b32.xlu1 %v6638_v34, %s6402_s18 }
 0x807   : > { %1327 = vadd.xlane.f32.xlu0 %v1326_v5 }
 0x809   : > { %3803 = vrot.lane.b32.xlu1 %v6647_v35, %s6402_s18 }
 0x80b   : > { %1330 = vadd.xlane.f32.xlu0 %v1329_v59 }
 0x80f   : > { %1336 = vadd.xlane.f32.xlu0 %v1335_v36 }
 0x813   : > { %950 = vadd.xlane.f32.xlu0 %v949_v21  ;;  %v2410_v21 = vsel %vm900_vm3, %v6994_v45, -inf }
 0x817   : > { %956 = vadd.xlane.f32.xlu0 %v955_v56 }
 0x81b   : > { %962 = vadd.xlane.f32.xlu0 %v961_v39 }
 0x81f   : > { %968 = vadd.xlane.f32.xlu0 %v967_v46  ;;  %v952_v46 = vsel %vm900_vm3, %v6735_v58, 0.0 }
 0x823   : > { %1951 = vadd.xlane.f32.xlu0 %v1950_v50 }
 0x827   : > { %1957 = vadd.xlane.f32.xlu0 %v1956_v55 }
 0x82b   : > { %1963 = vadd.xlane.f32.xlu0 %v1962_v62  ;;  %v2428_v62 = vsel %vm900_vm3, %v7006_v41, -inf }
 0x82d   : > { %1321 = vadd.xlane.f32.xlu1 %v1320_v63  ;;  %v964_v63 = vsel %vm900_vm3, %v6763_v52, 0.0 }
 0x82f   : > { %v2923_v5 = vpop.xlane.xlu0 %2922  ;;  %1969 = vadd.xlane.f32.xlu0 %v1968_v0 }
 0x830   : > { %v2943_v47 = vsub.f32 %v7008_v44, %v2923_v5  ;;  %v2920_v59 = vpop.xlane.xlu1 %2919  ;;  %v7133_v5 = vld [vmem:[%s7725_s8] sm:$0xff] }
 0x831   : > { %v2942_v13 = vsub.f32 %v7010_v37, %v2920_v59  ;;  %1333 = vadd.xlane.f32.xlu1 %v1332_v14  ;;  %v1965_v59 = vsel %vm900_vm3, %v6939_v17, 0.0 }
 0x832   : > { %v2952_v36 = vmul.f32 1.442695, %v2943_v47  ;;  %v1493_v47 = vrot.slane %v7133_v5, 4 }
 0x833   : > { %v2950_v38 = vmul.f32 1.442695, %v2942_v13  ;;  %v2929_v56 = vpop.xlane.xlu0 %2928  ;;  %2411 = vmax.xlane.f32.xlu0 %v2410_v21  ;;  %v2413_v13 = vsel %vm900_vm3, %v6992_v42, -inf }
 0x834   : > { %v2945_v44 = vsub.f32 %v7016_v40, %v2929_v56  ;;  %v958_v40 = vsel %vm900_vm3, %v6747_v61, 0.0  ;;  %v970_v61 = vsel %vm900_vm3, %v6771_v4, 0.0  ;;  %v1953_v4 = vsel %vm900_vm3, %v6921_v24, 0.0  ;;  %5539 = vmatprep.subr.msk.mxu0 %vm1518_vm4, %v1493_v47 }
 0x835   : > { %6177 = vpow2.f32 %v2950_v38  ;;  %1339 = vadd.xlane.f32.xlu1 %v1338_v29  ;;  %5540 = vmatpush3.msk.msra.mxu0 %vm1518_vm4, %v1493_v47  ;;  %v1971_v24 = vsel %vm900_vm3, %v6949_v18, 0.0  ;;  %v2425_v18 = vsel %vm900_vm3, %v7000_v57, -inf }
 0x836   : > { %6179 = vpow2.f32 %v2952_v36  ;;  %v2956_v50 = vmul.f32 1.442695, %v2945_v44  ;;  %5553 = vmatprep.subr.msk.mxu0 %vm1518_vm4, %v7133_v5  ;;  %v3284_v36 = vpop.permute.xlu1 %3283 }
 0x837   : > { %v2926_v37 = vpop.xlane.xlu0 %2925  ;;  %2417 = vmax.xlane.f32.xlu0 %v2416_v48 }
 0x838   : > { %v2944_v39 = vsub.f32 %v7018_v53, %v2926_v37 }
 0x839   : > { %953 = vadd.xlane.f32.xlu1 %v952_v46 }
 0x83a   : > { %v2954_v55 = vmul.f32 1.442695, %v2944_v39 }
 0x83b   : > { %2423 = vmax.xlane.f32.xlu0 %v2422_v51  ;;  %v2935_v14 = vpop.xlane.xlu0 %2934 }
 0x83c   : > { %6181 = vpow2.f32 %v2954_v55  ;;  %v2947_v21 = vsub.f32 %v7022_v25, %v2935_v14 }
 0x83d   : > { %6183 = vpow2.f32 %v2956_v50  ;;  %959 = vadd.xlane.f32.xlu1 %v958_v40 }
 0x83f   : > { %v7113_v53 = vpop.eup %6177  ;;  %2429 = vmax.xlane.f32.xlu0 %v2428_v62  ;;  %v2941_v17 = vpop.xlane.xlu0 %2940 }
 0x840   : > { %v7115_v58 = vpop.eup %6179  ;;  %5679 = vmatprep.mubr.msk.f32.mxu1 %vm900_vm3, %v7113_v53  ;;  %v2949_v44 = vsub.f32 %v7028_v9, %v2941_v17 }
 0x841   : > { %5680 = vmatmul.mubr.msk.f32.vlgmr.msra.gmra.mrb[58].mxu1 %vm900_vm3, %v7115_v58  ;;  %965 = vadd.xlane.f32.xlu1 %v964_v63 }
 0x842   : > { %5946 = vmatpush3.bf16.xpose.msk.msra.mxu1 %vm6618_vm2, %v6964_v12  ;;  %v1959_v12 = vsel %vm900_vm3, %v6929_v8, 0.0  ;;  %v2419_v8 = vsel %vm900_vm3, %v6996_v22, -inf }
 0x843   : > { %v3288_v38 = vpop.permute.xlu0 %3287 }
 0x845   : > { %971 = vadd.xlane.f32.xlu1 %v970_v61 }
 0x846   : > { %v7128_v0 = vpop.eup %6181 }
 0x847   : > { %v7135_v52 = vpop.eup %6183  ;;  %5682 = vmatprep.mubr.msk.f32.mxu1 %vm900_vm3, %v7128_v0  ;;  %v3290_v39 = vpop.permute.xlu0 %3289 }
 0x848   : > { %5683 = vmatmul.mubr.msk.f32.gmra.mrb[60].mxu1 %vm900_vm3, %v7135_v52 }
 0x849   : > { %1954 = vadd.xlane.f32.xlu1 %v1953_v4 }
 0x84b   : > { %v3294_v55 = vpop.permute.xlu0 %3293 }
 0x84d   : > { %1960 = vadd.xlane.f32.xlu1 %v1959_v12 }
 0x84f   : > { %v3790_v61 = vpop.permute.xlu0 %3789 }
 0x851   : > { %1966 = vadd.xlane.f32.xlu1 %v1965_v59 }
 0x853   : > { %v3794_v12 = vpop.permute.xlu0 %3793 }
 0x855   : > { %1972 = vadd.xlane.f32.xlu1 %v1971_v24  ;;  %6101 = vrot.lane.b32.xlu0 %v6622_v31, %s6403_s21 }
 0x857   : > { %v3798_v24 = vpop.permute.xlu0 %3797 }
 0x859   : > { %2414 = vmax.xlane.f32.xlu1 %v2413_v13  ;;  %4297 = vrot.lane.b32.xlu0 %v6574_v1, %s6404_s22  ;;  %v2431_v1 = vsel %vm900_vm3, %v7004_v54, -inf }
 0x85d   : > { %2420 = vmax.xlane.f32.xlu1 %v2419_v8  ;;  %4301 = vrot.lane.b32.xlu0 %v6582_v3, %s6404_s22  ;;  %v2960_v3 = vmul.f32 1.442695, %v2947_v21 }
 0x861   : > { %2426 = vmax.xlane.f32.xlu1 %v2425_v18  ;;  %4305 = vrot.lane.b32.xlu0 %v6592_v7, %s6404_s22  ;;  %v2964_v7 = vmul.f32 1.442695, %v2949_v44 }
 0x865   : > { %v2932_v56 = vpop.xlane.xlu1 %2931  ;;  %2432 = vmax.xlane.f32.xlu1 %v2431_v1 }
 0x866   : > { %v2946_v29 = vsub.f32 %v7024_v49, %v2932_v56 }
 0x868   : > { %v2958_v48 = vmul.f32 1.442695, %v2946_v29 }
 0x869   : > { %v2938_v37 = vpop.xlane.xlu1 %2937 }
 0x86a   : > { %6185 = vpow2.f32 %v2958_v48  ;;  %v2948_v46 = vsub.f32 %v7030_v6, %v2938_v37 }
 0x86b   : > { %6187 = vpow2.f32 %v2960_v3 }
 0x86c   : > { %v2962_v25 = vmul.f32 1.442695, %v2948_v46 }
 0x86d   : > { %v3286_v50 = vpop.permute.xlu1 %3285 }
 0x86e   : > { %6189 = vpow2.f32 %v2962_v25 }
 0x86f   : > { %6191 = vpow2.f32 %v2964_v7 }
 0x871   : > { %v6097_v51 = vpop.permute.xlu1 %6096 }
 0x872   : > { %v6099_v40 = vunpack.i.h.bf16 %v6097_v51  ;;  %v6098_v62 = vunpack.i.l.bf16 %v6097_v51 }
 0x874   : > { %v7173_v49 = vpop.eup %6185  ;;  %v5951_v63 = vpack.c.bf16 %v6099_v40, %v6098_v62 }
 0x875   : > { %v7175_v9 = vpop.eup %6187  ;;  %5685 = vmatprep.mubr.msk.f32.mxu1 %vm900_vm3, %v7173_v49  ;;  %v3292_v4 = vpop.permute.xlu1 %3291 }
 0x876   : > { %5686 = vmatmul.mubr.msk.f32.gmra.mrb[62].mxu1 %vm900_vm3, %v7175_v9  ;;  %6106 = vrot.lane.b32.xlu1 %v6622_v31, %s6405_s30 }
 0x877   : > { %5953 = vmatprep.subr.msk.bf16.mxu1 %vm6618_vm2, %v5951_v63 }
 0x878   : > { %v7184_v6 = vpop.eup %6189 }
 0x879   : > { %v7186_v47 = vpop.eup %6191  ;;  %5688 = vmatprep.mubr.msk.f32.mxu1 %vm900_vm3, %v7184_v6  ;;  %v3296_v59 = vpop.permute.xlu1 %3295 }
 0x87a   : > { %6111 = vrot.lane.b32.xlu1 %v6622_v31, %s6404_s22  ;;  %5689 = vmatmul.mubr.msk.f32.gmra.mrb[64].mxu1 %vm900_vm3, %v7186_v47 }
 0x87b   : > { %5709 = vmatprep.mubr.msk.f32.mxu1 %vm764_vm1, %v7087_v32  ;;  %v3802_v32 = vpop.permute.xlu0 %3801 }
 0x87e   : > { %4299 = vrot.lane.b32.xlu1 %v6578_v2, %s6404_s22  ;;  %5710 = vmatmul.mubr.msk.f32.vlgmr.msra.gmra.mrb[66].mxu1 %vm764_vm1, %v3284_v36  ;;  %v3792_v2 = vpop.permute.xlu1 %3791 }
 0x87f   : > { %5956 = vmatpush3.bf16.xpose.msk.msra.mxu1 %vm6618_vm2, %v5951_v63  ;;  %5712 = vmatprep.mubr.msk.f32.mxu1 %vm764_vm1, %v3286_v50 }
 0x882   : > { %4303 = vrot.lane.b32.xlu1 %v6632_v33, %s6404_s22  ;;  %5713 = vmatmul.mubr.msk.f32.gmra.mrb[68].mxu1 %vm764_vm1, %v3288_v38  ;;  %v3796_v13 = vpop.permute.xlu1 %3795 }
 0x883   : > { %5715 = vmatprep.mubr.msk.f32.mxu1 %vm764_vm1, %v3290_v39 }
 0x886   : > { %4307 = vrot.lane.b32.xlu1 %v6638_v34, %s6404_s22  ;;  %5716 = vmatmul.mubr.msk.f32.gmra.mrb[70].mxu1 %vm764_vm1, %v3292_v4  ;;  %v3800_v34 = vpop.permute.xlu1 %3799 }
 0x887   : > { %5718 = vmatprep.mubr.msk.f32.mxu1 %vm764_vm1, %v3294_v55 }
 0x88a   : > { %5719 = vmatmul.mubr.msk.f32.gmra.mrb[72].mxu1 %vm764_vm1, %v3296_v59  ;;  %v3804_v21 = vpop.permute.xlu1 %3803 }
 0x88b   : > { %5755 = vmatprep.mubr.msk.f32.mxu1 %vm764_vm1, %v3790_v61 }
 0x88c   : > { %v1319_v14 = vpop.xlane.xlu0 %1318 }
 0x88d   : > { %6193 = vrcp.f32 %v1319_v14 }
 0x88e   : > { %5756 = vmatmul.mubr.msk.f32.vlgmr.msra.gmra.mrb[74].mxu1 %vm764_vm1, %v3792_v2 }
 0x88f   : > { %5758 = vmatprep.mubr.msk.f32.mxu1 %vm764_vm1, %v3794_v12 }
 0x890   : > { %v1325_v33 = vpop.xlane.xlu0 %1324 }
 0x891   : > { %6195 = vrcp.f32 %v1325_v33 }
 0x892   : > { %5759 = vmatmul.mubr.msk.f32.gmra.mrb[76].mxu1 %vm764_vm1, %v3796_v13 }
 0x893   : > { %5761 = vmatprep.mubr.msk.f32.mxu1 %vm764_vm1, %v3798_v24 }
 0x894   : > { %v1328_v8 = vpop.xlane.xlu0 %1327 }
 0x896   : > { %5762 = vmatmul.mubr.msk.f32.gmra.mrb[78].mxu1 %vm764_vm1, %v3800_v34 }
 0x897   : > { %v6194_v17 = vpop.eup %6193  ;;  %5764 = vmatprep.mubr.msk.f32.mxu1 %vm764_vm1, %v3802_v32 }
 0x898   : > { %v1331_v18 = vpop.xlane.xlu0 %1330  ;;  %v1484_v36 = vmul.f32 %v6194_v17, %v6845_v16 }
 0x89a   : > { %5541 = vmatprep.mubr.msk.f32.mxu0 %vm764_vm1, %v1484_v36  ;;  %5765 = vmatmul.mubr.msk.f32.gmra.mrb[80].mxu1 %vm764_vm1, %v3804_v21 }
 0x89b   : > { %v6196_v51 = vpop.eup %6195 }
 0x89c   : > { %v1337_v38 = vpop.xlane.xlu0 %1336  ;;  %v1486_v12 = vmul.f32 %v6196_v51, %v6849_v20 }
 0x8a0   : > { %v951_v1 = vpop.xlane.xlu0 %950 }
 0x8a4   : > { %v957_v56 = vpop.xlane.xlu0 %956 }
 0x8a8   : > { %v963_v29 = vpop.xlane.xlu0 %962 }
 0x8ac   : > { %v969_v3 = vpop.xlane.xlu0 %968 }
 0x8b0   : > { %v7221_v44 = vpop.xlane.xlu0 %1951 }
 0x8b4   : > { %v7223_v48 = vpop.xlane.xlu0 %1957 }
 0x8b8   : > { %v7225_v37 = vpop.xlane.xlu0 %1963 }
 0x8ba   : > { %v1322_v39 = vpop.xlane.xlu1 %1321 }
 0x8bb   : > { %6197 = vrcp.f32 %v1322_v39 }
 0x8bc   : > { %v7227_v16 = vpop.xlane.xlu0 %1969  ;;  %6199 = vrcp.f32 %v1328_v8 }
 0x8bd   : > { %6201 = vrcp.f32 %v1331_v18 }
 0x8be   : > { %v1334_v46 = vpop.xlane.xlu1 %1333 }
 0x8bf   : > { %6203 = vrcp.f32 %v1334_v46 }
 0x8c0   : > { %v2412_v7 = vpop.xlane.xlu0 %2411  ;;  %6205 = vrcp.f32 %v1337_v38 }
 0x8c1   : > { %v2434_v25 = vsub.f32 %v6994_v45, %v2412_v7  ;;  %v7237_v45 = vld [vmem:[%s7725_s8 + $0x8] sm:$0xff]  ;;  %v7746_v7 = vld [vmem:[#allocation4_spill] sm:$0xff] }
 0x8c2   : > { %v1340_v50 = vpop.xlane.xlu1 %1339 }
 0x8c3   : > { %v2442_v55 = vmul.f32 1.442695, %v2434_v25  ;;  %6207 = vrcp.f32 %v1340_v50 }
 0x8c4   : > { %v7230_v40 = vpop.xlane.xlu0 %2417 }
 0x8c5   : > { %v6198_v62 = vpop.eup %6197  ;;  %6209 = vpow2.f32 %v2442_v55 }
 0x8c6   : > { %6211 = vrcp.f32 %v951_v1  ;;  %v1485_v63 = vmul.f32 %v6198_v62, %v6843_v15  ;;  %v954_v61 = vpop.xlane.xlu1 %953  ;;  %v6200_v4 = vpop.eup %6199  ;;  %v7748_v62 = vld [vmem:[#allocation6_spill] sm:$0xff] }
 0x8c7   : > { %v6202_v59 = vpop.eup %6201  ;;  %6213 = vrcp.f32 %v954_v61  ;;  %v1487_v20 = vmul.f32 %v6200_v4, %v6847_v19 }
 0x8c8   : > { %v7239_v24 = vpop.xlane.xlu0 %2423  ;;  %5542 = vmatmul.mubr.msk.f32.vlgmr.msra.gmra.mrb[18].mxu0 %vm764_vm1, %v1485_v63  ;;  %6215 = vrcp.f32 %v957_v56  ;;  %v1488_v32 = vmul.f32 %v6202_v59, %v6853_v26 }
 0x8c9   : > { %5544 = vmatprep.mubr.msk.f32.mxu0 %vm764_vm1, %v1486_v12  ;;  %5554 = vmatpush3.msk.msra.mxu0 %vm1518_vm4, %v7133_v5  ;;  %v6204_v2 = vpop.eup %6203  ;;  %v7749_v12 = vld [vmem:[#allocation5_spill] sm:$0xff] }
 0x8ca   : > { %v960_v15 = vpop.xlane.xlu1 %959  ;;  %5599 = vmatprep.subr.msk.mxu0 %vm1518_vm4, %v7237_v45  ;;  %v6206_v14 = vpop.eup %6205  ;;  %v1489_v34 = vmul.f32 %v6204_v2, %v6851_v23 }
 0x8cb   : > { %6217 = vrcp.f32 %v960_v15  ;;  %v1490_v8 = vmul.f32 %v6206_v14, %v6857_v28  ;;  %v7751_v14 = vld [vmem:[#allocation7_spill] sm:$0xff] }
 0x8cc   : > { %5545 = vmatmul.mubr.msk.f32.gmra.mrb[20].mxu0 %vm764_vm1, %v1487_v20  ;;  %v7250_v13 = vpop.xlane.xlu0 %2429  ;;  %6219 = vrcp.f32 %v963_v29  ;;  %v7745_v29 = vld [vmem:[#allocation2_spill] sm:$0xff] }
 0x8cd   : > { %5547 = vmatprep.mubr.msk.f32.mxu0 %vm764_vm1, %v1488_v32  ;;  %v6208_v33 = vpop.eup %6207 }
 0x8ce   : > { %v966_v5 = vpop.xlane.xlu1 %965  ;;  %v1491_v21 = vmul.f32 %v6208_v33, %v6855_v27 }
 0x8cf   : > { %v7254_v19 = vpop.eup %6209  ;;  %6221 = vrcp.f32 %v966_v5 }
 0x8d0   : > { %v6212_v17 = vpop.eup %6211  ;;  %5548 = vmatmul.mubr.msk.f32.gmra.mrb[22].mxu0 %vm764_vm1, %v1489_v34  ;;  %v2458_v26 = vsel %vm900_vm3, %v7254_v19, 0.0  ;;  %v6102_v18 = vpop.permute.xlu0 %6101  ;;  %6223 = vrcp.f32 %v969_v3  ;;  %v7752_v34 = vld [vmem:[#allocation10_spill] sm:$0xff] }
 0x8d1   : > { %2459 = vadd.xlane.f32.xlu1 %v2458_v26  ;;  %5550 = vmatprep.mubr.msk.f32.mxu0 %vm764_vm1, %v1490_v8  ;;  %v6214_v23 = vpop.eup %6213  ;;  %v1116_v38 = vmul.f32 %v6212_v17, %v6829_v60  ;;  %v6104_v28 = vunpack.i.h.bf16 %v6102_v18  ;;  %v6103_v56 = vunpack.i.l.bf16 %v6102_v18  ;;  %v2436_v17 = vsub.f32 %v6998_v10, %v7230_v40  ;;  %v7753_v26 = vld [vmem:[#allocation9_spill] sm:$0xff] }
 0x8d2   : > { %v972_v36 = vpop.xlane.xlu1 %971  ;;  %v6216_v1 = vpop.eup %6215  ;;  %v1117_v39 = vmul.f32 %v6214_v23, %v7745_v29  ;;  %v2438_v10 = vsub.f32 %v7002_v43, %v7239_v24  ;;  %v2440_v43 = vsub.f32 %v7006_v41, %v7250_v13 }
 0x8d3   : > { %6225 = vrcp.f32 %v972_v36  ;;  %v1118_v25 = vmul.f32 %v6216_v1, %v7746_v7  ;;  %v5927_v50 = vpack.c.bf16 %v6104_v28, %v6103_v56  ;;  %v2633_v36 = vrot.slane %v7237_v45, 4 }
 0x8d4   : > { %5551 = vmatmul.mubr.msk.f32.gmra.mrb[24].mxu0 %vm764_vm1, %v1491_v21  ;;  %6227 = vrcp.f32 %v7221_v44  ;;  %v7747_v44 = vld [vmem:[#allocation3_spill] sm:$0xff]  ;;  %v2446_v29 = vmul.f32 1.442695, %v2436_v17 }
 0x8d5   : > { %5555 = vmatprep.mubr.msk.f32.mxu0 %vm764_vm1, %v1116_v38  ;;  %v6218_v3 = vpop.eup %6217  ;;  %v7754_v38 = vld [vmem:[#allocation12_spill] sm:$0xff] }
 0x8d6   : > { %v1955_v46 = vpop.xlane.xlu1 %1954  ;;  %v6220_v27 = vpop.eup %6219  ;;  %v1119_v55 = vmul.f32 %v6218_v3, %v7747_v44  ;;  %v7756_v3 = vld [vmem:[#allocation14_spill] sm:$0xff] }
 0x8d7   : > { %6229 = vrcp.f32 %v1955_v46  ;;  %v1120_v63 = vmul.f32 %v6220_v27, %v7748_v62 }
 0x8d8   : > { %5556 = vmatmul.mubr.msk.f32.vlgmr.msra.gmra.mrb[18].mxu0 %vm764_vm1, %v1117_v39  ;;  %6231 = vrcp.f32 %v7223_v48  ;;  %v7750_v48 = vld [vmem:[#allocation8_spill] sm:$0xff]  ;;  %v7755_v39 = vld [vmem:[#allocation11_spill] sm:$0xff] }
 0x8d9   : > { %5600 = vmatpush3.msk.msra.mxu0 %vm1518_vm4, %v7237_v45  ;;  %5558 = vmatprep.mubr.msk.f32.mxu0 %vm764_vm1, %v1118_v25  ;;  %v6222_v51 = vpop.eup %6221 }
 0x8da   : > { %5928 = vmatprep.subr.bf16.mxu0 %v5927_v50  ;;  %v1961_v60 = vpop.xlane.xlu1 %1960  ;;  %v6224_v61 = vpop.eup %6223  ;;  %v1121_v59 = vmul.f32 %v6222_v51, %v7749_v12  ;;  %v7758_v51 = vld [vmem:[#allocation16_spill] sm:$0xff]  ;;  %v7759_v12 = vld [vmem:[#allocation15_spill] sm:$0xff] }
 0x8db   : > { %6233 = vrcp.f32 %v1961_v60  ;;  %v1122_v20 = vmul.f32 %v6224_v61, %v7750_v48  ;;  %v7757_v60 = vld [vmem:[#allocation13_spill] sm:$0xff]  ;;  %v2454_v61 = vmul.f32 1.442695, %v2440_v43  ;;  %v7372_v43 = vld [vmem:[%s7725_s8 + $0x10] sm:$0xff] }
 0x8dc   : > { %5559 = vmatmul.mubr.msk.f32.gmra.mrb[20].mxu0 %vm764_vm1, %v1119_v55  ;;  %6235 = vrcp.f32 %v7225_v37 }
 0x8dd   : > { %5561 = vmatprep.mubr.msk.f32.mxu0 %vm764_vm1, %v1120_v63  ;;  %v6226_v15 = vpop.eup %6225 }
 0x8de   : > { %v1967_v4 = vpop.xlane.xlu1 %1966  ;;  %v6228_v2 = vpop.eup %6227  ;;  %v1123_v33 = vmul.f32 %v6226_v15, %v7751_v14 }
 0x8df   : > { %6237 = vrcp.f32 %v1967_v4  ;;  %v2117_v37 = vmul.f32 %v6228_v2, %v7752_v34 }
 0x8e0   : > { %5562 = vmatmul.mubr.msk.f32.gmra.mrb[22].mxu0 %vm764_vm1, %v1121_v59  ;;  %6239 = vrcp.f32 %v7227_v16 }
 0x8e1   : > { %5564 = vmatprep.mubr.msk.f32.mxu0 %vm764_vm1, %v1122_v20  ;;  %v6230_v5 = vpop.eup %6229 }
 0x8e2   : > { %v1973_v32 = vpop.xlane.xlu1 %1972  ;;  %v6232_v8 = vpop.eup %6231  ;;  %v2118_v18 = vmul.f32 %v6230_v5, %v7753_v26 }
 0x8e3   : > { %6241 = vrcp.f32 %v1973_v32  ;;  %v2119_v1 = vmul.f32 %v6232_v8, %v7754_v38  ;;  %v2969_v38 = vsel %vm900_vm3, %v7115_v58, 0.0 }
 0x8e4   : > { %5565 = vmatmul.mubr.msk.f32.gmra.mrb[24].mxu0 %vm764_vm1, %v1123_v33 }
 0x8e5   : > { %5601 = vmatprep.mubr.msk.f32.mxu0 %vm764_vm1, %v2117_v37  ;;  %v6234_v21 = vpop.eup %6233 }
 0x8e6   : > { %v2415_v16 = vpop.xlane.xlu1 %2414  ;;  %v6236_v28 = vpop.eup %6235  ;;  %v2120_v45 = vmul.f32 %v6234_v21, %v7755_v39 }
 0x8e7   : > { %v2435_v23 = vsub.f32 %v6992_v42, %v2415_v16  ;;  %v2121_v7 = vmul.f32 %v6236_v28, %v7756_v3  ;;  %v2966_v28 = vsel %vm900_vm3, %v7113_v53, 0.0 }
 0x8e8   : > { %5602 = vmatmul.mubr.msk.f32.vlgmr.msra.gmra.mrb[18].mxu0 %vm764_vm1, %v2118_v18 }
 0x8e9   : > { %v2444_v56 = vmul.f32 1.442695, %v2435_v23  ;;  %5930 = vmatpush3.bf16.msra.mxu0 %v5927_v50  ;;  %5604 = vmatprep.mubr.msk.f32.mxu0 %vm764_vm1, %v2119_v1  ;;  %v6238_v46 = vpop.eup %6237  ;;  %v2450_v50 = vmul.f32 1.442695, %v2438_v10 }
 0x8ea   : > { %v2421_v40 = vpop.xlane.xlu1 %2420  ;;  %5645 = vmatprep.subr.msk.mxu0 %vm1518_vm4, %v2633_v36  ;;  %v6240_v25 = vpop.eup %6239  ;;  %v2122_v44 = vmul.f32 %v6238_v46, %v7757_v60 }
 0x8eb   : > { %6243 = vpow2.f32 %v2444_v56  ;;  %v2437_v42 = vsub.f32 %v6996_v22, %v2421_v40  ;;  %v2123_v62 = vmul.f32 %v6240_v25, %v7758_v51 }
 0x8ec   : > { %5605 = vmatmul.mubr.msk.f32.gmra.mrb[20].mxu0 %vm764_vm1, %v2120_v45  ;;  %6245 = vpow2.f32 %v2446_v29 }
 0x8ed   : > { %v2448_v27 = vmul.f32 1.442695, %v2437_v42  ;;  %5607 = vmatprep.mubr.msk.f32.mxu0 %vm764_vm1, %v2121_v7  ;;  %v6242_v55 = vpop.eup %6241 }
 0x8ee   : > { %v2427_v24 = vpop.xlane.xlu1 %2426  ;;  %v2124_v59 = vmul.f32 %v6242_v55, %v7759_v12 }
 0x8ef   : > { %6247 = vpow2.f32 %v2448_v27  ;;  %v2439_v22 = vsub.f32 %v7000_v57, %v2427_v24 }
 0x8f0   : > { %5608 = vmatmul.mubr.msk.f32.gmra.mrb[22].mxu0 %vm764_vm1, %v2122_v44  ;;  %6249 = vpow2.f32 %v2450_v50 }
 0x8f1   : > { %v2452_v63 = vmul.f32 1.442695, %v2439_v22  ;;  %5610 = vmatprep.mubr.msk.f32.mxu0 %vm764_vm1, %v2123_v62 }
 0x8f2   : > { %v2433_v4 = vpop.xlane.xlu1 %2432 }
 0x8f3   : > { %6251 = vpow2.f32 %v2452_v63  ;;  %v2441_v41 = vsub.f32 %v7004_v54, %v2433_v4 }
 0x8f4   : > { %5611 = vmatmul.mubr.msk.f32.gmra.mrb[24].mxu0 %vm764_vm1, %v2124_v59  ;;  %6253 = vpow2.f32 %v2454_v61 }
 0x8f5   : > { %v6244_v13 = vpop.eup %6243  ;;  %v2456_v15 = vmul.f32 1.442695, %v2441_v41  ;;  %5633 = vmatprep.mubr.msk.f32.mxu0 %vm900_vm3, %v7254_v19 }
 0x8f6   : > { %v6107_v57 = vpop.permute.xlu1 %6106  ;;  %v2461_v48 = vsel %vm900_vm3, %v6244_v13, 0.0  ;;  %v6246_v32 = vpop.eup %6245 }
 0x8f7   : > { %6255 = vpow2.f32 %v2456_v15  ;;  %v6109_v20 = vunpack.i.h.bf16 %v6107_v57  ;;  %v6108_v2 = vunpack.i.l.bf16 %v6107_v57  ;;  %2462 = vadd.xlane.f32.xlu0 %v2461_v48  ;;  %v2464_v18 = vsel %vm900_vm3, %v6246_v32, 0.0 }
 0x8f8   : > { %5634 = vmatmul.mubr.msk.f32.vlgmr.msra.gmra.mrb[26].mxu0 %vm900_vm3, %v6244_v13 }
 0x8f9   : > { %v6248_v14 = vpop.eup %6247  ;;  %v5957_v54 = vpack.c.bf16 %v6109_v20, %v6108_v2  ;;  %5636 = vmatprep.mubr.msk.f32.mxu0 %vm900_vm3, %v6246_v32  ;;  %5646 = vmatpush3.msk.msra.mxu0 %vm1518_vm4, %v2633_v36  ;;  %v7414_v20 = vpop.permute.xlu0 %4297  ;;  %v2972_v32 = vsel %vm900_vm3, %v7128_v0, 0.0  ;;  %v2984_v0 = vsel %vm900_vm3, %v7184_v6, 0.0 }
 0x8fa   : > { %v6112_v33 = vpop.permute.xlu1 %6111  ;;  %v2467_v19 = vsel %vm900_vm3, %v6248_v14, 0.0  ;;  %v6250_v37 = vpop.eup %6249  ;;  %5691 = vmatprep.subr.msk.mxu0 %vm1518_vm4, %v7372_v43 }
 0x8fb   : > { %v6114_v5 = vunpack.i.h.bf16 %v6112_v33  ;;  %v6113_v34 = vunpack.i.l.bf16 %v6112_v33  ;;  %5958 = vmatprep.subr.bf16.mxu1 %v5957_v54  ;;  %2468 = vadd.xlane.f32.xlu0 %v2467_v19  ;;  %v2470_v23 = vsel %vm900_vm3, %v6250_v37, 0.0  ;;  %v2975_v19 = vsel %vm900_vm3, %v7135_v52, 0.0 }
 0x8fc   : > { %5637 = vmatmul.mubr.msk.f32.gmra.mrb[28].mxu0 %vm900_vm3, %v6248_v14  ;;  %5960 = vmatpush3.bf16.msra.mxu1 %v5957_v54  ;;  %v2978_v14 = vsel %vm900_vm3, %v7173_v49, 0.0 }
 0x8fd   : > { %v6252_v8 = vpop.eup %6251  ;;  %v7321_v17 = vpack.c.bf16 %v6114_v5, %v6113_v34  ;;  %5639 = vmatprep.mubr.msk.f32.mxu0 %vm900_vm3, %v6250_v37  ;;  %v7416_v2 = vpop.permute.xlu0 %4301 }
 0x8fe   : > { %v2473_v26 = vsel %vm900_vm3, %v6252_v8, 0.0  ;;  %v6254_v36 = vpop.eup %6253 }
 0x8ff   : > { %2474 = vadd.xlane.f32.xlu1 %v2473_v26  ;;  %5963 = vmatprep.subr.msk.bf16.mxu1 %vm6618_vm2, %v7321_v17  ;;  %v2476_v1 = vsel %vm900_vm3, %v6254_v36, 0.0 }
 0x900   : > { %2465 = vadd.xlane.f32.xlu0 %v2464_v18  ;;  %5640 = vmatmul.mubr.msk.f32.gmra.mrb[30].mxu0 %vm900_vm3, %v6252_v8 }
 0x901   : > { %v6256_v16 = vpop.eup %6255  ;;  %5642 = vmatprep.mubr.msk.f32.mxu0 %vm900_vm3, %v6254_v36  ;;  %v7422_v54 = vpop.permute.xlu0 %4305 }
 0x902   : > { %v2479_v21 = vsel %vm900_vm3, %v6256_v16, 0.0 }
 0x903   : > { %2480 = vadd.xlane.f32.xlu1 %v2479_v21 }
 0x904   : > { %2471 = vadd.xlane.f32.xlu0 %v2470_v23  ;;  %5643 = vmatmul.mubr.msk.f32.gmra.mrb[32].mxu0 %vm900_vm3, %v6256_v16 }
 0x907   : > { %2970 = vadd.xlane.f32.xlu1 %v2969_v38 }
 0x908   : > { %2477 = vadd.xlane.f32.xlu0 %v2476_v1 }
 0x90c   : > { %2967 = vadd.xlane.f32.xlu0 %v2966_v28 }
 0x914   : > { %v7339_v56 = vpop.f32.mrb[58].mxu1 }
 0x915   : > { %v7341_v29 = vpop.f32.mrb[59].mxu1 }
 0x91b   : > { %v7343_v10 = vpop.f32.mrb[60].mxu1 }
 0x91c   : > { %v7345_v40 = vpop.f32.mrb[61].mxu1 }
 0x949   : > { %v7347_v39 = vpop.f32.mrb[62].mxu1 }
 0x94a   : > { %v7349_v45 = vpop.f32.mrb[63].mxu1 }
 0x94d   : > { %v7351_v58 = vpop.f32.mrb[64].mxu1 }
 0x94e   : > { %v7353_v46 = vpop.f32.mrb[65].mxu1 }
 0x951   : > { %v7355_v42 = vpop.f32.mrb[66].mxu1 }
 0x952   : > { %v7357_v53 = vpop.f32.mrb[67].mxu1  ;;  %v3429_v18 = vsel %vm900_vm3, %v7355_v42, -inf }
 0x953   : > { %v3426_v52 = vsel %vm900_vm3, %v7357_v53, -inf }
 0x955   : > { %v7359_v3 = vpop.f32.mrb[68].mxu1 }
 0x956   : > { %v7361_v7 = vpop.f32.mrb[69].mxu1  ;;  %v3435_v16 = vsel %vm900_vm3, %v7359_v3, -inf }
 0x957   : > { %v3432_v49 = vsel %vm900_vm3, %v7361_v7, -inf }
 0x959   : > { %v7363_v25 = vpop.f32.mrb[70].mxu1 }
 0x95a   : > { %v7365_v27 = vpop.f32.mrb[71].mxu1  ;;  %v3441_v23 = vsel %vm900_vm3, %v7363_v25, -inf }
 0x95b   : > { %v3438_v37 = vsel %vm900_vm3, %v7365_v27, -inf }
 0x95d   : > { %v7367_v50 = vpop.f32.mrb[72].mxu1 }
 0x95e   : > { %v7374_v24 = vpop.f32.mrb[73].mxu1  ;;  %v3447_v28 = vsel %vm900_vm3, %v7367_v50, -inf }
 0x95f   : > { %v3444_v26 = vsel %vm900_vm3, %v7374_v24, -inf }
 0x961   : > { %v7378_v60 = vpop.f32.mrb[74].mxu1 }
 0x962   : > { %v7380_v44 = vpop.f32.mrb[75].mxu1  ;;  %v3937_v55 = vsel %vm900_vm3, %v7378_v60, -inf }
 0x963   : > { %3938 = vmax.xlane.f32.xlu1 %v3937_v55  ;;  %v3934_v62 = vsel %vm900_vm3, %v7380_v44, -inf }
 0x965   : > { %v7384_v22 = vpop.f32.mrb[76].mxu1 }
 0x966   : > { %v7386_v51 = vpop.f32.mrb[77].mxu1  ;;  %v3943_v4 = vsel %vm900_vm3, %v7384_v22, -inf }
 0x967   : > { %3935 = vmax.xlane.f32.xlu1 %v3934_v62  ;;  %v3940_v41 = vsel %vm900_vm3, %v7386_v51, -inf }
 0x969   : > { %v7390_v63 = vpop.f32.mrb[78].mxu1 }
 0x96a   : > { %v7392_v61 = vpop.f32.mrb[79].mxu1  ;;  %v3949_v15 = vsel %vm900_vm3, %v7390_v63, -inf }
 0x96b   : > { %3944 = vmax.xlane.f32.xlu1 %v3943_v4  ;;  %v3946_v57 = vsel %vm900_vm3, %v7392_v61, -inf }
 0x96d   : > { %v7396_v12 = vpop.f32.mrb[80].mxu1 }
 0x96e   : > { %v7398_v59 = vpop.f32.mrb[81].mxu1  ;;  %v3955_v48 = vsel %vm900_vm3, %v7396_v12, -inf }
 0x96f   : > { %3941 = vmax.xlane.f32.xlu1 %v3940_v41  ;;  %v3952_v13 = vsel %vm900_vm3, %v7398_v59, -inf }
 0x970   : > { %3953 = vmax.xlane.f32.xlu0 %v3952_v13 }
 0x973   : > { %3950 = vmax.xlane.f32.xlu1 %v3949_v15 }
 0x977   : > { %3947 = vmax.xlane.f32.xlu1 %v3946_v57 }
 0x97b   : > { %3956 = vmax.xlane.f32.xlu1 %v3955_v48 }
 0x984   : > { %v2463_v33 = vpop.xlane.xlu0 %2462 }
 0x986   : > { %4309 = vrot.lane.b32.xlu0 %v6602_v11, %s6404_s22  ;;  %v2981_v11 = vsel %vm900_vm3, %v7175_v9, 0.0  ;;  %v2987_v9 = vsel %vm900_vm3, %v7186_v47, 0.0 }
 0x988   : > { %v2469_v5 = vpop.xlane.xlu0 %2468 }
 0x98c   : > { %4311 = vrot.lane.b32.xlu1 %v6647_v35, %s6404_s22  ;;  %v7426_v35 = vpop.permute.xlu1 %4299 }
 0x98d   : > { %v2466_v6 = vpop.xlane.xlu0 %2465 }
 0x990   : > { %v7434_v34 = vpop.permute.xlu1 %4303 }
 0x991   : > { %v2472_v36 = vpop.xlane.xlu0 %2471 }
 0x994   : > { %v7442_v8 = vpop.permute.xlu1 %4307 }
 0x995   : > { %v2478_v38 = vpop.xlane.xlu0 %2477 }
 0x998   : > { %v2460_v47 = vpop.xlane.xlu1 %2459 }
 0x999   : > { %6257 = vrcp.f32 %v2460_v47  ;;  %v2968_v55 = vpop.xlane.xlu0 %2967 }
 0x99a   : > { %6259 = vrcp.f32 %v2463_v33 }
 0x99b   : > { %6261 = vrcp.f32 %v2466_v6 }
 0x99c   : > { %v2475_v21 = vpop.xlane.xlu1 %2474  ;;  %6263 = vrcp.f32 %v2469_v5 }
 0x99d   : > { %6265 = vrcp.f32 %v2472_v36 }
 0x99e   : > { %6267 = vrcp.f32 %v2475_v21 }
 0x99f   : > { %6269 = vrcp.f32 %v2478_v38 }
 0x9a0   : > { %v2481_v1 = vpop.xlane.xlu1 %2480  ;;  %6271 = vrcp.f32 %v2968_v55 }
 0x9a1   : > { %6273 = vrcp.f32 %v2481_v1 }
 0x9a3   : > { %v6258_v4 = vpop.eup %6257 }
 0x9a4   : > { %v6260_v13 = vpop.eup %6259  ;;  %v2971_v57 = vpop.xlane.xlu1 %2970 }
 0x9a5   : > { %2973 = vadd.xlane.f32.xlu0 %v2972_v32  ;;  %6275 = vrcp.f32 %v2971_v57 }
 0x9a9   : > { %2979 = vadd.xlane.f32.xlu0 %v2978_v14  ;;  %v6262_v14 = vpop.eup %6261 }
 0x9aa   : > { %v6264_v33 = vpop.eup %6263 }
 0x9ad   : > { %2982 = vadd.xlane.f32.xlu0 %v2981_v11 }
 0x9b0   : > { %2976 = vadd.xlane.f32.xlu1 %v2975_v19 }
 0x9b1   : > { %2985 = vadd.xlane.f32.xlu0 %v2984_v0 }
 0x9b4   : > { %3433 = vmax.xlane.f32.xlu1 %v3432_v49  ;;  %v6266_v49 = vpop.eup %6265 }
 0x9b5   : > { %2988 = vadd.xlane.f32.xlu0 %v2987_v9 }
 0x9b8   : > { %3439 = vmax.xlane.f32.xlu1 %v3438_v37  ;;  %v6268_v37 = vpop.eup %6267 }
 0x9b9   : > { %3427 = vmax.xlane.f32.xlu0 %v3426_v52 }
 0x9bc   : > { %3445 = vmax.xlane.f32.xlu1 %v3444_v26  ;;  %v6270_v26 = vpop.eup %6269 }
 0x9bd   : > { %3430 = vmax.xlane.f32.xlu0 %v3429_v18  ;;  %v6272_v47 = vpop.eup %6271 }
 0x9be   : > { %v3133_v1 = vmul.f32 %v6272_v47, %v7341_v29 }
 0x9c1   : > { %3436 = vmax.xlane.f32.xlu0 %v3435_v16  ;;  %v6274_v16 = vpop.eup %6273 }
 0x9c2   : > { %v6276_v38 = vpop.eup %6275 }
 0x9c5   : > { %3442 = vmax.xlane.f32.xlu0 %v3441_v23 }
 0x9c9   : > { %3448 = vmax.xlane.f32.xlu0 %v3447_v28  ;;  %v3134_v28 = vmul.f32 %v6276_v38, %v7339_v56 }
 0x9cb   : > { %v5635_v62 = vpop.f32.mrb[26].mxu0 }
 0x9cc   : > { %v2586_v41 = vpop.f32.mrb[27].mxu0  ;;  %v2626_v48 = vmul.f32 %v6260_v13, %v5635_v62 }
 0x9cd   : > { %v2625_v15 = vmul.f32 %v6258_v4, %v2586_v41  ;;  %6116 = vrot.lane.b32.xlu1 %v6622_v31, %s6406_s28 }
 0x9cf   : > { %v5638_v32 = vpop.f32.mrb[28].mxu0  ;;  %5647 = vmatprep.mubr.msk.f32.mxu0 %vm764_vm1, %v2625_v15 }
 0x9d0   : > { %v2596_v11 = vpop.f32.mrb[29].mxu0  ;;  %5648 = vmatmul.mubr.msk.f32.vlgmr.msra.gmra.mrb[18].mxu0 %vm764_vm1, %v2626_v48  ;;  %v2628_v0 = vmul.f32 %v6264_v33, %v5638_v32 }
 0x9d1   : > { %v2627_v19 = vmul.f32 %v6262_v14, %v2596_v11  ;;  %5692 = vmatpush3.msk.msra.mxu0 %vm1518_vm4, %v7372_v43 }
 0x9d3   : > { %v5641_v5 = vpop.f32.mrb[30].mxu0  ;;  %5650 = vmatprep.mubr.msk.f32.mxu0 %vm764_vm1, %v2627_v19 }
 0x9d4   : > { %v2606_v9 = vpop.f32.mrb[31].mxu0  ;;  %5651 = vmatmul.mubr.msk.f32.gmra.mrb[20].mxu0 %vm764_vm1, %v2628_v0  ;;  %v2630_v6 = vmul.f32 %v6268_v37, %v5641_v5 }
 0x9d5   : > { %v2629_v52 = vmul.f32 %v6266_v49, %v2606_v9 }
 0x9d7   : > { %v5644_v18 = vpop.f32.mrb[32].mxu0  ;;  %5653 = vmatprep.mubr.msk.f32.mxu0 %vm764_vm1, %v2629_v52 }
 0x9d8   : > { %v2616_v36 = vpop.f32.mrb[33].mxu0  ;;  %5654 = vmatmul.mubr.msk.f32.gmra.mrb[22].mxu0 %vm764_vm1, %v2630_v6  ;;  %v2632_v23 = vmul.f32 %v6274_v16, %v5644_v18 }
 0x9d9   : > { %v2631_v21 = vmul.f32 %v6270_v26, %v2616_v36 }
 0x9db   : > { %5656 = vmatprep.mubr.msk.f32.mxu0 %vm764_vm1, %v2631_v21 }
 0x9dc   : > { %5657 = vmatmul.mubr.msk.f32.gmra.mrb[24].mxu0 %vm764_vm1, %v2632_v23 }
 0x9dd   : > { %5693 = vmatprep.mubr.msk.f32.mxu0 %vm764_vm1, %v3133_v1 }
 0x9e0   : > { %5694 = vmatmul.mubr.msk.f32.vlgmr.msra.gmra.mrb[18].mxu0 %vm764_vm1, %v3134_v28 }
 0x9f0   : > { %v3939_v55 = vpop.xlane.xlu1 %3938 }
 0x9f1   : > { %v3959_v62 = vsub.f32 %v7378_v60, %v3939_v55 }
 0x9f3   : > { %v3968_v13 = vmul.f32 1.442695, %v3959_v62 }
 0x9f4   : > { %v3936_v4 = vpop.xlane.xlu1 %3935 }
 0x9f5   : > { %v3958_v41 = vsub.f32 %v7380_v44, %v3936_v4 }
 0x9f7   : > { %v3966_v15 = vmul.f32 1.442695, %v3958_v41 }
 0x9f8   : > { %v3945_v57 = vpop.xlane.xlu1 %3944 }
 0x9f9   : > { %6277 = vpow2.f32 %v3966_v15  ;;  %v3961_v29 = vsub.f32 %v7384_v22, %v3945_v57 }
 0x9fa   : > { %6279 = vpow2.f32 %v3968_v13 }
 0x9fb   : > { %v3972_v14 = vmul.f32 1.442695, %v3961_v29 }
 0x9fc   : > { %v3942_v48 = vpop.xlane.xlu1 %3941 }
 0x9fd   : > { %v3960_v32 = vsub.f32 %v7386_v51, %v3942_v48  ;;  %v3954_v11 = vpop.xlane.xlu0 %3953 }
 0x9fe   : > { %v3964_v44 = vsub.f32 %v7398_v59, %v3954_v11 }
 0x9ff   : > { %v3970_v56 = vmul.f32 1.442695, %v3960_v32 }
 0xa00   : > { %v3951_v33 = vpop.xlane.xlu1 %3950 }
 0xa01   : > { %6281 = vpow2.f32 %v3970_v56  ;;  %v3963_v60 = vsub.f32 %v7390_v63, %v3951_v33  ;;  %v3978_v63 = vmul.f32 1.442695, %v3964_v44  ;;  %v4310_v26 = vpop.permute.xlu0 %4309 }
 0xa02   : > { %6283 = vpow2.f32 %v3972_v14 }
 0xa03   : > { %v7474_v19 = vpop.eup %6277  ;;  %v3976_v5 = vmul.f32 1.442695, %v3963_v60 }
 0xa04   : > { %v7477_v0 = vpop.eup %6279  ;;  %5771 = vmatprep.mubr.msk.f32.mxu1 %vm900_vm3, %v7474_v19  ;;  %v3948_v22 = vpop.xlane.xlu1 %3947 }
 0xa05   : > { %v3962_v51 = vsub.f32 %v7392_v61, %v3948_v22  ;;  %5772 = vmatmul.mubr.msk.f32.vlgmr.msra.gmra.mrb[82].mxu1 %vm900_vm3, %v7477_v0  ;;  %v3649_v22 = vrot.slane %v7372_v43, 4 }
 0xa06   : > { %5966 = vmatpush3.bf16.xpose.msk.msra.mxu1 %vm6618_vm2, %v7321_v17 }
 0xa07   : > { %v3974_v49 = vmul.f32 1.442695, %v3962_v51 }
 0xa08   : > { %v3957_v9 = vpop.xlane.xlu1 %3956 }
 0xa09   : > { %6285 = vpow2.f32 %v3974_v49  ;;  %v3965_v59 = vsub.f32 %v7396_v12, %v3957_v9 }
 0xa0a   : > { %6287 = vpow2.f32 %v3976_v5 }
 0xa0b   : > { %v7488_v37 = vpop.eup %6281  ;;  %6289 = vpow2.f32 %v3978_v63  ;;  %v3980_v52 = vmul.f32 1.442695, %v3965_v59 }
 0xa0c   : > { %v7490_v61 = vpop.eup %6283  ;;  %5774 = vmatprep.mubr.msk.f32.mxu1 %vm900_vm3, %v7488_v37  ;;  %v4312_v18 = vpop.permute.xlu1 %4311 }
 0xa0d   : > { %6291 = vpow2.f32 %v3980_v52  ;;  %5775 = vmatmul.mubr.msk.f32.gmra.mrb[84].mxu1 %vm900_vm3, %v7490_v61 }
 0xa13   : > { %v7496_v30 = vpop.eup %6285 }
 0xa14   : > { %v7498_v17 = vpop.eup %6287  ;;  %5777 = vmatprep.mubr.msk.f32.mxu1 %vm900_vm3, %v7496_v30 }
 0xa15   : > { %v7502_v12 = vpop.eup %6289  ;;  %5778 = vmatmul.mubr.msk.f32.gmra.mrb[86].mxu1 %vm900_vm3, %v7498_v17 }
 0xa16   : > { %5780 = vmatprep.mubr.msk.f32.mxu1 %vm900_vm3, %v7502_v12  ;;  %v4000_v52 = vsel %vm900_vm3, %v7502_v12, 0.0 }
 0xa17   : > { %v7508_v6 = vpop.eup %6291 }
 0xa19   : > { %5781 = vmatmul.mubr.msk.f32.gmra.mrb[88].mxu1 %vm900_vm3, %v7508_v6 }
 0xa1a   : > { %5801 = vmatprep.mubr.msk.f32.mxu1 %vm764_vm1, %v7414_v20 }
 0xa1d   : > { %5802 = vmatmul.mubr.msk.f32.vlgmr.msra.gmra.mrb[90].mxu1 %vm764_vm1, %v7426_v35 }
 0xa1e   : > { %5804 = vmatprep.mubr.msk.f32.mxu1 %vm764_vm1, %v7416_v2 }
 0xa21   : > { %5805 = vmatmul.mubr.msk.f32.gmra.mrb[92].mxu1 %vm764_vm1, %v7434_v34 }
 0xa22   : > { %5807 = vmatprep.mubr.msk.f32.mxu1 %vm764_vm1, %v7422_v54 }
 0xa25   : > { %5808 = vmatmul.mubr.msk.f32.gmra.mrb[94].mxu1 %vm764_vm1, %v7442_v8 }
 0xa26   : > { %5810 = vmatprep.mubr.msk.f32.mxu1 %vm764_vm1, %v4310_v26 }
 0xa29   : > { %5811 = vmatmul.mubr.msk.f32.gmra.mrb[96].mxu1 %vm764_vm1, %v4312_v18 }
 0xa32   : > { %v2974_v20 = vpop.xlane.xlu0 %2973 }
 0xa33   : > { %6293 = vrcp.f32 %v2974_v20 }
 0xa36   : > { %v2980_v35 = vpop.xlane.xlu0 %2979 }
 0xa37   : > { %6295 = vrcp.f32 %v2980_v35 }
 0xa3a   : > { %v2983_v47 = vpop.xlane.xlu0 %2982 }
 0xa3d   : > { %v6294_v2 = vpop.eup %6293  ;;  %v2977_v36 = vpop.xlane.xlu1 %2976 }
 0xa3e   : > { %6297 = vrcp.f32 %v2977_v36  ;;  %v2986_v34 = vpop.xlane.xlu0 %2985  ;;  %v3135_v54 = vmul.f32 %v6294_v2, %v7345_v40 }
 0xa3f   : > { %6299 = vrcp.f32 %v2983_v47 }
 0xa40   : > { %5696 = vmatprep.mubr.msk.f32.mxu0 %vm764_vm1, %v3135_v54  ;;  %6301 = vrcp.f32 %v2986_v34 }
 0xa41   : > { %v3434_v8 = vpop.xlane.xlu1 %3433  ;;  %v6296_v1 = vpop.eup %6295 }
 0xa42   : > { %v2989_v16 = vpop.xlane.xlu0 %2988  ;;  %v3452_v62 = vsub.f32 %v7361_v7, %v3434_v8  ;;  %v3137_v29 = vmul.f32 %v6296_v1, %v7349_v45  ;;  %v3997_v1 = vsel %vm900_vm3, %v7498_v17, 0.0 }
 0xa43   : > { %6303 = vrcp.f32 %v2989_v16  ;;  %v3985_v16 = vsel %vm900_vm3, %v7477_v0, 0.0  ;;  %v3994_v0 = vsel %vm900_vm3, %v7496_v30, 0.0 }
 0xa45   : > { %v3440_v21 = vpop.xlane.xlu1 %3439 }
 0xa46   : > { %v3454_v23 = vsub.f32 %v7365_v27, %v3440_v21  ;;  %v3428_v38 = vpop.xlane.xlu0 %3427  ;;  %v3982_v21 = vsel %vm900_vm3, %v7474_v19, 0.0  ;;  %v4003_v19 = vsel %vm900_vm3, %v7508_v6, 0.0 }
 0xa47   : > { %v3450_v28 = vsub.f32 %v7357_v53, %v3428_v38  ;;  %v3462_v53 = vmul.f32 1.442695, %v3452_v62  ;;  %v3988_v38 = vsel %vm900_vm3, %v7488_v37, 0.0 }
 0xa48   : > { %v6298_v55 = vpop.eup %6297  ;;  %v3466_v4 = vmul.f32 1.442695, %v3454_v23  ;;  %v3991_v23 = vsel %vm900_vm3, %v7490_v61, 0.0  ;;  %v7584_v61 = vld [vmem:[%s7725_s8 + $0x18] sm:$0xff] }
 0xa49   : > { %v3458_v41 = vmul.f32 1.442695, %v3450_v28  ;;  %v3446_v40 = vpop.xlane.xlu1 %3445  ;;  %v3136_v13 = vmul.f32 %v6298_v55, %v7343_v10  ;;  %v6300_v15 = vpop.eup %6299 }
 0xa4a   : > { %6305 = vpow2.f32 %v3466_v4  ;;  %v3431_v57 = vpop.xlane.xlu0 %3430  ;;  %v6302_v48 = vpop.eup %6301  ;;  %v3138_v14 = vmul.f32 %v6300_v15, %v7347_v39 }
 0xa4b   : > { %6307 = vpow2.f32 %v3458_v41  ;;  %v3451_v27 = vsub.f32 %v7355_v42, %v3431_v57  ;;  %5697 = vmatmul.mubr.msk.f32.gmra.mrb[20].mxu0 %vm764_vm1, %v3136_v13  ;;  %v3139_v60 = vmul.f32 %v6302_v48, %v7353_v46  ;;  %v3456_v42 = vsub.f32 %v7374_v24, %v3446_v40 }
 0xa4c   : > { %5699 = vmatprep.mubr.msk.f32.mxu0 %vm764_vm1, %v3137_v29 }
 0xa4d   : > { %v3460_v7 = vmul.f32 1.442695, %v3451_v27  ;;  %v6117_v32 = vpop.permute.xlu1 %6116  ;;  %v6304_v56 = vpop.eup %6303  ;;  %v3470_v63 = vmul.f32 1.442695, %v3456_v42 }
 0xa4e   : > { %v6119_v10 = vunpack.i.h.bf16 %v6117_v32  ;;  %v6118_v11 = vunpack.i.l.bf16 %v6117_v32  ;;  %v3437_v33 = vpop.xlane.xlu0 %3436  ;;  %v3140_v51 = vmul.f32 %v6304_v56, %v7351_v58 }
 0xa4f   : > { %6309 = vpow2.f32 %v3460_v7  ;;  %v3453_v45 = vsub.f32 %v7359_v3, %v3437_v33  ;;  %5700 = vmatmul.mubr.msk.f32.gmra.mrb[22].mxu0 %vm764_vm1, %v3138_v14 }
 0xa50   : > { %6311 = vpow2.f32 %v3462_v53  ;;  %v5947_v44 = vpack.c.bf16 %v6119_v10, %v6118_v11  ;;  %5702 = vmatprep.mubr.msk.f32.mxu0 %vm764_vm1, %v3139_v60 }
 0xa51   : > { %v3464_v39 = vmul.f32 1.442695, %v3453_v45 }
 0xa52   : > { %v3443_v5 = vpop.xlane.xlu0 %3442  ;;  %5948 = vmatprep.subr.bf16.mxu0 %v5947_v44 }
 0xa53   : > { %6313 = vpow2.f32 %v3464_v39  ;;  %v3455_v46 = vsub.f32 %v7363_v25, %v3443_v5  ;;  %5703 = vmatmul.mubr.msk.f32.gmra.mrb[24].mxu0 %vm764_vm1, %v3140_v51 }
 0xa54   : > { %v6306_v3 = vpop.eup %6305  ;;  %5950 = vmatpush3.bf16.msra.mxu0 %v5947_v44 }
 0xa55   : > { %v6308_v49 = vpop.eup %6307  ;;  %v3468_v24 = vmul.f32 1.442695, %v3455_v46  ;;  %v3486_v9 = vsel %vm900_vm3, %v6306_v3, 0.0  ;;  %5737 = vmatprep.subr.msk.mxu0 %vm1518_vm4, %v3649_v22 }
 0xa56   : > { %3487 = vadd.xlane.f32.xlu1 %v3486_v9  ;;  %v3449_v43 = vpop.xlane.xlu0 %3448  ;;  %5725 = vmatprep.mubr.msk.f32.mxu0 %vm900_vm3, %v6308_v49 }
 0xa57   : > { %6315 = vpow2.f32 %v3468_v24  ;;  %v3457_v58 = vsub.f32 %v7367_v50, %v3449_v43  ;;  %v3474_v50 = vsel %vm900_vm3, %v6308_v49, 0.0 }
 0xa58   : > { %6317 = vpow2.f32 %v3470_v63 }
 0xa59   : > { %v6310_v25 = vpop.eup %6309  ;;  %v3472_v59 = vmul.f32 1.442695, %v3457_v58 }
 0xa5a   : > { %v6312_v26 = vpop.eup %6311  ;;  %4001 = vadd.xlane.f32.xlu1 %v4000_v52  ;;  %5726 = vmatmul.mubr.msk.f32.vlgmr.msra.gmra.mrb[34].mxu0 %vm900_vm3, %v6310_v25  ;;  %v3477_v18 = vsel %vm900_vm3, %v6310_v25, 0.0 }
 0xa5b   : > { %6319 = vpow2.f32 %v3472_v59  ;;  %3478 = vadd.xlane.f32.xlu0 %v3477_v18  ;;  %5728 = vmatprep.mubr.msk.f32.mxu0 %vm900_vm3, %v6312_v26  ;;  %v3480_v36 = vsel %vm900_vm3, %v6312_v26, 0.0 }
 0xa5c   : > { %5738 = vmatpush3.msk.msra.mxu0 %vm1518_vm4, %v3649_v22 }
 0xa5d   : > { %v6314_v20 = vpop.eup %6313  ;;  %5783 = vmatprep.subr.msk.mxu0 %vm1518_vm4, %v7584_v61 }
 0xa5e   : > { %5729 = vmatmul.mubr.msk.f32.gmra.mrb[36].mxu0 %vm900_vm3, %v6314_v20  ;;  %v3483_v47 = vsel %vm900_vm3, %v6314_v20, 0.0 }
 0xa5f   : > { %3475 = vadd.xlane.f32.xlu0 %v3474_v50  ;;  %5731 = vmatprep.mubr.msk.f32.mxu0 %vm900_vm3, %v6306_v3 }
 0xa61   : > { %v6316_v12 = vpop.eup %6315 }
 0xa62   : > { %v6318_v35 = vpop.eup %6317  ;;  %5732 = vmatmul.mubr.msk.f32.gmra.mrb[38].mxu0 %vm900_vm3, %v6316_v12  ;;  %v3489_v34 = vsel %vm900_vm3, %v6316_v12, 0.0 }
 0xa63   : > { %3484 = vadd.xlane.f32.xlu0 %v3483_v47  ;;  %5734 = vmatprep.mubr.msk.f32.mxu0 %vm900_vm3, %v6318_v35  ;;  %v3492_v8 = vsel %vm900_vm3, %v6318_v35, 0.0 }
 0xa65   : > { %v6320_v2 = vpop.eup %6319 }
 0xa66   : > { %5735 = vmatmul.mubr.msk.f32.gmra.mrb[40].mxu0 %vm900_vm3, %v6320_v2  ;;  %v3495_v54 = vsel %vm900_vm3, %v6320_v2, 0.0 }
 0xa67   : > { %3481 = vadd.xlane.f32.xlu0 %v3480_v36 }
 0xa6b   : > { %3490 = vadd.xlane.f32.xlu0 %v3489_v34 }
 0xa6f   : > { %3496 = vadd.xlane.f32.xlu0 %v3495_v54 }
 0xa73   : > { %3493 = vadd.xlane.f32.xlu0 %v3492_v8 }
 0xa77   : > { %3986 = vadd.xlane.f32.xlu0 %v3985_v16 }
 0xa7b   : > { %3983 = vadd.xlane.f32.xlu0 %v3982_v21 }
 0xa7f   : > { %3992 = vadd.xlane.f32.xlu0 %v3991_v23 }
 0xa83   : > { %3989 = vadd.xlane.f32.xlu0 %v3988_v38 }
 0xa87   : > { %3998 = vadd.xlane.f32.xlu0 %v3997_v1 }
 0xa8b   : > { %3995 = vadd.xlane.f32.xlu0 %v3994_v0 }
 0xa8f   : > { %4004 = vadd.xlane.f32.xlu0 %v4003_v19 }
 0xad8   : > { %v7588_v37 = vpop.f32.mrb[82].mxu1 }
 0xad9   : > { %v7590_v17 = vpop.f32.mrb[83].mxu1 }
 0xae0   : > { %v7592_v28 = vpop.f32.mrb[84].mxu1 }
 0xae1   : > { %v7594_v30 = vpop.f32.mrb[85].mxu1 }
 0xae3   : > { %v3488_v63 = vpop.xlane.xlu1 %3487 }
 0xae7   : > { %v4002_v21 = vpop.xlane.xlu1 %4001 }
 0xae8   : > { %v7596_v55 = vpop.f32.mrb[86].mxu1  ;;  %v3479_v4 = vpop.xlane.xlu0 %3478 }
 0xae9   : > { %v7598_v6 = vpop.f32.mrb[87].mxu1 }
 0xaec   : > { %v7600_v62 = vpop.f32.mrb[88].mxu1  ;;  %v3476_v29 = vpop.xlane.xlu0 %3475 }
 0xaed   : > { %v7602_v41 = vpop.f32.mrb[89].mxu1  ;;  %6321 = vrcp.f32 %v3476_v29 }
 0xaee   : > { %6323 = vrcp.f32 %v3479_v4 }
 0xaf0   : > { %v7604_v40 = vpop.f32.mrb[90].mxu1  ;;  %v3485_v14 = vpop.xlane.xlu0 %3484 }
 0xaf1   : > { %v7606_v13 = vpop.f32.mrb[91].mxu1  ;;  %v4445_v15 = vsel %vm900_vm3, %v7604_v40, -inf }
 0xaf2   : > { %4446 = vmax.xlane.f32.xlu0 %v4445_v15  ;;  %v4442_v57 = vsel %vm900_vm3, %v7606_v13, -inf }
 0xaf3   : > { %4443 = vmax.xlane.f32.xlu1 %v4442_v57 }
 0xaf4   : > { %v7612_v48 = vpop.f32.mrb[92].mxu1  ;;  %v3482_v44 = vpop.xlane.xlu0 %3481 }
 0xaf5   : > { %v7614_v27 = vpop.f32.mrb[93].mxu1  ;;  %v4451_v53 = vsel %vm900_vm3, %v7612_v48, -inf  ;;  %6325 = vrcp.f32 %v3482_v44 }
 0xaf6   : > { %4452 = vmax.xlane.f32.xlu0 %v4451_v53  ;;  %v4448_v7 = vsel %vm900_vm3, %v7614_v27, -inf  ;;  %6327 = vrcp.f32 %v3485_v14 }
 0xaf7   : > { %4449 = vmax.xlane.f32.xlu1 %v4448_v7  ;;  %6329 = vrcp.f32 %v3488_v63  ;;  %v6322_v9 = vpop.eup %6321 }
 0xaf8   : > { %v7620_v32 = vpop.f32.mrb[94].mxu1  ;;  %v3491_v22 = vpop.xlane.xlu0 %3490 }
 0xaf9   : > { %v7622_v56 = vpop.f32.mrb[95].mxu1  ;;  %v4457_v10 = vsel %vm900_vm3, %v7620_v32, -inf  ;;  %6331 = vrcp.f32 %v3491_v22  ;;  %v6324_v58 = vpop.eup %6323 }
 0xafa   : > { %4458 = vmax.xlane.f32.xlu0 %v4457_v10  ;;  %v4454_v11 = vsel %vm900_vm3, %v7622_v56, -inf }
 0xafb   : > { %4455 = vmax.xlane.f32.xlu1 %v4454_v11 }
 0xafc   : > { %v7628_v33 = vpop.f32.mrb[96].mxu1  ;;  %v3497_v39 = vpop.xlane.xlu0 %3496 }
 0xafd   : > { %v7630_v60 = vpop.f32.mrb[97].mxu1  ;;  %v4463_v45 = vsel %vm900_vm3, %v7628_v33, -inf }
 0xafe   : > { %v4460_v42 = vsel %vm900_vm3, %v7630_v60, -inf  ;;  %4464 = vmax.xlane.f32.xlu0 %v4463_v45 }
 0xaff   : > { %4461 = vmax.xlane.f32.xlu1 %v4460_v42  ;;  %v6326_v26 = vpop.eup %6325 }
 0xb00   : > { %v3494_v51 = vpop.xlane.xlu0 %3493  ;;  %v6328_v20 = vpop.eup %6327 }
 0xb01   : > { %6333 = vrcp.f32 %v3494_v51  ;;  %v6330_v2 = vpop.eup %6329 }
 0xb03   : > { %v6332_v34 = vpop.eup %6331 }
 0xb04   : > { %v3987_v5 = vpop.xlane.xlu0 %3986 }
 0xb08   : > { %v3984_v46 = vpop.xlane.xlu0 %3983 }
 0xb09   : > { %6335 = vrcp.f32 %v3984_v46 }
 0xb0a   : > { %6337 = vrcp.f32 %v3497_v39 }
 0xb0b   : > { %6339 = vrcp.f32 %v3987_v5  ;;  %v6334_v16 = vpop.eup %6333 }
 0xb0c   : > { %v3993_v3 = vpop.xlane.xlu0 %3992 }
 0xb10   : > { %6121 = vrot.lane.b32.xlu1 %v6622_v31, %s6407_s12  ;;  %v3990_v49 = vpop.xlane.xlu0 %3989 }
 0xb11   : > { %6341 = vrcp.f32 %v3990_v49 }
 0xb12   : > { %6343 = vrcp.f32 %v3993_v3 }
 0xb13   : > { %v6336_v38 = vpop.eup %6335 }
 0xb14   : > { %v3999_v25 = vpop.xlane.xlu0 %3998  ;;  %v6338_v0 = vpop.eup %6337  ;;  %v4149_v29 = vmul.f32 %v6336_v38, %v7590_v17 }
 0xb15   : > { %v6340_v57 = vpop.eup %6339 }
 0xb16   : > { %v4150_v7 = vmul.f32 %v6340_v57, %v7588_v37 }
 0xb18   : > { %v3996_v35 = vpop.xlane.xlu0 %3995 }
 0xb19   : > { %6345 = vrcp.f32 %v3996_v35 }
 0xb1a   : > { %6347 = vrcp.f32 %v3999_v25 }
 0xb1b   : > { %6349 = vrcp.f32 %v4002_v21  ;;  %v6342_v53 = vpop.eup %6341 }
 0xb1c   : > { %v4005_v4 = vpop.xlane.xlu0 %4004  ;;  %v6344_v14 = vpop.eup %6343  ;;  %v4151_v10 = vmul.f32 %v6342_v53, %v7594_v30 }
 0xb1d   : > { %6351 = vrcp.f32 %v4005_v4  ;;  %v4152_v45 = vmul.f32 %v6344_v14, %v7592_v28 }
 0xb23   : > { %v6346_v11 = vpop.eup %6345 }
 0xb24   : > { %v6348_v42 = vpop.eup %6347  ;;  %v4153_v17 = vmul.f32 %v6346_v11, %v7598_v6 }
 0xb25   : > { %v6350_v44 = vpop.eup %6349  ;;  %v4154_v37 = vmul.f32 %v6348_v42, %v7596_v55 }
 0xb26   : > { %v4155_v30 = vmul.f32 %v6350_v44, %v7602_v41 }
 0xb27   : > { %v6352_v22 = vpop.eup %6351 }
 0xb28   : > { %v4156_v39 = vmul.f32 %v6352_v22, %v7600_v62 }
 0xb2d   : > { %v5727_v24 = vpop.f32.mrb[34].mxu0 }
 0xb2e   : > { %v3602_v43 = vpop.f32.mrb[35].mxu0  ;;  %v3642_v31 = vmul.f32 %v6324_v58, %v5727_v24 }
 0xb2f   : > { %v3641_v59 = vmul.f32 %v6322_v9, %v3602_v43 }
 0xb31   : > { %v5730_v52 = vpop.f32.mrb[36].mxu0  ;;  %5739 = vmatprep.mubr.msk.f32.mxu0 %vm764_vm1, %v3641_v59 }
 0xb32   : > { %v3612_v18 = vpop.f32.mrb[37].mxu0  ;;  %5740 = vmatmul.mubr.msk.f32.vlgmr.msra.gmra.mrb[18].mxu0 %vm764_vm1, %v3642_v31  ;;  %v3644_v12 = vmul.f32 %v6328_v20, %v5730_v52 }
 0xb33   : > { %v3643_v50 = vmul.f32 %v6326_v26, %v3612_v18  ;;  %5784 = vmatpush3.msk.msra.mxu0 %vm1518_vm4, %v7584_v61 }
 0xb35   : > { %v5733_v47 = vpop.f32.mrb[38].mxu0  ;;  %5742 = vmatprep.mubr.msk.f32.mxu0 %vm764_vm1, %v3643_v50 }
 0xb36   : > { %v3622_v36 = vpop.f32.mrb[39].mxu0  ;;  %5743 = vmatmul.mubr.msk.f32.gmra.mrb[20].mxu0 %vm764_vm1, %v3644_v12  ;;  %v3646_v8 = vmul.f32 %v6332_v34, %v5733_v47  ;;  %v4665_v12 = vrot.slane %v7584_v61, 4 }
 0xb37   : > { %v3645_v54 = vmul.f32 %v6330_v2, %v3622_v36 }
 0xb39   : > { %v5736_v23 = vpop.f32.mrb[40].mxu0  ;;  %5745 = vmatprep.mubr.msk.f32.mxu0 %vm764_vm1, %v3645_v54 }
 0xb3a   : > { %v3632_v1 = vpop.f32.mrb[41].mxu0  ;;  %5746 = vmatmul.mubr.msk.f32.gmra.mrb[22].mxu0 %vm764_vm1, %v3646_v8  ;;  %v3648_v15 = vmul.f32 %v6338_v0, %v5736_v23 }
 0xb3b   : > { %v3647_v19 = vmul.f32 %v6334_v16, %v3632_v1 }
 0xb3d   : > { %5748 = vmatprep.mubr.msk.f32.mxu0 %vm764_vm1, %v3647_v19 }
 0xb3e   : > { %5749 = vmatmul.mubr.msk.f32.gmra.mrb[24].mxu0 %vm764_vm1, %v3648_v15 }
 0xb3f   : > { %5785 = vmatprep.mubr.msk.f32.mxu0 %vm764_vm1, %v4149_v29 }
 0xb42   : > { %5786 = vmatmul.mubr.msk.f32.vlgmr.msra.gmra.mrb[18].mxu0 %vm764_vm1, %v4150_v7 }
 0xb43   : > { %5788 = vmatprep.mubr.msk.f32.mxu0 %vm764_vm1, %v4151_v10 }
 0xb46   : > { %5789 = vmatmul.mubr.msk.f32.gmra.mrb[20].mxu0 %vm764_vm1, %v4152_v45 }
 0xb47   : > { %5791 = vmatprep.mubr.msk.f32.mxu0 %vm764_vm1, %v4153_v17 }
 0xb4a   : > { %5792 = vmatmul.mubr.msk.f32.gmra.mrb[22].mxu0 %vm764_vm1, %v4154_v37 }
 0xb4b   : > { %5794 = vmatprep.mubr.msk.f32.mxu0 %vm764_vm1, %v4155_v30 }
 0xb4e   : > { %5795 = vmatmul.mubr.msk.f32.gmra.mrb[24].mxu0 %vm764_vm1, %v4156_v39 }
 0xb7f   : > { %v4447_v28 = vpop.xlane.xlu0 %4446 }
 0xb80   : > { %v4467_v6 = vsub.f32 %v7604_v40, %v4447_v28  ;;  %v4444_v51 = vpop.xlane.xlu1 %4443 }
 0xb81   : > { %v4466_v5 = vsub.f32 %v7606_v13, %v4444_v51 }
 0xb82   : > { %v4476_v46 = vmul.f32 1.442695, %v4467_v6 }
 0xb83   : > { %v4474_v3 = vmul.f32 1.442695, %v4466_v5  ;;  %v4453_v55 = vpop.xlane.xlu0 %4452 }
 0xb84   : > { %6353 = vpow2.f32 %v4476_v46  ;;  %v4469_v41 = vsub.f32 %v7612_v48, %v4453_v55  ;;  %v4450_v63 = vpop.xlane.xlu1 %4449 }
 0xb85   : > { %6355 = vpow2.f32 %v4474_v3  ;;  %v4468_v24 = vsub.f32 %v7614_v27, %v4450_v63 }
 0xb86   : > { %v4480_v49 = vmul.f32 1.442695, %v4469_v41 }
 0xb87   : > { %v4459_v62 = vpop.xlane.xlu0 %4458  ;;  %v4478_v40 = vmul.f32 1.442695, %v4468_v24 }
 0xb88   : > { %v4456_v9 = vpop.xlane.xlu1 %4455  ;;  %6357 = vpow2.f32 %v4480_v49  ;;  %v4471_v58 = vsub.f32 %v7620_v32, %v4459_v62 }
 0xb89   : > { %v4470_v43 = vsub.f32 %v7622_v56, %v4456_v9 }
 0xb8a   : > { %v4484_v31 = vmul.f32 1.442695, %v4471_v58 }
 0xb8b   : > { %v4482_v13 = vmul.f32 1.442695, %v4470_v43  ;;  %v4465_v26 = vpop.xlane.xlu0 %4464  ;;  %v5135_v43 = vld [vmem:[%s7726_s9] ss:$0 sm:$0xff] }
 0xb8c   : > { %v4462_v25 = vpop.xlane.xlu1 %4461  ;;  %v4473_v32 = vsub.f32 %v7628_v33, %v4465_v26 }
 0xb8d   : > { %6359 = vpow2.f32 %v4482_v13  ;;  %v4472_v48 = vsub.f32 %v7630_v60, %v4462_v25 }
 0xb8e   : > { %v6354_v59 = vpop.eup %6353  ;;  %6361 = vpow2.f32 %v4478_v40  ;;  %v4488_v2 = vmul.f32 1.442695, %v4473_v32 }
 0xb8f   : > { %v6356_v52 = vpop.eup %6355  ;;  %v4493_v27 = vsel %vm900_vm3, %v6354_v59, 0.0  ;;  %6363 = vpow2.f32 %v4484_v31  ;;  %v4486_v50 = vmul.f32 1.442695, %v4472_v48 }
 0xb90   : > { %v6122_v18 = vpop.permute.xlu1 %6121  ;;  %4494 = vadd.xlane.f32.xlu0 %v4493_v27  ;;  %5817 = vmatprep.mubr.msk.f32.mxu0 %vm900_vm3, %v6356_v52  ;;  %v4490_v47 = vsel %vm900_vm3, %v6356_v52, 0.0 }
 0xb91   : > { %v6124_v56 = vunpack.i.h.bf16 %v6122_v18  ;;  %v6123_v20 = vunpack.i.l.bf16 %v6122_v18  ;;  %6365 = vpow2.f32 %v4486_v50 }
 0xb92   : > { %v6358_v60 = vpop.eup %6357  ;;  %6367 = vpow2.f32 %v4488_v2 }
 0xb93   : > { %v5967_v35 = vpack.c.bf16 %v6124_v56, %v6123_v20  ;;  %v4499_v34 = vsel %vm900_vm3, %v6358_v60, 0.0 }
 0xb94   : > { %4491 = vadd.xlane.f32.xlu0 %v4490_v47 }
 0xb95   : > { %5968 = vmatprep.subr.bf16.mxu0 %v5967_v35 }
 0xb96   : > { %5970 = vmatpush3.bf16.msra.mxu0 %v5967_v35 }
 0xb97   : > { %v6360_v36 = vpop.eup %6359  ;;  %5829 = vmatprep.subr.msk.mxu0 %vm1518_vm4, %v4665_v12 }
 0xb98   : > { %v6362_v54 = vpop.eup %6361  ;;  %4500 = vadd.xlane.f32.xlu0 %v4499_v34  ;;  %v4502_v33 = vsel %vm900_vm3, %v6360_v36, 0.0 }
 0xb99   : > { %4503 = vadd.xlane.f32.xlu1 %v4502_v33  ;;  %5818 = vmatmul.mubr.msk.f32.vlgmr.msra.gmra.mrb[42].mxu0 %vm900_vm3, %v6354_v59  ;;  %v4496_v61 = vsel %vm900_vm3, %v6362_v54, 0.0  ;;  %v6364_v8 = vpop.eup %6363 }
 0xb9a   : > { %5820 = vmatprep.mubr.msk.f32.mxu0 %vm900_vm3, %v6362_v54  ;;  %5830 = vmatpush3.msk.msra.mxu0 %vm1518_vm4, %v4665_v12  ;;  %v4505_v16 = vsel %vm900_vm3, %v6364_v8, 0.0 }
 0xb9b   : > { %v6366_v21 = vpop.eup %6365 }
 0xb9c   : > { %4497 = vadd.xlane.f32.xlu0 %v4496_v61  ;;  %v4508_v23 = vsel %vm900_vm3, %v6366_v21, 0.0  ;;  %v6368_v38 = vpop.eup %6367 }
 0xb9d   : > { %5821 = vmatmul.mubr.msk.f32.gmra.mrb[44].mxu0 %vm900_vm3, %v6358_v60  ;;  %v4511_v1 = vsel %vm900_vm3, %v6368_v38, 0.0 }
 0xb9e   : > { %5823 = vmatprep.mubr.msk.f32.mxu0 %vm900_vm3, %v6360_v36 }
 0xba0   : > { %4506 = vadd.xlane.f32.xlu0 %v4505_v16 }
 0xba1   : > { %5824 = vmatmul.mubr.msk.f32.gmra.mrb[46].mxu0 %vm900_vm3, %v6364_v8 }
 0xba2   : > { %5826 = vmatprep.mubr.msk.f32.mxu0 %vm900_vm3, %v6366_v21 }
 0xba4   : > { %4509 = vadd.xlane.f32.xlu0 %v4508_v23 }
 0xba5   : > { %5827 = vmatmul.mubr.msk.f32.gmra.mrb[48].mxu0 %vm900_vm3, %v6368_v38 }
 0xba8   : > { %4512 = vadd.xlane.f32.xlu0 %v4511_v1 }
 0xc1d   : > { %v4495_v0 = vpop.xlane.xlu0 %4494 }
 0xc21   : > { %v4492_v19 = vpop.xlane.xlu0 %4491 }
 0xc22   : > { %6369 = vrcp.f32 %v4492_v19 }
 0xc23   : > { %6371 = vrcp.f32 %v4495_v0 }
 0xc25   : > { %v4501_v4 = vpop.xlane.xlu0 %4500 }
 0xc26   : > { %v4504_v53 = vpop.xlane.xlu1 %4503 }
 0xc29   : > { %v4498_v15 = vpop.xlane.xlu0 %4497 }
 0xc2a   : > { %6373 = vrcp.f32 %v4498_v15 }
 0xc2b   : > { %6375 = vrcp.f32 %v4501_v4 }
 0xc2c   : > { %6377 = vrcp.f32 %v4504_v53  ;;  %v6370_v14 = vpop.eup %6369 }
 0xc2d   : > { %v4507_v57 = vpop.xlane.xlu0 %4506  ;;  %v6372_v45 = vpop.eup %6371 }
 0xc2e   : > { %6379 = vrcp.f32 %v4507_v57 }
 0xc31   : > { %v4510_v29 = vpop.xlane.xlu0 %4509 }
 0xc32   : > { %6381 = vrcp.f32 %v4510_v29 }
 0xc34   : > { %v6374_v37 = vpop.eup %6373 }
 0xc35   : > { %v4513_v10 = vpop.xlane.xlu0 %4512  ;;  %v6376_v30 = vpop.eup %6375 }
 0xc36   : > { %6383 = vrcp.f32 %v4513_v10  ;;  %v6378_v51 = vpop.eup %6377 }
 0xc38   : > { %v6380_v46 = vpop.eup %6379 }
 0xc3c   : > { %v6382_v63 = vpop.eup %6381 }
 0xc40   : > { %v6384_v24 = vpop.eup %6383 }
 0xc6c   : > { %v5819_v7 = vpop.f32.mrb[42].mxu0 }
 0xc6d   : > { %v4618_v11 = vpop.f32.mrb[43].mxu0  ;;  %v4658_v17 = vmul.f32 %v6372_v45, %v5819_v7 }
 0xc6e   : > { %v4657_v42 = vmul.f32 %v6370_v14, %v4618_v11 }
 0xc70   : > { %v5822_v44 = vpop.f32.mrb[44].mxu0  ;;  %5831 = vmatprep.mubr.msk.f32.mxu0 %vm764_vm1, %v4657_v42 }
 0xc71   : > { %v4628_v22 = vpop.f32.mrb[45].mxu0  ;;  %5832 = vmatmul.mubr.msk.f32.vlgmr.msra.gmra.mrb[18].mxu0 %vm764_vm1, %v4658_v17  ;;  %v4660_v28 = vmul.f32 %v6376_v30, %v5822_v44 }
 0xc72   : > { %v4659_v39 = vmul.f32 %v6374_v37, %v4628_v22 }
 0xc74   : > { %v5825_v6 = vpop.f32.mrb[46].mxu0  ;;  %5834 = vmatprep.mubr.msk.f32.mxu0 %vm764_vm1, %v4659_v39 }
 0xc75   : > { %v4638_v5 = vpop.f32.mrb[47].mxu0  ;;  %5835 = vmatmul.mubr.msk.f32.gmra.mrb[20].mxu0 %vm764_vm1, %v4660_v28  ;;  %v4662_v55 = vmul.f32 %v6380_v46, %v5825_v6 }
 0xc76   : > { %v4661_v3 = vmul.f32 %v6378_v51, %v4638_v5 }
 0xc78   : > { %v5828_v41 = vpop.f32.mrb[48].mxu0  ;;  %5837 = vmatprep.mubr.msk.f32.mxu0 %vm764_vm1, %v4661_v3 }
 0xc79   : > { %v4648_v49 = vpop.f32.mrb[49].mxu0  ;;  %5838 = vmatmul.mubr.msk.f32.gmra.mrb[22].mxu0 %vm764_vm1, %v4662_v55  ;;  %v4664_v9 = vmul.f32 %v6384_v24, %v5828_v41 }
 0xc7a   : > { %v4663_v62 = vmul.f32 %v6382_v63, %v4648_v49 }
 0xc7c   : > { %5840 = vmatprep.mubr.msk.f32.mxu0 %vm764_vm1, %v4663_v62 }
 0xc7d   : > { %5841 = vmatmul.mubr.msk.f32.gmra.mrb[24].mxu0 %vm764_vm1, %v4664_v9 }
 0xd44   : > { %v5833_v40 = vpop.f32.mrb[18].mxu0 }
 0xd45   : > { %v4813_v58 = vadd.f32 %v5833_v40, %v5135_v43  ;;  %v4758_v13 = vpop.f32.mrb[19].mxu0 }
 0xd46   : > { %v4812_v25 = vadd.f32 %v5135_v43, %v4758_v13 }
 0xd47   : > { %4821 = vst.msk [vmem:[%s379_s19 + $0x8] sm:$0xff] %vm392_vm0, %v4813_v58 }
 0xd48   : > { %4820 = vst.msk [vmem:[%s379_s19] sm:$0xff] %vm392_vm0, %v4812_v25  ;;  %v5836_v59 = vpop.f32.mrb[20].mxu0 }
 0xd49   : > { %v4815_v31 = vadd.f32 %v5836_v59, %v5135_v43  ;;  %v4768_v48 = vpop.f32.mrb[21].mxu0 }
 0xd4a   : > { %v4814_v52 = vadd.f32 %v5135_v43, %v4768_v48 }
 0xd4b   : > { %4823 = vst.msk [vmem:[%s379_s19 + $0x18] sm:$0xff] %vm392_vm0, %v4815_v31 }
 0xd4c   : > { %4822 = vst.msk [vmem:[%s379_s19 + $0x10] sm:$0xff] %vm392_vm0, %v4814_v52  ;;  %v5839_v26 = vpop.f32.mrb[22].mxu0 }
 0xd4d   : > { %v4817_v27 = vadd.f32 %v5839_v26, %v5135_v43  ;;  %v4778_v18 = vpop.f32.mrb[23].mxu0 }
 0xd4e   : > { %v4816_v56 = vadd.f32 %v5135_v43, %v4778_v18 }
 0xd4f   : > { %4825 = vst.msk [vmem:[%s379_s19 + $0x28] sm:$0xff] %vm392_vm0, %v4817_v27 }
 0xd50   : > { %4824 = vst.msk [vmem:[%s379_s19 + $0x20] sm:$0xff] %vm392_vm0, %v4816_v56  ;;  %v5842_v20 = vpop.f32.mrb[24].mxu0 }
 0xd51   : > { %v4819_v32 = vadd.f32 %v5842_v20, %v5135_v43  ;;  %v4788_v50 = vpop.f32.mrb[25].mxu0 }
 0xd52   : > { %v4818_v12 = vadd.f32 %v5135_v43, %v4788_v50 }
 0xd53   : > { %4827 = vst.msk [vmem:[%s379_s19 + $0x38] sm:$0xff] %vm392_vm0, %v4819_v32 }
 0xd54   : > { %4826 = vst.msk [vmem:[%s379_s19 + $0x30] sm:$0xff] %vm392_vm0, %v4818_v12 }
 0xd55 PF: > { %s20_s13 = sadd.s32 1, %s6391_s13  }
 0xd56   : > { %p17_p4 = scmp.ge.s32.totalorder %s20_s13, 4  }
 0xd58   :  { %19 = sbr.rel (!%p17_p4) target bundleno = 1 (0x1), region = 93 }

</bundles_post_ra>
